<compile_context>
chip_gen: v6e
topology: v6e:2x2x1
jax: 0.10.0
libtpu: 0.0.40
codegen_flags: <defaults>
</compile_context>

<pallas_src>
import functools

import jax
import jax.numpy as jnp
from jax import lax
from jax.experimental import pallas as pl
from jax.experimental.pallas import tpu as pltpu

NEG = -1e9            # additive attention-mask value / viterbi pad score
CRF_PAD = -10000.0    # matches the reference forward-algorithm constant
TAGS_PADDED = 128     # lane-dense CRF tag axis

# TODO(synk): set to jnp.bfloat16 for production XLM-R shapes on v6e/v7x
# (accumulation stays f32 via preferred_element_type); f32 keeps numerics
# closest to the PyTorch reference at these toy sizes.
COMPUTE_DTYPE = jnp.float32

VMEM_SPEC = pl.BlockSpec(memory_space=pltpu.MemorySpace.VMEM)


def _row_tile(m):
    # Largest convenient row tile: 256 when divisible (real shapes); otherwise
    # split in two (keeps a parallel grid axis for megacore) if 8-aligned.
    if m % 256 == 0:
        return 256
    if m % 16 == 0:
        return m // 2
    return m


def _k_tile(k):
    return 512 if k % 512 == 0 else k


# ----------------------------------------------------------------------------
# Grid-tiled linear kernels (f32 accumulator scratch, fused epilogues)
# ----------------------------------------------------------------------------
def _linear_kernel(x_ref, w_ref, b_ref, o_ref, acc_ref, *, activation):
    @pl.when(pl.program_id(1) == 0)
    def _():
        acc_ref[...] = jnp.zeros_like(acc_ref)

    acc_ref[...] += jnp.dot(x_ref[...].astype(COMPUTE_DTYPE),
                            w_ref[...].astype(COMPUTE_DTYPE),
                            preferred_element_type=jnp.float32)

    @pl.when(pl.program_id(1) == pl.num_programs(1) - 1)
    def _():
        y = acc_ref[...] + b_ref[...]
        if activation == "gelu":
            # TODO(synk): HF XLM-R uses exact erf-GELU; tanh approximation here.
            y = jax.nn.gelu(y, approximate=True)
        o_ref[...] = y


def _linear_res_ln_kernel(x_ref, w_ref, b_ref, res_ref, g_ref, bb_ref,
                          o_ref, acc_ref, *, eps):
    @pl.when(pl.program_id(1) == 0)
    def _():
        acc_ref[...] = jnp.zeros_like(acc_ref)

    acc_ref[...] += jnp.dot(x_ref[...].astype(COMPUTE_DTYPE),
                            w_ref[...].astype(COMPUTE_DTYPE),
                            preferred_element_type=jnp.float32)

    @pl.when(pl.program_id(1) == pl.num_programs(1) - 1)
    def _():
        y = acc_ref[...] + b_ref[...] + res_ref[...]     # bias + residual
        mu = jnp.mean(y, axis=-1, keepdims=True)
        yc = y - mu
        var = jnp.mean(yc * yc, axis=-1, keepdims=True)
        o_ref[...] = yc * lax.rsqrt(var + eps) * g_ref[...] + bb_ref[...]


def linear(x, w, b, activation=None):
    m, k = x.shape
    n = w.shape[1]
    tm, tk = _row_tile(m), _k_tile(k)
    return pl.pallas_call(
        functools.partial(_linear_kernel, activation=activation),
        out_shape=jax.ShapeDtypeStruct((m, n), jnp.float32),
        grid=(m // tm, k // tk),
        in_specs=[pl.BlockSpec((tm, tk), lambda i, j: (i, j)),
                  pl.BlockSpec((tk, n), lambda i, j: (j, 0)),
                  pl.BlockSpec((1, n), lambda i, j: (0, 0))],
        out_specs=pl.BlockSpec((tm, n), lambda i, j: (i, 0)),
        scratch_shapes=[pltpu.VMEM((tm, n), jnp.float32)],
        compiler_params=pltpu.CompilerParams(
            dimension_semantics=("parallel", "arbitrary")),
    )(x, w, b.reshape(1, n))


def linear_residual_layernorm(x, w, b, residual, gamma, beta, eps=1e-5):
    m, k = x.shape
    n = w.shape[1]
    tm, tk = _row_tile(m), _k_tile(k)
    return pl.pallas_call(
        functools.partial(_linear_res_ln_kernel, eps=eps),
        out_shape=jax.ShapeDtypeStruct((m, n), jnp.float32),
        grid=(m // tm, k // tk),
        in_specs=[pl.BlockSpec((tm, tk), lambda i, j: (i, j)),
                  pl.BlockSpec((tk, n), lambda i, j: (j, 0)),
                  pl.BlockSpec((1, n), lambda i, j: (0, 0)),
                  pl.BlockSpec((tm, n), lambda i, j: (i, 0)),
                  pl.BlockSpec((1, n), lambda i, j: (0, 0)),
                  pl.BlockSpec((1, n), lambda i, j: (0, 0))],
        out_specs=pl.BlockSpec((tm, n), lambda i, j: (i, 0)),
        scratch_shapes=[pltpu.VMEM((tm, n), jnp.float32)],
        compiler_params=pltpu.CompilerParams(
            dimension_semantics=("parallel", "arbitrary")),
    )(x, w, b.reshape(1, n), residual, gamma.reshape(1, n), beta.reshape(1, n))


# ----------------------------------------------------------------------------
# Standalone LayerNorm (embeddings only)
# ----------------------------------------------------------------------------
def _layernorm_kernel(x_ref, g_ref, b_ref, o_ref, *, eps):
    x = x_ref[...]
    mu = jnp.mean(x, axis=-1, keepdims=True)
    xc = x - mu
    var = jnp.mean(xc * xc, axis=-1, keepdims=True)
    o_ref[...] = xc * lax.rsqrt(var + eps) * g_ref[...] + b_ref[...]


def layernorm(x, g, b, eps=1e-5):
    m, d = x.shape
    tm = _row_tile(m)
    return pl.pallas_call(
        functools.partial(_layernorm_kernel, eps=eps),
        out_shape=jax.ShapeDtypeStruct((m, d), jnp.float32),
        grid=(m // tm,),
        in_specs=[pl.BlockSpec((tm, d), lambda i: (i, 0)),
                  pl.BlockSpec((1, d), lambda i: (0, 0)),
                  pl.BlockSpec((1, d), lambda i: (0, 0))],
        out_specs=pl.BlockSpec((tm, d), lambda i: (i, 0)),
        compiler_params=pltpu.CompilerParams(dimension_semantics=("parallel",)),
    )(x, g.reshape(1, d), b.reshape(1, d))


# ----------------------------------------------------------------------------
# Self-attention: per-batch kernel over the fused [B, S, 3D] QKV tensor
# ----------------------------------------------------------------------------
def _attention_kernel(qkv_ref, bias_ref, o_ref, *, heads, head_dim, scale):
    d = heads * head_dim
    qkv = qkv_ref[0].astype(COMPUTE_DTYPE)               # [S, 3D]
    q, k, v = qkv[:, :d], qkv[:, d:2 * d], qkv[:, 2 * d:]
    bias = bias_ref[0]                                   # [1, S] (keys masked)
    outs = []
    for h in range(heads):                               # static loop over heads
        sl = slice(h * head_dim, (h + 1) * head_dim)
        # 'nt' contraction directly on the MXU — no explicit K transpose (XLU).
        s = lax.dot_general(q[:, sl], k[:, sl], (((1,), (1,)), ((), ())),
                            preferred_element_type=jnp.float32) * scale
        s = s + bias
        mx = jnp.max(s, axis=-1, keepdims=True)
        p = jnp.exp(s - mx)
        p = p * pl.reciprocal(jnp.sum(p, axis=-1, keepdims=True), approx=True)
        outs.append(jnp.dot(p.astype(COMPUTE_DTYPE), v[:, sl],
                            preferred_element_type=jnp.float32))
    o_ref[0] = jnp.concatenate(outs, axis=-1)            # single lane-dense store


def attention(qkv, bias, heads):
    b, s, three_d = qkv.shape
    d = three_d // 3
    head_dim = d // heads
    return pl.pallas_call(
        functools.partial(_attention_kernel, heads=heads, head_dim=head_dim,
                          scale=1.0 / head_dim ** 0.5),
        out_shape=jax.ShapeDtypeStruct((b, s, d), jnp.float32),
        grid=(b,),
        in_specs=[pl.BlockSpec((1, s, three_d), lambda i: (i, 0, 0)),
                  pl.BlockSpec((1, 1, s), lambda i: (i, 0, 0))],
        out_specs=pl.BlockSpec((1, s, d), lambda i: (i, 0, 0)),
        compiler_params=pltpu.CompilerParams(dimension_semantics=("parallel",)),
    )(qkv, bias)


# ----------------------------------------------------------------------------
# Fused CRF kernel: NLL loss (mean) + Viterbi decode in one pallas_call
# ----------------------------------------------------------------------------
def _crf_kernel(em_ref, tags_ref, mask_ref, trans_ref, loss_ref, pred_ref,
                hist_ref, *, seq_len, batch, num_tags, tp):
    trans = trans_ref[...]                                    # [TP, TP] (pad = 0)
    lane = lax.broadcasted_iota(jnp.int32, (batch, tp), 1)    # [B, TP]
    valid = lane < num_tags

    # ----- gold-path score (reference _score_sentence) -----
    oh0 = (lane == tags_ref[0]).astype(jnp.float32)           # [B, TP]
    score0 = jnp.sum(em_ref[0] * oh0, axis=1, keepdims=True)  # [B, 1]

    def score_body(i, carry):
        score, prev_oh = carry
        oh = (lane == tags_ref[i]).astype(jnp.float32)
        mask_i = mask_ref[i]                                  # [B, 1]
        emit = jnp.sum(em_ref[i] * oh, axis=1, keepdims=True)
        # transitions[prev_tag, curr_tag] via a small matmul (no [B,TP,TP] outer)
        tsc = jnp.sum(jnp.dot(prev_oh, trans,
                              preferred_element_type=jnp.float32) * oh,
                      axis=1, keepdims=True)
        return score + (emit + tsc) * mask_i, oh

    gold, _ = lax.fori_loop(1, seq_len, score_body, (score0, oh0))

    # ----- log partition (reference _forward_algorithm) -----
    alphas0 = jnp.where(lane == 0, jnp.float32(0.0), jnp.float32(CRF_PAD))

    def fwd_body(i, alphas):
        em_i = em_ref[i]
        mask_i = mask_ref[i]
        bc = alphas[:, :, None] + trans[None, :, :]           # [B, TP, TP]
        mx = jnp.max(bc, axis=1)
        nts = mx + jnp.log(jnp.sum(jnp.exp(bc - mx[:, None, :]), axis=1))
        new = mask_i * (nts + em_i) + (1.0 - mask_i) * alphas
        return jnp.where(valid, new, jnp.float32(CRF_PAD))    # keep pad tags inert

    alphas = lax.fori_loop(0, seq_len, fwd_body, alphas0)
    mx = jnp.max(alphas, axis=1, keepdims=True)
    log_z = mx + jnp.log(jnp.sum(jnp.exp(alphas - mx), axis=1, keepdims=True))
    loss = log_z - gold                                       # [B, 1]
    loss_ref[...] = jnp.sum(loss, axis=0, keepdims=True) * (1.0 / batch)  # mean

    # ----- Viterbi decode (reference _viterbi_decode) -----
    src = lax.broadcasted_iota(jnp.int32, (batch, tp, tp), 1)  # hoisted iota
    scores0 = jnp.where(valid, em_ref[0], NEG)                 # i == 0: emissions only

    def vit_body(i, scores):
        bc = scores[:, :, None] + trans[None, :, :]
        mk = jnp.max(bc, axis=1, keepdims=True)
        hist_ref[i] = jnp.min(jnp.where(bc >= mk, src, tp), axis=1)  # first argmax
        new = jnp.max(bc, axis=1) + em_ref[i] * mask_ref[i]
        return jnp.where(valid, new, NEG)

    scores = lax.fori_loop(1, seq_len, vit_body, scores0)

    mf = jnp.max(scores, axis=1, keepdims=True)
    final_tag = jnp.min(jnp.where(scores >= mf, lane, tp), axis=1, keepdims=True)
    pred_ref[seq_len - 1] = final_tag

    def back_body(t, tag):
        j = seq_len - 2 - t
        prev = jnp.sum(jnp.where(lane == tag, hist_ref[j + 1], 0),
                       axis=1, keepdims=True)
        pred_ref[j] = prev
        return prev

    lax.fori_loop(0, seq_len - 1, back_body, final_tag)


def crf_loss_and_decode(emissions_padded, tags, mask, trans_padded, num_tags):
    # emissions_padded: [S, B, TP] time-major (reference transposes to seq-first)
    s, b, tp = emissions_padded.shape
    tg = jnp.transpose(tags, (1, 0)).astype(jnp.int32)[:, :, None]
    mk = jnp.transpose(mask, (1, 0)).astype(jnp.float32)[:, :, None]
    loss, preds = pl.pallas_call(
        functools.partial(_crf_kernel, seq_len=s, batch=b,
                          num_tags=num_tags, tp=tp),
        out_shape=(jax.ShapeDtypeStruct((1, 1), jnp.float32),
                   jax.ShapeDtypeStruct((s, b, 1), jnp.int32)),
        in_specs=[VMEM_SPEC] * 4,
        out_specs=(VMEM_SPEC, VMEM_SPEC),
        scratch_shapes=[pltpu.VMEM((s, b, tp), jnp.int32)],
    )(emissions_padded, tg, mk, trans_padded)
    return loss[0, 0], preds[:, :, 0]


# ----------------------------------------------------------------------------
# Parameter init + full model forward (synthetic XLM-R-like encoder + CRF)
# ----------------------------------------------------------------------------
CFG = dict(vocab=100, max_pos=32, hidden=32, heads=4, intermediate=64,
           layers=2, num_labels=5)


def init_params(key, cfg):
    d, i_dim, n_layers = cfg["hidden"], cfg["intermediate"], cfg["layers"]
    v, p_max, t = cfg["vocab"], cfg["max_pos"], cfg["num_labels"]
    tp = TAGS_PADDED
    keys = iter(jax.random.split(key, 64))
    nrm = lambda shape: 0.02 * jax.random.normal(next(keys), shape, jnp.float32)

    cls_w = nrm((d, t))
    params = {
        "word_emb": nrm((v, d)),
        "pos_emb": nrm((p_max, d)),
        "type_emb": nrm((1, d)),
        "emb_ln_g": jnp.ones((d,), jnp.float32),
        "emb_ln_b": jnp.zeros((d,), jnp.float32),
        # classifier weights padded to the lane-dense CRF tag axis (extra
        # columns are zero -> zero logits, masked out inside the CRF kernel).
        "cls_w": jnp.zeros((d, tp), jnp.float32).at[:, :t].set(cls_w),
        "cls_b": jnp.zeros((tp,), jnp.float32),
        "layers": [],
    }
    for _ in range(n_layers):
        wq, wk, wv = nrm((d, d)), nrm((d, d)), nrm((d, d))
        params["layers"].append(dict(
            w_qkv=jnp.concatenate([wq, wk, wv], axis=1),      # fused [D, 3D]
            b_qkv=jnp.zeros((3 * d,), jnp.float32),
            wo=nrm((d, d)), bo=jnp.zeros((d,), jnp.float32),
            ln1_g=jnp.ones((d,), jnp.float32), ln1_b=jnp.zeros((d,), jnp.float32),
            w1=nrm((d, i_dim)), b1=jnp.zeros((i_dim,), jnp.float32),
            w2=nrm((i_dim, d)), b2=jnp.zeros((d,), jnp.float32),
            ln2_g=jnp.ones((d,), jnp.float32), ln2_b=jnp.zeros((d,), jnp.float32),
        ))
    # CRF transitions: uniform(-0.1, 0.1); transitions[0, 2] = -10.0 (reference)
    tr = jax.random.uniform(next(keys), (t, t), jnp.float32,
                            minval=-0.1, maxval=0.1)
    tr = tr.at[0, 2].set(-10.0)
    params["transitions"] = jnp.zeros((tp, tp), jnp.float32).at[:t, :t].set(tr)
    return params


def model_forward(params, input_ids, attention_mask, labels):
    b, s = input_ids.shape
    d, h, t = CFG["hidden"], CFG["heads"], CFG["num_labels"]

    # embeddings (gather lookups stay in plain JAX)
    x = (params["word_emb"][input_ids]
         + params["pos_emb"][jnp.arange(s)][None, :, :]
         + params["type_emb"][0][None, None, :]).reshape(b * s, d)
    x = layernorm(x, params["emb_ln_g"], params["emb_ln_b"])

    # additive attention bias, broadcast over heads & query positions
    bias = ((1.0 - attention_mask.astype(jnp.float32)) * NEG)[:, None, :]  # [B,1,S]

    for lp in params["layers"]:
        qkv = linear(x, lp["w_qkv"], lp["b_qkv"])                    # [B*S, 3D]
        attn = attention(qkv.reshape(b, s, 3 * d), bias, h)          # [B, S, D]
        x = linear_residual_layernorm(attn.reshape(b * s, d), lp["wo"], lp["bo"],
                                      residual=x, gamma=lp["ln1_g"],
                                      beta=lp["ln1_b"])
        f = linear(x, lp["w1"], lp["b1"], activation="gelu")
        x = linear_residual_layernorm(f, lp["w2"], lp["b2"],
                                      residual=x, gamma=lp["ln2_g"],
                                      beta=lp["ln2_b"])

    # classifier produces lane-dense padded logits; self.dropout = identity (eval)
    logits_padded = linear(x, params["cls_w"], params["cls_b"]).reshape(b, s, -1)
    logits = logits_padded[:, :, :t]

    emissions = jnp.transpose(logits_padded, (1, 0, 2))              # [S, B, TP]
    loss, preds = crf_loss_and_decode(emissions, labels, attention_mask,
                                      params["transitions"], num_tags=t)
    # reference CRF.decode with batch_first=True returns [seq_len, batch]
    return {"logits": logits, "loss": loss, "predictions": preds}


if __name__ == "__main__":
    B, S = 2, 8
    key = jax.random.PRNGKey(0)
    k_p, k_ids, k_lab = jax.random.split(key, 3)

    params = init_params(k_p, CFG)
    input_ids = jax.random.randint(k_ids, (B, S), 0, CFG["vocab"], jnp.int32)
    attention_mask = jnp.array([[1, 1, 1, 1, 1, 1, 1, 1],
                                [1, 1, 1, 1, 1, 1, 0, 0]], jnp.int32)
    labels = jax.random.randint(k_lab, (B, S), 0, CFG["num_labels"], jnp.int32)

    fwd = jax.jit(model_forward)
    out = fwd(params, input_ids, attention_mask, labels)
    jax.block_until_ready(out)

    assert out["logits"].shape == (B, S, CFG["num_labels"])
    assert out["loss"].shape == ()
    assert out["predictions"].shape == (S, B)  # reference decode returns [seq, batch]
    print("KERNEL_OK")
</pallas_src>

<mosaic_0001>
module attributes {stable_mosaic.version = 11 : i64} {
  func.func @_layernorm_kernel(%arg0: i32, %arg1: memref<8x32xf32, #tpu.memory_space<vmem>>, %arg2: memref<1x32xf32, #tpu.memory_space<vmem>>, %arg3: memref<1x32xf32, #tpu.memory_space<vmem>>, %arg4: memref<8x32xf32, #tpu.memory_space<vmem>>) attributes {dimension_semantics = [#tpu.dimension_semantics<parallel>], iteration_bounds = array<i64: 2>, scalar_prefetch = 0 : i64, scratch_operands = 0 : i64, tpu.core_type = #tpu.core_type<tc>, window_params = [{transform_indices = @transform_0, window_bounds = array<i64: 8, 32>}, {pipeline_mode = #tpu.pipeline_mode<synchronous>, transform_indices = @transform_1, window_bounds = array<i64: 1, 32>}, {pipeline_mode = #tpu.pipeline_mode<synchronous>, transform_indices = @transform_2, window_bounds = array<i64: 1, 32>}, {transform_indices = @transform_3, window_bounds = array<i64: 8, 32>}]} {
    %c0 = arith.constant 0 : index
    %c0_0 = arith.constant 0 : index
    %0 = vector.load %arg1[%c0, %c0_0] : memref<8x32xf32, #tpu.memory_space<vmem>>, vector<8x32xf32>
    %cst = arith.constant dense<0.000000e+00> : vector<8xf32>
    %1 = vector.multi_reduction <add>, %0, %cst [1] : vector<8x32xf32> to vector<8xf32>
    %2 = vector.shape_cast %1 : vector<8xf32> to vector<8x1xf32>
    %cst_1 = arith.constant 3.200000e+01 : f32
    %3 = vector.broadcast %cst_1 : f32 to vector<8x1xf32>
    %4 = arith.divf %2, %3 : vector<8x1xf32>
    %5 = vector.broadcast %4 : vector<8x1xf32> to vector<8x32xf32>
    %6 = arith.subf %0, %5 : vector<8x32xf32>
    %7 = arith.mulf %6, %6 : vector<8x32xf32>
    %cst_2 = arith.constant dense<0.000000e+00> : vector<8xf32>
    %8 = vector.multi_reduction <add>, %7, %cst_2 [1] : vector<8x32xf32> to vector<8xf32>
    %9 = vector.shape_cast %8 : vector<8xf32> to vector<8x1xf32>
    %cst_3 = arith.constant 3.200000e+01 : f32
    %10 = vector.broadcast %cst_3 : f32 to vector<8x1xf32>
    %11 = arith.divf %9, %10 : vector<8x1xf32>
    %cst_4 = arith.constant 9.99999974E-6 : f32
    %12 = vector.broadcast %cst_4 : f32 to vector<8x1xf32>
    %13 = arith.addf %11, %12 : vector<8x1xf32>
    %14 = math.rsqrt %13 : vector<8x1xf32>
    %15 = vector.broadcast %14 : vector<8x1xf32> to vector<8x32xf32>
    %16 = arith.mulf %6, %15 : vector<8x32xf32>
    %c0_5 = arith.constant 0 : index
    %c0_6 = arith.constant 0 : index
    %17 = vector.load %arg2[%c0_5, %c0_6] : memref<1x32xf32, #tpu.memory_space<vmem>>, vector<1x32xf32>
    %18 = vector.broadcast %17 : vector<1x32xf32> to vector<8x32xf32>
    %19 = arith.mulf %16, %18 : vector<8x32xf32>
    %c0_7 = arith.constant 0 : index
    %c0_8 = arith.constant 0 : index
    %20 = vector.load %arg3[%c0_7, %c0_8] : memref<1x32xf32, #tpu.memory_space<vmem>>, vector<1x32xf32>
    %21 = vector.broadcast %20 : vector<1x32xf32> to vector<8x32xf32>
    %22 = arith.addf %19, %21 : vector<8x32xf32>
    %c0_9 = arith.constant 0 : index
    %c0_10 = arith.constant 0 : index
    %23 = vector.load %arg4[%c0_9, %c0_10] : memref<8x32xf32, #tpu.memory_space<vmem>>, vector<8x32xf32>
    tpu.vector_store %arg4[%c0_9, %c0_10], %22 {strides = array<i32>} : memref<8x32xf32, #tpu.memory_space<vmem>>, vector<8x32xf32>,
    return
  }
  func.func @transform_0(%arg0: i32) -> (i32, i32) {
    %c0_i32 = arith.constant 0 : i32
    %c0_i32_0 = arith.constant 0 : i32
    return %arg0, %c0_i32 : i32, i32
  }
  func.func @transform_1(%arg0: i32) -> (i32, i32) {
    %c0_i32 = arith.constant 0 : i32
    %c0_i32_0 = arith.constant 0 : i32
    %c0_i32_1 = arith.constant 0 : i32
    return %c0_i32, %c0_i32_0 : i32, i32
  }
  func.func @transform_2(%arg0: i32) -> (i32, i32) {
    %c0_i32 = arith.constant 0 : i32
    %c0_i32_0 = arith.constant 0 : i32
    %c0_i32_1 = arith.constant 0 : i32
    return %c0_i32, %c0_i32_0 : i32, i32
  }
  func.func @transform_3(%arg0: i32) -> (i32, i32) {
    %c0_i32 = arith.constant 0 : i32
    %c0_i32_0 = arith.constant 0 : i32
    return %arg0, %c0_i32 : i32, i32
  }
}

module attributes {stable_mosaic.version = 11 : i64} {
  func.func @_linear_kernel(%arg0: i32, %arg1: i32, %arg2: memref<8x32xf32, #tpu.memory_space<vmem>>, %arg3: memref<32x96xf32, #tpu.memory_space<vmem>>, %arg4: memref<1x96xf32, #tpu.memory_space<vmem>>, %arg5: memref<8x96xf32, #tpu.memory_space<vmem>>, %arg6: memref<8x96xf32, #tpu.memory_space<vmem>>) attributes {dimension_semantics = [#tpu.dimension_semantics<parallel>, #tpu.dimension_semantics<arbitrary>], iteration_bounds = array<i64: 2, 1>, scalar_prefetch = 0 : i64, scratch_operands = 1 : i64, tpu.core_type = #tpu.core_type<tc>, window_params = [{transform_indices = @transform_0, window_bounds = array<i64: 8, 32>}, {transform_indices = @transform_1, window_bounds = array<i64: 32, 96>}, {pipeline_mode = #tpu.pipeline_mode<synchronous>, transform_indices = @transform_2, window_bounds = array<i64: 1, 96>}, {transform_indices = @transform_3, window_bounds = array<i64: 8, 96>}]} {
    %c0_i32 = arith.constant 0 : i32
    %0 = arith.cmpi eq, %arg1, %c0_i32 : i32
    %1 = arith.extui %0 : i1 to i32
    %c0_i32_0 = arith.constant 0 : i32
    %2 = arith.cmpi ne, %1, %c0_i32_0 : i32
    scf.if %2 {
      %cst_10 = arith.constant 0.000000e+00 : f32
      %12 = vector.broadcast %cst_10 : f32 to vector<8x96xf32>
      %c0_11 = arith.constant 0 : index
      %c0_12 = arith.constant 0 : index
      %13 = vector.load %arg6[%c0_11, %c0_12] : memref<8x96xf32, #tpu.memory_space<vmem>>, vector<8x96xf32>
      tpu.vector_store %arg6[%c0_11, %c0_12], %12 {strides = array<i32>} : memref<8x96xf32, #tpu.memory_space<vmem>>, vector<8x96xf32>,
    } else {
    }
    %c0 = arith.constant 0 : index
    %c0_1 = arith.constant 0 : index
    %3 = vector.load %arg6[%c0, %c0_1] : memref<8x96xf32, #tpu.memory_space<vmem>>, vector<8x96xf32>
    %c0_2 = arith.constant 0 : index
    %c0_3 = arith.constant 0 : index
    %4 = vector.load %arg2[%c0_2, %c0_3] : memref<8x32xf32, #tpu.memory_space<vmem>>, vector<8x32xf32>
    %c0_4 = arith.constant 0 : index
    %c0_5 = arith.constant 0 : index
    %5 = vector.load %arg3[%c0_4, %c0_5] : memref<32x96xf32, #tpu.memory_space<vmem>>, vector<32x96xf32>
    %cst = arith.constant dense<0.000000e+00> : vector<8x96xf32>
    %6 = tpu.matmul %4, %5, %cst {dimension_numbers = #tpu.dot_dimension_numbers<[1], [0], [0], [1], [0, 0, 1, 1], [], []>} : vector<8x32xf32>, vector<32x96xf32>, vector<8x96xf32> -> vector<8x96xf32>
    %7 = arith.addf %3, %6 : vector<8x96xf32>
    %c0_6 = arith.constant 0 : index
    %c0_7 = arith.constant 0 : index
    %8 = vector.load %arg6[%c0_6, %c0_7] : memref<8x96xf32, #tpu.memory_space<vmem>>, vector<8x96xf32>
    tpu.vector_store %arg6[%c0_6, %c0_7], %7 {strides = array<i32>} : memref<8x96xf32, #tpu.memory_space<vmem>>, vector<8x96xf32>,
    %c0_i32_8 = arith.constant 0 : i32
    %9 = arith.cmpi eq, %arg1, %c0_i32_8 : i32
    %10 = arith.extui %9 : i1 to i32
    %c0_i32_9 = arith.constant 0 : i32
    %11 = arith.cmpi ne, %10, %c0_i32_9 : i32
    scf.if %11 {
      %c0_10 = arith.constant 0 : index
      %c0_11 = arith.constant 0 : index
      %12 = vector.load %arg6[%c0_10, %c0_11] : memref<8x96xf32, #tpu.memory_space<vmem>>, vector<8x96xf32>
      %c0_12 = arith.constant 0 : index
      %c0_13 = arith.constant 0 : index
      %13 = vector.load %arg4[%c0_12, %c0_13] : memref<1x96xf32, #tpu.memory_space<vmem>>, vector<1x96xf32>
      %14 = vector.broadcast %13 : vector<1x96xf32> to vector<8x96xf32>
      %15 = arith.addf %12, %14 : vector<8x96xf32>
      %c0_14 = arith.constant 0 : index
      %c0_15 = arith.constant 0 : index
      %16 = vector.load %arg5[%c0_14, %c0_15] : memref<8x96xf32, #tpu.memory_space<vmem>>, vector<8x96xf32>
      tpu.vector_store %arg5[%c0_14, %c0_15], %15 {strides = array<i32>} : memref<8x96xf32, #tpu.memory_space<vmem>>, vector<8x96xf32>,
    } else {
    }
    return
  }
  func.func @transform_0(%arg0: i32, %arg1: i32) -> (i32, i32) {
    %c0_i32 = arith.constant 0 : i32
    return %arg0, %arg1 : i32, i32
  }
  func.func @transform_1(%arg0: i32, %arg1: i32) -> (i32, i32) {
    %c0_i32 = arith.constant 0 : i32
    %c0_i32_0 = arith.constant 0 : i32
    return %arg1, %c0_i32 : i32, i32
  }
  func.func @transform_2(%arg0: i32, %arg1: i32) -> (i32, i32) {
    %c0_i32 = arith.constant 0 : i32
    %c0_i32_0 = arith.constant 0 : i32
    %c0_i32_1 = arith.constant 0 : i32
    return %c0_i32, %c0_i32_0 : i32, i32
  }
  func.func @transform_3(%arg0: i32, %arg1: i32) -> (i32, i32) {
    %c0_i32 = arith.constant 0 : i32
    %c0_i32_0 = arith.constant 0 : i32
    return %arg0, %c0_i32 : i32, i32
  }
}

module attributes {stable_mosaic.version = 11 : i64} {
  func.func @_attention_kernel(%arg0: i32, %arg1: memref<1x8x96xf32, #tpu.memory_space<vmem>>, %arg2: memref<1x1x8xf32, #tpu.memory_space<vmem>>, %arg3: memref<1x8x32xf32, #tpu.memory_space<vmem>>) attributes {dimension_semantics = [#tpu.dimension_semantics<parallel>], iteration_bounds = array<i64: 2>, scalar_prefetch = 0 : i64, scratch_operands = 0 : i64, tpu.core_type = #tpu.core_type<tc>, window_params = [{transform_indices = @transform_0, window_bounds = array<i64: 1, 8, 96>}, {transform_indices = @transform_1, window_bounds = array<i64: 1, 1, 8>}, {transform_indices = @transform_2, window_bounds = array<i64: 1, 8, 32>}]} {
    %c0 = arith.constant 0 : index
    %c0_0 = arith.constant 0 : index
    %c0_1 = arith.constant 0 : index
    %0 = vector.load %arg1[%c0, %c0_0, %c0_1] : memref<1x8x96xf32, #tpu.memory_space<vmem>>, vector<1x8x96xf32>
    %1 = vector.shape_cast %0 : vector<1x8x96xf32> to vector<8x96xf32>
    %2 = vector.extract_strided_slice %1 {offsets = [0, 0], sizes = [8, 32], strides = [1, 1]} : vector<8x96xf32> to vector<8x32xf32>
    %3 = vector.extract_strided_slice %1 {offsets = [0, 32], sizes = [8, 32], strides = [1, 1]} : vector<8x96xf32> to vector<8x32xf32>
    %4 = vector.extract_strided_slice %1 {offsets = [0, 64], sizes = [8, 32], strides = [1, 1]} : vector<8x96xf32> to vector<8x32xf32>
    %c0_2 = arith.constant 0 : index
    %c0_3 = arith.constant 0 : index
    %c0_4 = arith.constant 0 : index
    %5 = vector.load %arg2[%c0_2, %c0_3, %c0_4] : memref<1x1x8xf32, #tpu.memory_space<vmem>>, vector<1x1x8xf32>
    %6 = vector.shape_cast %5 : vector<1x1x8xf32> to vector<1x8xf32>
    %7 = vector.extract_strided_slice %2 {offsets = [0, 0], sizes = [8, 8], strides = [1, 1]} : vector<8x32xf32> to vector<8x8xf32>
    %8 = vector.extract_strided_slice %3 {offsets = [0, 0], sizes = [8, 8], strides = [1, 1]} : vector<8x32xf32> to vector<8x8xf32>
    %cst = arith.constant dense<0.000000e+00> : vector<8x8xf32>
    %9 = tpu.matmul %7, %8, %cst {dimension_numbers = #tpu.dot_dimension_numbers<[1], [1], [0], [0], [0, 0, 1, 0], [], []>} : vector<8x8xf32>, vector<8x8xf32>, vector<8x8xf32> -> vector<8x8xf32>
    %cst_5 = arith.constant 0.353553385 : f32
    %10 = vector.broadcast %cst_5 : f32 to vector<8x8xf32>
    %11 = arith.mulf %9, %10 : vector<8x8xf32>
    %12 = vector.broadcast %6 : vector<1x8xf32> to vector<8x8xf32>
    %13 = arith.addf %11, %12 : vector<8x8xf32>
    %cst_6 = arith.constant dense<0xFF800000> : vector<8xf32>
    %14 = vector.multi_reduction <maximumf>, %13, %cst_6 [1] : vector<8x8xf32> to vector<8xf32>
    %15 = vector.shape_cast %14 : vector<8xf32> to vector<8x1xf32>
    %16 = vector.broadcast %15 : vector<8x1xf32> to vector<8x8xf32>
    %17 = arith.subf %13, %16 : vector<8x8xf32>
    %18 = math.exp %17 : vector<8x8xf32>
    %cst_7 = arith.constant dense<0.000000e+00> : vector<8xf32>
    %19 = vector.multi_reduction <add>, %18, %cst_7 [1] : vector<8x8xf32> to vector<8xf32>
    %20 = vector.shape_cast %19 : vector<8xf32> to vector<8x1xf32>
    %21 = tpu.reciprocal %20 {approx = true} : vector<8x1xf32> -> vector<8x1xf32>
    %22 = vector.broadcast %21 : vector<8x1xf32> to vector<8x8xf32>
    %23 = arith.mulf %18, %22 : vector<8x8xf32>
    %24 = vector.extract_strided_slice %4 {offsets = [0, 0], sizes = [8, 8], strides = [1, 1]} : vector<8x32xf32> to vector<8x8xf32>
    %cst_8 = arith.constant dense<0.000000e+00> : vector<8x8xf32>
    %25 = tpu.matmul %23, %24, %cst_8 {dimension_numbers = #tpu.dot_dimension_numbers<[1], [0], [0], [1], [0, 0, 1, 1], [], []>} : vector<8x8xf32>, vector<8x8xf32>, vector<8x8xf32> -> vector<8x8xf32>
    %26 = vector.extract_strided_slice %2 {offsets = [0, 8], sizes = [8, 8], strides = [1, 1]} : vector<8x32xf32> to vector<8x8xf32>
    %27 = vector.extract_strided_slice %3 {offsets = [0, 8], sizes = [8, 8], strides = [1, 1]} : vector<8x32xf32> to vector<8x8xf32>
    %cst_9 = arith.constant dense<0.000000e+00> : vector<8x8xf32>
    %28 = tpu.matmul %26, %27, %cst_9 {dimension_numbers = #tpu.dot_dimension_numbers<[1], [1], [0], [0], [0, 0, 1, 0], [], []>} : vector<8x8xf32>, vector<8x8xf32>, vector<8x8xf32> -> vector<8x8xf32>
    %cst_10 = arith.constant 0.353553385 : f32
    %29 = vector.broadcast %cst_10 : f32 to vector<8x8xf32>
    %30 = arith.mulf %28, %29 : vector<8x8xf32>
    %31 = vector.broadcast %6 : vector<1x8xf32> to vector<8x8xf32>
    %32 = arith.addf %30, %31 : vector<8x8xf32>
    %cst_11 = arith.constant dense<0xFF800000> : vector<8xf32>
    %33 = vector.multi_reduction <maximumf>, %32, %cst_11 [1] : vector<8x8xf32> to vector<8xf32>
    %34 = vector.shape_cast %33 : vector<8xf32> to vector<8x1xf32>
    %35 = vector.broadcast %34 : vector<8x1xf32> to vector<8x8xf32>
    %36 = arith.subf %32, %35 : vector<8x8xf32>
    %37 = math.exp %36 : vector<8x8xf32>
    %cst_12 = arith.constant dense<0.000000e+00> : vector<8xf32>
    %38 = vector.multi_reduction <add>, %37, %cst_12 [1] : vector<8x8xf32> to vector<8xf32>
    %39 = vector.shape_cast %38 : vector<8xf32> to vector<8x1xf32>
    %40 = tpu.reciprocal %39 {approx = true} : vector<8x1xf32> -> vector<8x1xf32>
    %41 = vector.broadcast %40 : vector<8x1xf32> to vector<8x8xf32>
    %42 = arith.mulf %37, %41 : vector<8x8xf32>
    %43 = vector.extract_strided_slice %4 {offsets = [0, 8], sizes = [8, 8], strides = [1, 1]} : vector<8x32xf32> to vector<8x8xf32>
    %cst_13 = arith.constant dense<0.000000e+00> : vector<8x8xf32>
    %44 = tpu.matmul %42, %43, %cst_13 {dimension_numbers = #tpu.dot_dimension_numbers<[1], [0], [0], [1], [0, 0, 1, 1], [], []>} : vector<8x8xf32>, vector<8x8xf32>, vector<8x8xf32> -> vector<8x8xf32>
    %45 = vector.extract_strided_slice %2 {offsets = [0, 16], sizes = [8, 8], strides = [1, 1]} : vector<8x32xf32> to vector<8x8xf32>
    %46 = vector.extract_strided_slice %3 {offsets = [0, 16], sizes = [8, 8], strides = [1, 1]} : vector<8x32xf32> to vector<8x8xf32>
    %cst_14 = arith.constant dense<0.000000e+00> : vector<8x8xf32>
    %47 = tpu.matmul %45, %46, %cst_14 {dimension_numbers = #tpu.dot_dimension_numbers<[1], [1], [0], [0], [0, 0, 1, 0], [], []>} : vector<8x8xf32>, vector<8x8xf32>, vector<8x8xf32> -> vector<8x8xf32>
    %cst_15 = arith.constant 0.353553385 : f32
    %48 = vector.broadcast %cst_15 : f32 to vector<8x8xf32>
    %49 = arith.mulf %47, %48 : vector<8x8xf32>
    %50 = vector.broadcast %6 : vector<1x8xf32> to vector<8x8xf32>
    %51 = arith.addf %49, %50 : vector<8x8xf32>
    %cst_16 = arith.constant dense<0xFF800000> : vector<8xf32>
    %52 = vector.multi_reduction <maximumf>, %51, %cst_16 [1] : vector<8x8xf32> to vector<8xf32>
    %53 = vector.shape_cast %52 : vector<8xf32> to vector<8x1xf32>
    %54 = vector.broadcast %53 : vector<8x1xf32> to vector<8x8xf32>
    %55 = arith.subf %51, %54 : vector<8x8xf32>
    %56 = math.exp %55 : vector<8x8xf32>
    %cst_17 = arith.constant dense<0.000000e+00> : vector<8xf32>
    %57 = vector.multi_reduction <add>, %56, %cst_17 [1] : vector<8x8xf32> to vector<8xf32>
    %58 = vector.shape_cast %57 : vector<8xf32> to vector<8x1xf32>
    %59 = tpu.reciprocal %58 {approx = true} : vector<8x1xf32> -> vector<8x1xf32>
    %60 = vector.broadcast %59 : vector<8x1xf32> to vector<8x8xf32>
    %61 = arith.mulf %56, %60 : vector<8x8xf32>
    %62 = vector.extract_strided_slice %4 {offsets = [0, 16], sizes = [8, 8], strides = [1, 1]} : vector<8x32xf32> to vector<8x8xf32>
    %cst_18 = arith.constant dense<0.000000e+00> : vector<8x8xf32>
    %63 = tpu.matmul %61, %62, %cst_18 {dimension_numbers = #tpu.dot_dimension_numbers<[1], [0], [0], [1], [0, 0, 1, 1], [], []>} : vector<8x8xf32>, vector<8x8xf32>, vector<8x8xf32> -> vector<8x8xf32>
    %64 = vector.extract_strided_slice %2 {offsets = [0, 24], sizes = [8, 8], strides = [1, 1]} : vector<8x32xf32> to vector<8x8xf32>
    %65 = vector.extract_strided_slice %3 {offsets = [0, 24], sizes = [8, 8], strides = [1, 1]} : vector<8x32xf32> to vector<8x8xf32>
    %cst_19 = arith.constant dense<0.000000e+00> : vector<8x8xf32>
    %66 = tpu.matmul %64, %65, %cst_19 {dimension_numbers = #tpu.dot_dimension_numbers<[1], [1], [0], [0], [0, 0, 1, 0], [], []>} : vector<8x8xf32>, vector<8x8xf32>, vector<8x8xf32> -> vector<8x8xf32>
    %cst_20 = arith.constant 0.353553385 : f32
    %67 = vector.broadcast %cst_20 : f32 to vector<8x8xf32>
    %68 = arith.mulf %66, %67 : vector<8x8xf32>
    %69 = vector.broadcast %6 : vector<1x8xf32> to vector<8x8xf32>
    %70 = arith.addf %68, %69 : vector<8x8xf32>
    %cst_21 = arith.constant dense<0xFF800000> : vector<8xf32>
    %71 = vector.multi_reduction <maximumf>, %70, %cst_21 [1] : vector<8x8xf32> to vector<8xf32>
    %72 = vector.shape_cast %71 : vector<8xf32> to vector<8x1xf32>
    %73 = vector.broadcast %72 : vector<8x1xf32> to vector<8x8xf32>
    %74 = arith.subf %70, %73 : vector<8x8xf32>
    %75 = math.exp %74 : vector<8x8xf32>
    %cst_22 = arith.constant dense<0.000000e+00> : vector<8xf32>
    %76 = vector.multi_reduction <add>, %75, %cst_22 [1] : vector<8x8xf32> to vector<8xf32>
    %77 = vector.shape_cast %76 : vector<8xf32> to vector<8x1xf32>
    %78 = tpu.reciprocal %77 {approx = true} : vector<8x1xf32> -> vector<8x1xf32>
    %79 = vector.broadcast %78 : vector<8x1xf32> to vector<8x8xf32>
    %80 = arith.mulf %75, %79 : vector<8x8xf32>
    %81 = vector.extract_strided_slice %4 {offsets = [0, 24], sizes = [8, 8], strides = [1, 1]} : vector<8x32xf32> to vector<8x8xf32>
    %cst_23 = arith.constant dense<0.000000e+00> : vector<8x8xf32>
    %82 = tpu.matmul %80, %81, %cst_23 {dimension_numbers = #tpu.dot_dimension_numbers<[1], [0], [0], [1], [0, 0, 1, 1], [], []>} : vector<8x8xf32>, vector<8x8xf32>, vector<8x8xf32> -> vector<8x8xf32>
    %83 = tpu.concatenate %25, %44, %63, %82 in 1 : vector<8x8xf32>, vector<8x8xf32>, vector<8x8xf32>, vector<8x8xf32> -> vector<8x32xf32>
    %c0_24 = arith.constant 0 : index
    %c0_25 = arith.constant 0 : index
    %c0_26 = arith.constant 0 : index
    %84 = vector.load %arg3[%c0_24, %c0_25, %c0_26] : memref<1x8x32xf32, #tpu.memory_space<vmem>>, vector<1x8x32xf32>
    %85 = vector.shape_cast %84 : vector<1x8x32xf32> to vector<8x32xf32>
    %86 = vector.shape_cast %83 : vector<8x32xf32> to vector<1x8x32xf32>
    tpu.vector_store %arg3[%c0_24, %c0_25, %c0_26], %86 {strides = array<i32>} : memref<1x8x32xf32, #tpu.memory_space<vmem>>, vector<1x8x32xf32>,
    return
  }
  func.func @transform_0(%arg0: i32) -> (i32, i32, i32) {
    %c0_i32 = arith.constant 0 : i32
    %c0_i32_0 = arith.constant 0 : i32
    %c0_i32_1 = arith.constant 0 : i32
    return %arg0, %c0_i32, %c0_i32_0 : i32, i32, i32
  }
  func.func @transform_1(%arg0: i32) -> (i32, i32, i32) {
    %c0_i32 = arith.constant 0 : i32
    %c0_i32_0 = arith.constant 0 : i32
    %c0_i32_1 = arith.constant 0 : i32
    return %arg0, %c0_i32, %c0_i32_0 : i32, i32, i32
  }
  func.func @transform_2(%arg0: i32) -> (i32, i32, i32) {
    %c0_i32 = arith.constant 0 : i32
    %c0_i32_0 = arith.constant 0 : i32
    %c0_i32_1 = arith.constant 0 : i32
    return %arg0, %c0_i32, %c0_i32_0 : i32, i32, i32
  }
}

module attributes {stable_mosaic.version = 11 : i64} {
  func.func @_linear_res_ln_kernel(%arg0: i32, %arg1: i32, %arg2: memref<8x32xf32, #tpu.memory_space<vmem>>, %arg3: memref<32x32xf32, #tpu.memory_space<vmem>>, %arg4: memref<1x32xf32, #tpu.memory_space<vmem>>, %arg5: memref<8x32xf32, #tpu.memory_space<vmem>>, %arg6: memref<1x32xf32, #tpu.memory_space<vmem>>, %arg7: memref<1x32xf32, #tpu.memory_space<vmem>>, %arg8: memref<8x32xf32, #tpu.memory_space<vmem>>, %arg9: memref<8x32xf32, #tpu.memory_space<vmem>>) attributes {dimension_semantics = [#tpu.dimension_semantics<parallel>, #tpu.dimension_semantics<arbitrary>], iteration_bounds = array<i64: 2, 1>, scalar_prefetch = 0 : i64, scratch_operands = 1 : i64, tpu.core_type = #tpu.core_type<tc>, window_params = [{transform_indices = @transform_0, window_bounds = array<i64: 8, 32>}, {transform_indices = @transform_1, window_bounds = array<i64: 32, 32>}, {pipeline_mode = #tpu.pipeline_mode<synchronous>, transform_indices = @transform_2, window_bounds = array<i64: 1, 32>}, {transform_indices = @transform_3, window_bounds = array<i64: 8, 32>}, {pipeline_mode = #tpu.pipeline_mode<synchronous>, transform_indices = @transform_4, window_bounds = array<i64: 1, 32>}, {pipeline_mode = #tpu.pipeline_mode<synchronous>, transform_indices = @transform_5, window_bounds = array<i64: 1, 32>}, {transform_indices = @transform_6, window_bounds = array<i64: 8, 32>}]} {
    %c0_i32 = arith.constant 0 : i32
    %0 = arith.cmpi eq, %arg1, %c0_i32 : i32
    %1 = arith.extui %0 : i1 to i32
    %c0_i32_0 = arith.constant 0 : i32
    %2 = arith.cmpi ne, %1, %c0_i32_0 : i32
    scf.if %2 {
      %cst_10 = arith.constant 0.000000e+00 : f32
      %12 = vector.broadcast %cst_10 : f32 to vector<8x32xf32>
      %c0_11 = arith.constant 0 : index
      %c0_12 = arith.constant 0 : index
      %13 = vector.load %arg9[%c0_11, %c0_12] : memref<8x32xf32, #tpu.memory_space<vmem>>, vector<8x32xf32>
      tpu.vector_store %arg9[%c0_11, %c0_12], %12 {strides = array<i32>} : memref<8x32xf32, #tpu.memory_space<vmem>>, vector<8x32xf32>,
    } else {
    }
    %c0 = arith.constant 0 : index
    %c0_1 = arith.constant 0 : index
    %3 = vector.load %arg9[%c0, %c0_1] : memref<8x32xf32, #tpu.memory_space<vmem>>, vector<8x32xf32>
    %c0_2 = arith.constant 0 : index
    %c0_3 = arith.constant 0 : index
    %4 = vector.load %arg2[%c0_2, %c0_3] : memref<8x32xf32, #tpu.memory_space<vmem>>, vector<8x32xf32>
    %c0_4 = arith.constant 0 : index
    %c0_5 = arith.constant 0 : index
    %5 = vector.load %arg3[%c0_4, %c0_5] : memref<32x32xf32, #tpu.memory_space<vmem>>, vector<32x32xf32>
    %cst = arith.constant dense<0.000000e+00> : vector<8x32xf32>
    %6 = tpu.matmul %4, %5, %cst {dimension_numbers = #tpu.dot_dimension_numbers<[1], [0], [0], [1], [0, 0, 1, 1], [], []>} : vector<8x32xf32>, vector<32x32xf32>, vector<8x32xf32> -> vector<8x32xf32>
    %7 = arith.addf %3, %6 : vector<8x32xf32>
    %c0_6 = arith.constant 0 : index
    %c0_7 = arith.constant 0 : index
    %8 = vector.load %arg9[%c0_6, %c0_7] : memref<8x32xf32, #tpu.memory_space<vmem>>, vector<8x32xf32>
    tpu.vector_store %arg9[%c0_6, %c0_7], %7 {strides = array<i32>} : memref<8x32xf32, #tpu.memory_space<vmem>>, vector<8x32xf32>,
    %c0_i32_8 = arith.constant 0 : i32
    %9 = arith.cmpi eq, %arg1, %c0_i32_8 : i32
    %10 = arith.extui %9 : i1 to i32
    %c0_i32_9 = arith.constant 0 : i32
    %11 = arith.cmpi ne, %10, %c0_i32_9 : i32
    scf.if %11 {
      %c0_10 = arith.constant 0 : index
      %c0_11 = arith.constant 0 : index
      %12 = vector.load %arg9[%c0_10, %c0_11] : memref<8x32xf32, #tpu.memory_space<vmem>>, vector<8x32xf32>
      %c0_12 = arith.constant 0 : index
      %c0_13 = arith.constant 0 : index
      %13 = vector.load %arg4[%c0_12, %c0_13] : memref<1x32xf32, #tpu.memory_space<vmem>>, vector<1x32xf32>
      %14 = vector.broadcast %13 : vector<1x32xf32> to vector<8x32xf32>
      %15 = arith.addf %12, %14 : vector<8x32xf32>
      %c0_14 = arith.constant 0 : index
      %c0_15 = arith.constant 0 : index
      %16 = vector.load %arg5[%c0_14, %c0_15] : memref<8x32xf32, #tpu.memory_space<vmem>>, vector<8x32xf32>
      %17 = arith.addf %15, %16 : vector<8x32xf32>
      %cst_16 = arith.constant dense<0.000000e+00> : vector<8xf32>
      %18 = vector.multi_reduction <add>, %17, %cst_16 [1] : vector<8x32xf32> to vector<8xf32>
      %19 = vector.shape_cast %18 : vector<8xf32> to vector<8x1xf32>
      %cst_17 = arith.constant 3.200000e+01 : f32
      %20 = vector.broadcast %cst_17 : f32 to vector<8x1xf32>
      %21 = arith.divf %19, %20 : vector<8x1xf32>
      %22 = vector.broadcast %21 : vector<8x1xf32> to vector<8x32xf32>
      %23 = arith.subf %17, %22 : vector<8x32xf32>
      %24 = arith.mulf %23, %23 : vector<8x32xf32>
      %cst_18 = arith.constant dense<0.000000e+00> : vector<8xf32>
      %25 = vector.multi_reduction <add>, %24, %cst_18 [1] : vector<8x32xf32> to vector<8xf32>
      %26 = vector.shape_cast %25 : vector<8xf32> to vector<8x1xf32>
      %cst_19 = arith.constant 3.200000e+01 : f32
      %27 = vector.broadcast %cst_19 : f32 to vector<8x1xf32>
      %28 = arith.divf %26, %27 : vector<8x1xf32>
      %cst_20 = arith.constant 9.99999974E-6 : f32
      %29 = vector.broadcast %cst_20 : f32 to vector<8x1xf32>
      %30 = arith.addf %28, %29 : vector<8x1xf32>
      %31 = math.rsqrt %30 : vector<8x1xf32>
      %32 = vector.broadcast %31 : vector<8x1xf32> to vector<8x32xf32>
      %33 = arith.mulf %23, %32 : vector<8x32xf32>
      %c0_21 = arith.constant 0 : index
      %c0_22 = arith.constant 0 : index
      %34 = vector.load %arg6[%c0_21, %c0_22] : memref<1x32xf32, #tpu.memory_space<vmem>>, vector<1x32xf32>
      %35 = vector.broadcast %34 : vector<1x32xf32> to vector<8x32xf32>
      %36 = arith.mulf %33, %35 : vector<8x32xf32>
      %c0_23 = arith.constant 0 : index
      %c0_24 = arith.constant 0 : index
      %37 = vector.load %arg7[%c0_23, %c0_24] : memref<1x32xf32, #tpu.memory_space<vmem>>, vector<1x32xf32>
      %38 = vector.broadcast %37 : vector<1x32xf32> to vector<8x32xf32>
      %39 = arith.addf %36, %38 : vector<8x32xf32>
      %c0_25 = arith.constant 0 : index
      %c0_26 = arith.constant 0 : index
      %40 = vector.load %arg8[%c0_25, %c0_26] : memref<8x32xf32, #tpu.memory_space<vmem>>, vector<8x32xf32>
      tpu.vector_store %arg8[%c0_25, %c0_26], %39 {strides = array<i32>} : memref<8x32xf32, #tpu.memory_space<vmem>>, vector<8x32xf32>,
    } else {
    }
    return
  }
  func.func @transform_0(%arg0: i32, %arg1: i32) -> (i32, i32) {
    %c0_i32 = arith.constant 0 : i32
    return %arg0, %arg1 : i32, i32
  }
  func.func @transform_1(%arg0: i32, %arg1: i32) -> (i32, i32) {
    %c0_i32 = arith.constant 0 : i32
    %c0_i32_0 = arith.constant 0 : i32
    return %arg1, %c0_i32 : i32, i32
  }
  func.func @transform_2(%arg0: i32, %arg1: i32) -> (i32, i32) {
    %c0_i32 = arith.constant 0 : i32
    %c0_i32_0 = arith.constant 0 : i32
    %c0_i32_1 = arith.constant 0 : i32
    return %c0_i32, %c0_i32_0 : i32, i32
  }
  func.func @transform_3(%arg0: i32, %arg1: i32) -> (i32, i32) {
    %c0_i32 = arith.constant 0 : i32
    %c0_i32_0 = arith.constant 0 : i32
    return %arg0, %c0_i32 : i32, i32
  }
  func.func @transform_4(%arg0: i32, %arg1: i32) -> (i32, i32) {
    %c0_i32 = arith.constant 0 : i32
    %c0_i32_0 = arith.constant 0 : i32
    %c0_i32_1 = arith.constant 0 : i32
    return %c0_i32, %c0_i32_0 : i32, i32
  }
  func.func @transform_5(%arg0: i32, %arg1: i32) -> (i32, i32) {
    %c0_i32 = arith.constant 0 : i32
    %c0_i32_0 = arith.constant 0 : i32
    %c0_i32_1 = arith.constant 0 : i32
    return %c0_i32, %c0_i32_0 : i32, i32
  }
  func.func @transform_6(%arg0: i32, %arg1: i32) -> (i32, i32) {
    %c0_i32 = arith.constant 0 : i32
    %c0_i32_0 = arith.constant 0 : i32
    return %arg0, %c0_i32 : i32, i32
  }
}

module attributes {stable_mosaic.version = 11 : i64} {
  func.func @_linear_kernel(%arg0: i32, %arg1: i32, %arg2: memref<8x32xf32, #tpu.memory_space<vmem>>, %arg3: memref<32x64xf32, #tpu.memory_space<vmem>>, %arg4: memref<1x64xf32, #tpu.memory_space<vmem>>, %arg5: memref<8x64xf32, #tpu.memory_space<vmem>>, %arg6: memref<8x64xf32, #tpu.memory_space<vmem>>) attributes {dimension_semantics = [#tpu.dimension_semantics<parallel>, #tpu.dimension_semantics<arbitrary>], iteration_bounds = array<i64: 2, 1>, scalar_prefetch = 0 : i64, scratch_operands = 1 : i64, tpu.core_type = #tpu.core_type<tc>, window_params = [{transform_indices = @transform_0, window_bounds = array<i64: 8, 32>}, {transform_indices = @transform_1, window_bounds = array<i64: 32, 64>}, {pipeline_mode = #tpu.pipeline_mode<synchronous>, transform_indices = @transform_2, window_bounds = array<i64: 1, 64>}, {transform_indices = @transform_3, window_bounds = array<i64: 8, 64>}]} {
    %c0_i32 = arith.constant 0 : i32
    %0 = arith.cmpi eq, %arg1, %c0_i32 : i32
    %1 = arith.extui %0 : i1 to i32
    %c0_i32_0 = arith.constant 0 : i32
    %2 = arith.cmpi ne, %1, %c0_i32_0 : i32
    scf.if %2 {
      %cst_10 = arith.constant 0.000000e+00 : f32
      %12 = vector.broadcast %cst_10 : f32 to vector<8x64xf32>
      %c0_11 = arith.constant 0 : index
      %c0_12 = arith.constant 0 : index
      %13 = vector.load %arg6[%c0_11, %c0_12] : memref<8x64xf32, #tpu.memory_space<vmem>>, vector<8x64xf32>
      tpu.vector_store %arg6[%c0_11, %c0_12], %12 {strides = array<i32>} : memref<8x64xf32, #tpu.memory_space<vmem>>, vector<8x64xf32>,
    } else {
    }
    %c0 = arith.constant 0 : index
    %c0_1 = arith.constant 0 : index
    %3 = vector.load %arg6[%c0, %c0_1] : memref<8x64xf32, #tpu.memory_space<vmem>>, vector<8x64xf32>
    %c0_2 = arith.constant 0 : index
    %c0_3 = arith.constant 0 : index
    %4 = vector.load %arg2[%c0_2, %c0_3] : memref<8x32xf32, #tpu.memory_space<vmem>>, vector<8x32xf32>
    %c0_4 = arith.constant 0 : index
    %c0_5 = arith.constant 0 : index
    %5 = vector.load %arg3[%c0_4, %c0_5] : memref<32x64xf32, #tpu.memory_space<vmem>>, vector<32x64xf32>
    %cst = arith.constant dense<0.000000e+00> : vector<8x64xf32>
    %6 = tpu.matmul %4, %5, %cst {dimension_numbers = #tpu.dot_dimension_numbers<[1], [0], [0], [1], [0, 0, 1, 1], [], []>} : vector<8x32xf32>, vector<32x64xf32>, vector<8x64xf32> -> vector<8x64xf32>
    %7 = arith.addf %3, %6 : vector<8x64xf32>
    %c0_6 = arith.constant 0 : index
    %c0_7 = arith.constant 0 : index
    %8 = vector.load %arg6[%c0_6, %c0_7] : memref<8x64xf32, #tpu.memory_space<vmem>>, vector<8x64xf32>
    tpu.vector_store %arg6[%c0_6, %c0_7], %7 {strides = array<i32>} : memref<8x64xf32, #tpu.memory_space<vmem>>, vector<8x64xf32>,
    %c0_i32_8 = arith.constant 0 : i32
    %9 = arith.cmpi eq, %arg1, %c0_i32_8 : i32
    %10 = arith.extui %9 : i1 to i32
    %c0_i32_9 = arith.constant 0 : i32
    %11 = arith.cmpi ne, %10, %c0_i32_9 : i32
    scf.if %11 {
      %c0_10 = arith.constant 0 : index
      %c0_11 = arith.constant 0 : index
      %12 = vector.load %arg6[%c0_10, %c0_11] : memref<8x64xf32, #tpu.memory_space<vmem>>, vector<8x64xf32>
      %c0_12 = arith.constant 0 : index
      %c0_13 = arith.constant 0 : index
      %13 = vector.load %arg4[%c0_12, %c0_13] : memref<1x64xf32, #tpu.memory_space<vmem>>, vector<1x64xf32>
      %14 = vector.broadcast %13 : vector<1x64xf32> to vector<8x64xf32>
      %15 = arith.addf %12, %14 : vector<8x64xf32>
      %16 = arith.mulf %15, %15 : vector<8x64xf32>
      %17 = arith.mulf %15, %16 : vector<8x64xf32>
      %cst_14 = arith.constant 4.471500e-02 : f32
      %18 = vector.broadcast %cst_14 : f32 to vector<8x64xf32>
      %19 = arith.mulf %18, %17 : vector<8x64xf32>
      %20 = arith.addf %15, %19 : vector<8x64xf32>
      %cst_15 = arith.constant 0.797884583 : f32
      %21 = vector.broadcast %cst_15 : f32 to vector<8x64xf32>
      %22 = arith.mulf %21, %20 : vector<8x64xf32>
      %23 = math.tanh %22 : vector<8x64xf32>
      %cst_16 = arith.constant 1.000000e+00 : f32
      %24 = vector.broadcast %cst_16 : f32 to vector<8x64xf32>
      %25 = arith.addf %24, %23 : vector<8x64xf32>
      %cst_17 = arith.constant 5.000000e-01 : f32
      %26 = vector.broadcast %cst_17 : f32 to vector<8x64xf32>
      %27 = arith.mulf %26, %25 : vector<8x64xf32>
      %28 = arith.mulf %15, %27 : vector<8x64xf32>
      %c0_18 = arith.constant 0 : index
      %c0_19 = arith.constant 0 : index
      %29 = vector.load %arg5[%c0_18, %c0_19] : memref<8x64xf32, #tpu.memory_space<vmem>>, vector<8x64xf32>
      tpu.vector_store %arg5[%c0_18, %c0_19], %28 {strides = array<i32>} : memref<8x64xf32, #tpu.memory_space<vmem>>, vector<8x64xf32>,
    } else {
    }
    return
  }
  func.func @transform_0(%arg0: i32, %arg1: i32) -> (i32, i32) {
    %c0_i32 = arith.constant 0 : i32
    return %arg0, %arg1 : i32, i32
  }
  func.func @transform_1(%arg0: i32, %arg1: i32) -> (i32, i32) {
    %c0_i32 = arith.constant 0 : i32
    %c0_i32_0 = arith.constant 0 : i32
    return %arg1, %c0_i32 : i32, i32
  }
  func.func @transform_2(%arg0: i32, %arg1: i32) -> (i32, i32) {
    %c0_i32 = arith.constant 0 : i32
    %c0_i32_0 = arith.constant 0 : i32
    %c0_i32_1 = arith.constant 0 : i32
    return %c0_i32, %c0_i32_0 : i32, i32
  }
  func.func @transform_3(%arg0: i32, %arg1: i32) -> (i32, i32) {
    %c0_i32 = arith.constant 0 : i32
    %c0_i32_0 = arith.constant 0 : i32
    return %arg0, %c0_i32 : i32, i32
  }
}

module attributes {stable_mosaic.version = 11 : i64} {
  func.func @_linear_res_ln_kernel(%arg0: i32, %arg1: i32, %arg2: memref<8x64xf32, #tpu.memory_space<vmem>>, %arg3: memref<64x32xf32, #tpu.memory_space<vmem>>, %arg4: memref<1x32xf32, #tpu.memory_space<vmem>>, %arg5: memref<8x32xf32, #tpu.memory_space<vmem>>, %arg6: memref<1x32xf32, #tpu.memory_space<vmem>>, %arg7: memref<1x32xf32, #tpu.memory_space<vmem>>, %arg8: memref<8x32xf32, #tpu.memory_space<vmem>>, %arg9: memref<8x32xf32, #tpu.memory_space<vmem>>) attributes {dimension_semantics = [#tpu.dimension_semantics<parallel>, #tpu.dimension_semantics<arbitrary>], iteration_bounds = array<i64: 2, 1>, scalar_prefetch = 0 : i64, scratch_operands = 1 : i64, tpu.core_type = #tpu.core_type<tc>, window_params = [{transform_indices = @transform_0, window_bounds = array<i64: 8, 64>}, {transform_indices = @transform_1, window_bounds = array<i64: 64, 32>}, {pipeline_mode = #tpu.pipeline_mode<synchronous>, transform_indices = @transform_2, window_bounds = array<i64: 1, 32>}, {transform_indices = @transform_3, window_bounds = array<i64: 8, 32>}, {pipeline_mode = #tpu.pipeline_mode<synchronous>, transform_indices = @transform_4, window_bounds = array<i64: 1, 32>}, {pipeline_mode = #tpu.pipeline_mode<synchronous>, transform_indices = @transform_5, window_bounds = array<i64: 1, 32>}, {transform_indices = @transform_6, window_bounds = array<i64: 8, 32>}]} {
    %c0_i32 = arith.constant 0 : i32
    %0 = arith.cmpi eq, %arg1, %c0_i32 : i32
    %1 = arith.extui %0 : i1 to i32
    %c0_i32_0 = arith.constant 0 : i32
    %2 = arith.cmpi ne, %1, %c0_i32_0 : i32
    scf.if %2 {
      %cst_10 = arith.constant 0.000000e+00 : f32
      %12 = vector.broadcast %cst_10 : f32 to vector<8x32xf32>
      %c0_11 = arith.constant 0 : index
      %c0_12 = arith.constant 0 : index
      %13 = vector.load %arg9[%c0_11, %c0_12] : memref<8x32xf32, #tpu.memory_space<vmem>>, vector<8x32xf32>
      tpu.vector_store %arg9[%c0_11, %c0_12], %12 {strides = array<i32>} : memref<8x32xf32, #tpu.memory_space<vmem>>, vector<8x32xf32>,
    } else {
    }
    %c0 = arith.constant 0 : index
    %c0_1 = arith.constant 0 : index
    %3 = vector.load %arg9[%c0, %c0_1] : memref<8x32xf32, #tpu.memory_space<vmem>>, vector<8x32xf32>
    %c0_2 = arith.constant 0 : index
    %c0_3 = arith.constant 0 : index
    %4 = vector.load %arg2[%c0_2, %c0_3] : memref<8x64xf32, #tpu.memory_space<vmem>>, vector<8x64xf32>
    %c0_4 = arith.constant 0 : index
    %c0_5 = arith.constant 0 : index
    %5 = vector.load %arg3[%c0_4, %c0_5] : memref<64x32xf32, #tpu.memory_space<vmem>>, vector<64x32xf32>
    %cst = arith.constant dense<0.000000e+00> : vector<8x32xf32>
    %6 = tpu.matmul %4, %5, %cst {dimension_numbers = #tpu.dot_dimension_numbers<[1], [0], [0], [1], [0, 0, 1, 1], [], []>} : vector<8x64xf32>, vector<64x32xf32>, vector<8x32xf32> -> vector<8x32xf32>
    %7 = arith.addf %3, %6 : vector<8x32xf32>
    %c0_6 = arith.constant 0 : index
    %c0_7 = arith.constant 0 : index
    %8 = vector.load %arg9[%c0_6, %c0_7] : memref<8x32xf32, #tpu.memory_space<vmem>>, vector<8x32xf32>
    tpu.vector_store %arg9[%c0_6, %c0_7], %7 {strides = array<i32>} : memref<8x32xf32, #tpu.memory_space<vmem>>, vector<8x32xf32>,
    %c0_i32_8 = arith.constant 0 : i32
    %9 = arith.cmpi eq, %arg1, %c0_i32_8 : i32
    %10 = arith.extui %9 : i1 to i32
    %c0_i32_9 = arith.constant 0 : i32
    %11 = arith.cmpi ne, %10, %c0_i32_9 : i32
    scf.if %11 {
      %c0_10 = arith.constant 0 : index
      %c0_11 = arith.constant 0 : index
      %12 = vector.load %arg9[%c0_10, %c0_11] : memref<8x32xf32, #tpu.memory_space<vmem>>, vector<8x32xf32>
      %c0_12 = arith.constant 0 : index
      %c0_13 = arith.constant 0 : index
      %13 = vector.load %arg4[%c0_12, %c0_13] : memref<1x32xf32, #tpu.memory_space<vmem>>, vector<1x32xf32>
      %14 = vector.broadcast %13 : vector<1x32xf32> to vector<8x32xf32>
      %15 = arith.addf %12, %14 : vector<8x32xf32>
      %c0_14 = arith.constant 0 : index
      %c0_15 = arith.constant 0 : index
      %16 = vector.load %arg5[%c0_14, %c0_15] : memref<8x32xf32, #tpu.memory_space<vmem>>, vector<8x32xf32>
      %17 = arith.addf %15, %16 : vector<8x32xf32>
      %cst_16 = arith.constant dense<0.000000e+00> : vector<8xf32>
      %18 = vector.multi_reduction <add>, %17, %cst_16 [1] : vector<8x32xf32> to vector<8xf32>
      %19 = vector.shape_cast %18 : vector<8xf32> to vector<8x1xf32>
      %cst_17 = arith.constant 3.200000e+01 : f32
      %20 = vector.broadcast %cst_17 : f32 to vector<8x1xf32>
      %21 = arith.divf %19, %20 : vector<8x1xf32>
      %22 = vector.broadcast %21 : vector<8x1xf32> to vector<8x32xf32>
      %23 = arith.subf %17, %22 : vector<8x32xf32>
      %24 = arith.mulf %23, %23 : vector<8x32xf32>
      %cst_18 = arith.constant dense<0.000000e+00> : vector<8xf32>
      %25 = vector.multi_reduction <add>, %24, %cst_18 [1] : vector<8x32xf32> to vector<8xf32>
      %26 = vector.shape_cast %25 : vector<8xf32> to vector<8x1xf32>
      %cst_19 = arith.constant 3.200000e+01 : f32
      %27 = vector.broadcast %cst_19 : f32 to vector<8x1xf32>
      %28 = arith.divf %26, %27 : vector<8x1xf32>
      %cst_20 = arith.constant 9.99999974E-6 : f32
      %29 = vector.broadcast %cst_20 : f32 to vector<8x1xf32>
      %30 = arith.addf %28, %29 : vector<8x1xf32>
      %31 = math.rsqrt %30 : vector<8x1xf32>
      %32 = vector.broadcast %31 : vector<8x1xf32> to vector<8x32xf32>
      %33 = arith.mulf %23, %32 : vector<8x32xf32>
      %c0_21 = arith.constant 0 : index
      %c0_22 = arith.constant 0 : index
      %34 = vector.load %arg6[%c0_21, %c0_22] : memref<1x32xf32, #tpu.memory_space<vmem>>, vector<1x32xf32>
      %35 = vector.broadcast %34 : vector<1x32xf32> to vector<8x32xf32>
      %36 = arith.mulf %33, %35 : vector<8x32xf32>
      %c0_23 = arith.constant 0 : index
      %c0_24 = arith.constant 0 : index
      %37 = vector.load %arg7[%c0_23, %c0_24] : memref<1x32xf32, #tpu.memory_space<vmem>>, vector<1x32xf32>
      %38 = vector.broadcast %37 : vector<1x32xf32> to vector<8x32xf32>
      %39 = arith.addf %36, %38 : vector<8x32xf32>
      %c0_25 = arith.constant 0 : index
      %c0_26 = arith.constant 0 : index
      %40 = vector.load %arg8[%c0_25, %c0_26] : memref<8x32xf32, #tpu.memory_space<vmem>>, vector<8x32xf32>
      tpu.vector_store %arg8[%c0_25, %c0_26], %39 {strides = array<i32>} : memref<8x32xf32, #tpu.memory_space<vmem>>, vector<8x32xf32>,
    } else {
    }
    return
  }
  func.func @transform_0(%arg0: i32, %arg1: i32) -> (i32, i32) {
    %c0_i32 = arith.constant 0 : i32
    return %arg0, %arg1 : i32, i32
  }
  func.func @transform_1(%arg0: i32, %arg1: i32) -> (i32, i32) {
    %c0_i32 = arith.constant 0 : i32
    %c0_i32_0 = arith.constant 0 : i32
    return %arg1, %c0_i32 : i32, i32
  }
  func.func @transform_2(%arg0: i32, %arg1: i32) -> (i32, i32) {
    %c0_i32 = arith.constant 0 : i32
    %c0_i32_0 = arith.constant 0 : i32
    %c0_i32_1 = arith.constant 0 : i32
    return %c0_i32, %c0_i32_0 : i32, i32
  }
  func.func @transform_3(%arg0: i32, %arg1: i32) -> (i32, i32) {
    %c0_i32 = arith.constant 0 : i32
    %c0_i32_0 = arith.constant 0 : i32
    return %arg0, %c0_i32 : i32, i32
  }
  func.func @transform_4(%arg0: i32, %arg1: i32) -> (i32, i32) {
    %c0_i32 = arith.constant 0 : i32
    %c0_i32_0 = arith.constant 0 : i32
    %c0_i32_1 = arith.constant 0 : i32
    return %c0_i32, %c0_i32_0 : i32, i32
  }
  func.func @transform_5(%arg0: i32, %arg1: i32) -> (i32, i32) {
    %c0_i32 = arith.constant 0 : i32
    %c0_i32_0 = arith.constant 0 : i32
    %c0_i32_1 = arith.constant 0 : i32
    return %c0_i32, %c0_i32_0 : i32, i32
  }
  func.func @transform_6(%arg0: i32, %arg1: i32) -> (i32, i32) {
    %c0_i32 = arith.constant 0 : i32
    %c0_i32_0 = arith.constant 0 : i32
    return %arg0, %c0_i32 : i32, i32
  }
}

module attributes {stable_mosaic.version = 11 : i64} {
  func.func @_linear_kernel(%arg0: i32, %arg1: i32, %arg2: memref<8x32xf32, #tpu.memory_space<vmem>>, %arg3: memref<32x128xf32, #tpu.memory_space<vmem>>, %arg4: memref<1x128xf32, #tpu.memory_space<vmem>>, %arg5: memref<8x128xf32, #tpu.memory_space<vmem>>, %arg6: memref<8x128xf32, #tpu.memory_space<vmem>>) attributes {dimension_semantics = [#tpu.dimension_semantics<parallel>, #tpu.dimension_semantics<arbitrary>], iteration_bounds = array<i64: 2, 1>, scalar_prefetch = 0 : i64, scratch_operands = 1 : i64, tpu.core_type = #tpu.core_type<tc>, window_params = [{transform_indices = @transform_0, window_bounds = array<i64: 8, 32>}, {transform_indices = @transform_1, window_bounds = array<i64: 32, 128>}, {pipeline_mode = #tpu.pipeline_mode<synchronous>, transform_indices = @transform_2, window_bounds = array<i64: 1, 128>}, {transform_indices = @transform_3, window_bounds = array<i64: 8, 128>}]} {
    %c0_i32 = arith.constant 0 : i32
    %0 = arith.cmpi eq, %arg1, %c0_i32 : i32
    %1 = arith.extui %0 : i1 to i32
    %c0_i32_0 = arith.constant 0 : i32
    %2 = arith.cmpi ne, %1, %c0_i32_0 : i32
    scf.if %2 {
      %cst_10 = arith.constant 0.000000e+00 : f32
      %12 = vector.broadcast %cst_10 : f32 to vector<8x128xf32>
      %c0_11 = arith.constant 0 : index
      %c0_12 = arith.constant 0 : index
      %13 = vector.load %arg6[%c0_11, %c0_12] : memref<8x128xf32, #tpu.memory_space<vmem>>, vector<8x128xf32>
      tpu.vector_store %arg6[%c0_11, %c0_12], %12 {strides = array<i32>} : memref<8x128xf32, #tpu.memory_space<vmem>>, vector<8x128xf32>,
    } else {
    }
    %c0 = arith.constant 0 : index
    %c0_1 = arith.constant 0 : index
    %3 = vector.load %arg6[%c0, %c0_1] : memref<8x128xf32, #tpu.memory_space<vmem>>, vector<8x128xf32>
    %c0_2 = arith.constant 0 : index
    %c0_3 = arith.constant 0 : index
    %4 = vector.load %arg2[%c0_2, %c0_3] : memref<8x32xf32, #tpu.memory_space<vmem>>, vector<8x32xf32>
    %c0_4 = arith.constant 0 : index
    %c0_5 = arith.constant 0 : index
    %5 = vector.load %arg3[%c0_4, %c0_5] : memref<32x128xf32, #tpu.memory_space<vmem>>, vector<32x128xf32>
    %cst = arith.constant dense<0.000000e+00> : vector<8x128xf32>
    %6 = tpu.matmul %4, %5, %cst {dimension_numbers = #tpu.dot_dimension_numbers<[1], [0], [0], [1], [0, 0, 1, 1], [], []>} : vector<8x32xf32>, vector<32x128xf32>, vector<8x128xf32> -> vector<8x128xf32>
    %7 = arith.addf %3, %6 : vector<8x128xf32>
    %c0_6 = arith.constant 0 : index
    %c0_7 = arith.constant 0 : index
    %8 = vector.load %arg6[%c0_6, %c0_7] : memref<8x128xf32, #tpu.memory_space<vmem>>, vector<8x128xf32>
    tpu.vector_store %arg6[%c0_6, %c0_7], %7 {strides = array<i32>} : memref<8x128xf32, #tpu.memory_space<vmem>>, vector<8x128xf32>,
    %c0_i32_8 = arith.constant 0 : i32
    %9 = arith.cmpi eq, %arg1, %c0_i32_8 : i32
    %10 = arith.extui %9 : i1 to i32
    %c0_i32_9 = arith.constant 0 : i32
    %11 = arith.cmpi ne, %10, %c0_i32_9 : i32
    scf.if %11 {
      %c0_10 = arith.constant 0 : index
      %c0_11 = arith.constant 0 : index
      %12 = vector.load %arg6[%c0_10, %c0_11] : memref<8x128xf32, #tpu.memory_space<vmem>>, vector<8x128xf32>
      %c0_12 = arith.constant 0 : index
      %c0_13 = arith.constant 0 : index
      %13 = vector.load %arg4[%c0_12, %c0_13] : memref<1x128xf32, #tpu.memory_space<vmem>>, vector<1x128xf32>
      %14 = vector.broadcast %13 : vector<1x128xf32> to vector<8x128xf32>
      %15 = arith.addf %12, %14 : vector<8x128xf32>
      %c0_14 = arith.constant 0 : index
      %c0_15 = arith.constant 0 : index
      %16 = vector.load %arg5[%c0_14, %c0_15] : memref<8x128xf32, #tpu.memory_space<vmem>>, vector<8x128xf32>
      tpu.vector_store %arg5[%c0_14, %c0_15], %15 {strides = array<i32>} : memref<8x128xf32, #tpu.memory_space<vmem>>, vector<8x128xf32>,
    } else {
    }
    return
  }
  func.func @transform_0(%arg0: i32, %arg1: i32) -> (i32, i32) {
    %c0_i32 = arith.constant 0 : i32
    return %arg0, %arg1 : i32, i32
  }
  func.func @transform_1(%arg0: i32, %arg1: i32) -> (i32, i32) {
    %c0_i32 = arith.constant 0 : i32
    %c0_i32_0 = arith.constant 0 : i32
    return %arg1, %c0_i32 : i32, i32
  }
  func.func @transform_2(%arg0: i32, %arg1: i32) -> (i32, i32) {
    %c0_i32 = arith.constant 0 : i32
    %c0_i32_0 = arith.constant 0 : i32
    %c0_i32_1 = arith.constant 0 : i32
    return %c0_i32, %c0_i32_0 : i32, i32
  }
  func.func @transform_3(%arg0: i32, %arg1: i32) -> (i32, i32) {
    %c0_i32 = arith.constant 0 : i32
    %c0_i32_0 = arith.constant 0 : i32
    return %arg0, %c0_i32 : i32, i32
  }
}

module attributes {stable_mosaic.version = 11 : i64} {
  func.func @_crf_kernel(%arg0: memref<8x2x128xf32, #tpu.memory_space<vmem>>, %arg1: memref<8x2x1xi32, #tpu.memory_space<vmem>>, %arg2: memref<8x2x1xf32, #tpu.memory_space<vmem>>, %arg3: memref<128x128xf32, #tpu.memory_space<vmem>>, %arg4: memref<1x1xf32, #tpu.memory_space<vmem>>, %arg5: memref<8x2x1xi32, #tpu.memory_space<vmem>>, %arg6: memref<8x2x128xi32, #tpu.memory_space<vmem>>) attributes {dimension_semantics = [], scalar_prefetch = 0 : i64, scratch_operands = 1 : i64, tpu.core_type = #tpu.core_type<tc>} {
    %c0 = arith.constant 0 : index
    %c0_0 = arith.constant 0 : index
    %0 = vector.load %arg3[%c0, %c0_0] : memref<128x128xf32, #tpu.memory_space<vmem>>, vector<128x128xf32>
    %1 = tpu.iota {dimensions = array<i32: 1>} : vector<2x128xi32>
    %c5_i32 = arith.constant 5 : i32
    %2 = vector.broadcast %c5_i32 : i32 to vector<2x128xi32>
    %3 = arith.cmpi slt, %1, %2 : vector<2x128xi32>
    %c0_1 = arith.constant 0 : index
    %c0_2 = arith.constant 0 : index
    %c0_3 = arith.constant 0 : index
    %4 = vector.load %arg1[%c0_1, %c0_2, %c0_3] : memref<8x2x1xi32, #tpu.memory_space<vmem>>, vector<1x2x1xi32>
    %5 = vector.shape_cast %4 : vector<1x2x1xi32> to vector<2x1xi32>
    %6 = vector.broadcast %5 : vector<2x1xi32> to vector<2x128xi32>
    %7 = arith.cmpi eq, %1, %6 : vector<2x128xi32>
    %8 = arith.extui %7 : vector<2x128xi1> to vector<2x128xi32>
    %9 = arith.sitofp %8 : vector<2x128xi32> to vector<2x128xf32>
    %c0_4 = arith.constant 0 : index
    %c0_5 = arith.constant 0 : index
    %c0_6 = arith.constant 0 : index
    %10 = vector.load %arg0[%c0_4, %c0_5, %c0_6] : memref<8x2x128xf32, #tpu.memory_space<vmem>>, vector<1x2x128xf32>
    %11 = vector.shape_cast %10 : vector<1x2x128xf32> to vector<2x128xf32>
    %12 = arith.mulf %11, %9 : vector<2x128xf32>
    %cst = arith.constant dense<0.000000e+00> : vector<2xf32>
    %13 = vector.multi_reduction <add>, %12, %cst [1] : vector<2x128xf32> to vector<2xf32>
    %14 = vector.shape_cast %13 : vector<2xf32> to vector<2x1xf32>
    %c1_i32 = arith.constant 1 : i32
    %c7_i32 = arith.constant 7 : i32
    %15 = arith.addi %c1_i32, %c7_i32 : i32
    %c1_i32_7 = arith.constant 1 : i32
    %16:2 = scf.for %arg7 = %c1_i32 to %15 step %c1_i32_7 iter_args(%arg8 = %14, %arg9 = %9) -> (vector<2x1xf32>, vector<2x128xf32>)  : i32 {
      %59 = arith.index_cast %arg7 : i32 to index
      %c0_36 = arith.constant 0 : index
      %c0_37 = arith.constant 0 : index
      %60 = vector.load %arg1[%59, %c0_36, %c0_37] : memref<8x2x1xi32, #tpu.memory_space<vmem>>, vector<1x2x1xi32>
      %61 = vector.shape_cast %60 : vector<1x2x1xi32> to vector<2x1xi32>
      %62 = vector.broadcast %61 : vector<2x1xi32> to vector<2x128xi32>
      %63 = arith.cmpi eq, %1, %62 : vector<2x128xi32>
      %64 = arith.extui %63 : vector<2x128xi1> to vector<2x128xi32>
      %65 = arith.sitofp %64 : vector<2x128xi32> to vector<2x128xf32>
      %66 = arith.index_cast %arg7 : i32 to index
      %c0_38 = arith.constant 0 : index
      %c0_39 = arith.constant 0 : index
      %67 = vector.load %arg2[%66, %c0_38, %c0_39] : memref<8x2x1xf32, #tpu.memory_space<vmem>>, vector<1x2x1xf32>
      %68 = vector.shape_cast %67 : vector<1x2x1xf32> to vector<2x1xf32>
      %69 = arith.index_cast %arg7 : i32 to index
      %c0_40 = arith.constant 0 : index
      %c0_41 = arith.constant 0 : index
      %70 = vector.load %arg0[%69, %c0_40, %c0_41] : memref<8x2x128xf32, #tpu.memory_space<vmem>>, vector<1x2x128xf32>
      %71 = vector.shape_cast %70 : vector<1x2x128xf32> to vector<2x128xf32>
      %72 = arith.mulf %71, %65 : vector<2x128xf32>
      %cst_42 = arith.constant dense<0.000000e+00> : vector<2xf32>
      %73 = vector.multi_reduction <add>, %72, %cst_42 [1] : vector<2x128xf32> to vector<2xf32>
      %74 = vector.shape_cast %73 : vector<2xf32> to vector<2x1xf32>
      %cst_43 = arith.constant dense<0.000000e+00> : vector<2x128xf32>
      %75 = tpu.matmul %arg9, %0, %cst_43 {dimension_numbers = #tpu.dot_dimension_numbers<[1], [0], [0], [1], [0, 0, 1, 1], [], []>} : vector<2x128xf32>, vector<128x128xf32>, vector<2x128xf32> -> vector<2x128xf32>
      %76 = arith.mulf %75, %65 : vector<2x128xf32>
      %cst_44 = arith.constant dense<0.000000e+00> : vector<2xf32>
      %77 = vector.multi_reduction <add>, %76, %cst_44 [1] : vector<2x128xf32> to vector<2xf32>
      %78 = vector.shape_cast %77 : vector<2xf32> to vector<2x1xf32>
      %79 = arith.addf %74, %78 : vector<2x1xf32>
      %80 = arith.mulf %79, %68 : vector<2x1xf32>
      %81 = arith.addf %arg8, %80 : vector<2x1xf32>
      scf.yield %81, %65 : vector<2x1xf32>, vector<2x128xf32>
    }
    %c7_i32_8 = arith.constant 7 : i32
    %c0_i32 = arith.constant 0 : i32
    %17 = vector.broadcast %c0_i32 : i32 to vector<2x128xi32>
    %18 = arith.cmpi eq, %1, %17 : vector<2x128xi32>
    %cst_9 = arith.constant 0.000000e+00 : f32
    %cst_10 = arith.constant -1.000000e+04 : f32
    %19 = vector.broadcast %cst_9 : f32 to vector<2x128xf32>
    %20 = vector.broadcast %cst_10 : f32 to vector<2x128xf32>
    %21 = arith.select %18, %19, %20 : vector<2x128xi1>, vector<2x128xf32>
    %c0_i32_11 = arith.constant 0 : i32
    %c8_i32 = arith.constant 8 : i32
    %22 = arith.addi %c0_i32_11, %c8_i32 : i32
    %c1_i32_12 = arith.constant 1 : i32
    %23 = scf.for %arg7 = %c0_i32_11 to %22 step %c1_i32_12 iter_args(%arg8 = %21) -> (vector<2x128xf32>)  : i32 {
      %59 = arith.index_cast %arg7 : i32 to index
      %c0_36 = arith.constant 0 : index
      %c0_37 = arith.constant 0 : index
      %60 = vector.load %arg0[%59, %c0_36, %c0_37] : memref<8x2x128xf32, #tpu.memory_space<vmem>>, vector<1x2x128xf32>
      %61 = vector.shape_cast %60 : vector<1x2x128xf32> to vector<2x128xf32>
      %62 = arith.index_cast %arg7 : i32 to index
      %c0_38 = arith.constant 0 : index
      %c0_39 = arith.constant 0 : index
      %63 = vector.load %arg2[%62, %c0_38, %c0_39] : memref<8x2x1xf32, #tpu.memory_space<vmem>>, vector<1x2x1xf32>
      %64 = vector.shape_cast %63 : vector<1x2x1xf32> to vector<2x1xf32>
      %65 = vector.shape_cast %arg8 : vector<2x128xf32> to vector<2x128x1xf32>
      %66 = vector.shape_cast %0 : vector<128x128xf32> to vector<1x128x128xf32>
      %67 = vector.broadcast %65 : vector<2x128x1xf32> to vector<2x128x128xf32>
      %68 = vector.broadcast %66 : vector<1x128x128xf32> to vector<2x128x128xf32>
      %69 = arith.addf %67, %68 : vector<2x128x128xf32>
      %cst_40 = arith.constant dense<0xFF800000> : vector<2x128xf32>
      %70 = vector.multi_reduction <maximumf>, %69, %cst_40 [1] : vector<2x128x128xf32> to vector<2x128xf32>
      %71 = vector.shape_cast %70 : vector<2x128xf32> to vector<2x1x128xf32>
      %72 = vector.broadcast %71 : vector<2x1x128xf32> to vector<2x128x128xf32>
      %73 = arith.subf %69, %72 : vector<2x128x128xf32>
      %74 = math.exp %73 : vector<2x128x128xf32>
      %cst_41 = arith.constant dense<0.000000e+00> : vector<2x128xf32>
      %75 = vector.multi_reduction <add>, %74, %cst_41 [1] : vector<2x128x128xf32> to vector<2x128xf32>
      %76 = math.log %75 : vector<2x128xf32>
      %77 = arith.addf %70, %76 : vector<2x128xf32>
      %78 = arith.addf %77, %61 : vector<2x128xf32>
      %79 = vector.broadcast %64 : vector<2x1xf32> to vector<2x128xf32>
      %80 = arith.mulf %79, %78 : vector<2x128xf32>
      %cst_42 = arith.constant 1.000000e+00 : f32
      %81 = vector.broadcast %cst_42 : f32 to vector<2x1xf32>
      %82 = arith.subf %81, %64 : vector<2x1xf32>
      %83 = vector.broadcast %82 : vector<2x1xf32> to vector<2x128xf32>
      %84 = arith.mulf %83, %arg8 : vector<2x128xf32>
      %85 = arith.addf %80, %84 : vector<2x128xf32>
      %cst_43 = arith.constant -1.000000e+04 : f32
      %86 = vector.broadcast %cst_43 : f32 to vector<2x128xf32>
      %87 = arith.select %3, %85, %86 : vector<2x128xi1>, vector<2x128xf32>
      scf.yield %87 : vector<2x128xf32>
    }
    %c8_i32_13 = arith.constant 8 : i32
    %cst_14 = arith.constant dense<0xFF800000> : vector<2xf32>
    %24 = vector.multi_reduction <maximumf>, %23, %cst_14 [1] : vector<2x128xf32> to vector<2xf32>
    %25 = vector.shape_cast %24 : vector<2xf32> to vector<2x1xf32>
    %26 = vector.broadcast %25 : vector<2x1xf32> to vector<2x128xf32>
    %27 = arith.subf %23, %26 : vector<2x128xf32>
    %28 = math.exp %27 : vector<2x128xf32>
    %cst_15 = arith.constant dense<0.000000e+00> : vector<2xf32>
    %29 = vector.multi_reduction <add>, %28, %cst_15 [1] : vector<2x128xf32> to vector<2xf32>
    %30 = vector.shape_cast %29 : vector<2xf32> to vector<2x1xf32>
    %31 = math.log %30 : vector<2x1xf32>
    %32 = arith.addf %25, %31 : vector<2x1xf32>
    %33 = arith.subf %32, %16#0 : vector<2x1xf32>
    %cst_16 = arith.constant dense<0.000000e+00> : vector<1xf32>
    %34 = vector.multi_reduction <add>, %33, %cst_16 [0] : vector<2x1xf32> to vector<1xf32>
    %35 = vector.shape_cast %34 : vector<1xf32> to vector<1x1xf32>
    %cst_17 = arith.constant 5.000000e-01 : f32
    %36 = vector.broadcast %cst_17 : f32 to vector<1x1xf32>
    %37 = arith.mulf %35, %36 : vector<1x1xf32>
    %c0_18 = arith.constant 0 : index
    %c0_19 = arith.constant 0 : index
    %38 = vector.load %arg4[%c0_18, %c0_19] : memref<1x1xf32, #tpu.memory_space<vmem>>, vector<1x1xf32>
    tpu.vector_store %arg4[%c0_18, %c0_19], %37 {strides = array<i32>} : memref<1x1xf32, #tpu.memory_space<vmem>>, vector<1x1xf32>,
    %39 = tpu.iota {dimensions = array<i32: 1>} : vector<2x128x128xi32>
    %c0_20 = arith.constant 0 : index
    %c0_21 = arith.constant 0 : index
    %c0_22 = arith.constant 0 : index
    %40 = vector.load %arg0[%c0_20, %c0_21, %c0_22] : memref<8x2x128xf32, #tpu.memory_space<vmem>>, vector<1x2x128xf32>
    %41 = vector.shape_cast %40 : vector<1x2x128xf32> to vector<2x128xf32>
    %cst_23 = arith.constant -1.000000e+09 : f32
    %42 = vector.broadcast %cst_23 : f32 to vector<2x128xf32>
    %43 = arith.select %3, %41, %42 : vector<2x128xi1>, vector<2x128xf32>
    %c1_i32_24 = arith.constant 1 : i32
    %c7_i32_25 = arith.constant 7 : i32
    %44 = arith.addi %c1_i32_24, %c7_i32_25 : i32
    %c1_i32_26 = arith.constant 1 : i32
    %45 = scf.for %arg7 = %c1_i32_24 to %44 step %c1_i32_26 iter_args(%arg8 = %43) -> (vector<2x128xf32>)  : i32 {
      %59 = vector.shape_cast %arg8 : vector<2x128xf32> to vector<2x128x1xf32>
      %60 = vector.shape_cast %0 : vector<128x128xf32> to vector<1x128x128xf32>
      %61 = vector.broadcast %59 : vector<2x128x1xf32> to vector<2x128x128xf32>
      %62 = vector.broadcast %60 : vector<1x128x128xf32> to vector<2x128x128xf32>
      %63 = arith.addf %61, %62 : vector<2x128x128xf32>
      %cst_36 = arith.constant dense<0xFF800000> : vector<2x128xf32>
      %64 = vector.multi_reduction <maximumf>, %63, %cst_36 [1] : vector<2x128x128xf32> to vector<2x128xf32>
      %65 = vector.shape_cast %64 : vector<2x128xf32> to vector<2x1x128xf32>
      %66 = vector.broadcast %65 : vector<2x1x128xf32> to vector<2x128x128xf32>
      %67 = arith.cmpf oge, %63, %66 : vector<2x128x128xf32>
      %c128_i32_37 = arith.constant 128 : i32
      %68 = vector.broadcast %c128_i32_37 : i32 to vector<2x128x128xi32>
      %69 = arith.select %67, %39, %68 : vector<2x128x128xi1>, vector<2x128x128xi32>
      %cst_38 = arith.constant dense<2147483647> : vector<2x128xi32>
      %70 = vector.multi_reduction <minsi>, %69, %cst_38 [1] : vector<2x128x128xi32> to vector<2x128xi32>
      %71 = arith.index_cast %arg7 : i32 to index
      %c0_39 = arith.constant 0 : index
      %c0_40 = arith.constant 0 : index
      %72 = vector.load %arg6[%71, %c0_39, %c0_40] : memref<8x2x128xi32, #tpu.memory_space<vmem>>, vector<1x2x128xi32>
      %73 = vector.shape_cast %72 : vector<1x2x128xi32> to vector<2x128xi32>
      %74 = vector.shape_cast %70 : vector<2x128xi32> to vector<1x2x128xi32>
      tpu.vector_store %arg6[%71, %c0_39, %c0_40], %74 {strides = array<i32>} : memref<8x2x128xi32, #tpu.memory_space<vmem>>, vector<1x2x128xi32>,
      %cst_41 = arith.constant dense<0xFF800000> : vector<2x128xf32>
      %75 = vector.multi_reduction <maximumf>, %63, %cst_41 [1] : vector<2x128x128xf32> to vector<2x128xf32>
      %76 = arith.index_cast %arg7 : i32 to index
      %c0_42 = arith.constant 0 : index
      %c0_43 = arith.constant 0 : index
      %77 = vector.load %arg0[%76, %c0_42, %c0_43] : memref<8x2x128xf32, #tpu.memory_space<vmem>>, vector<1x2x128xf32>
      %78 = vector.shape_cast %77 : vector<1x2x128xf32> to vector<2x128xf32>
      %79 = arith.index_cast %arg7 : i32 to index
      %c0_44 = arith.constant 0 : index
      %c0_45 = arith.constant 0 : index
      %80 = vector.load %arg2[%79, %c0_44, %c0_45] : memref<8x2x1xf32, #tpu.memory_space<vmem>>, vector<1x2x1xf32>
      %81 = vector.shape_cast %80 : vector<1x2x1xf32> to vector<2x1xf32>
      %82 = vector.broadcast %81 : vector<2x1xf32> to vector<2x128xf32>
      %83 = arith.mulf %78, %82 : vector<2x128xf32>
      %84 = arith.addf %75, %83 : vector<2x128xf32>
      %cst_46 = arith.constant -1.000000e+09 : f32
      %85 = vector.broadcast %cst_46 : f32 to vector<2x128xf32>
      %86 = arith.select %3, %84, %85 : vector<2x128xi1>, vector<2x128xf32>
      scf.yield %86 : vector<2x128xf32>
    }
    %c7_i32_27 = arith.constant 7 : i32
    %cst_28 = arith.constant dense<0xFF800000> : vector<2xf32>
    %46 = vector.multi_reduction <maximumf>, %45, %cst_28 [1] : vector<2x128xf32> to vector<2xf32>
    %47 = vector.shape_cast %46 : vector<2xf32> to vector<2x1xf32>
    %48 = vector.broadcast %47 : vector<2x1xf32> to vector<2x128xf32>
    %49 = arith.cmpf oge, %45, %48 : vector<2x128xf32>
    %c128_i32 = arith.constant 128 : i32
    %50 = vector.broadcast %c128_i32 : i32 to vector<2x128xi32>
    %51 = arith.select %49, %1, %50 : vector<2x128xi1>, vector<2x128xi32>
    %cst_29 = arith.constant dense<2147483647> : vector<2xi32>
    %52 = vector.multi_reduction <minsi>, %51, %cst_29 [1] : vector<2x128xi32> to vector<2xi32>
    %53 = vector.shape_cast %52 : vector<2xi32> to vector<2x1xi32>
    %c7 = arith.constant 7 : index
    %c0_30 = arith.constant 0 : index
    %c0_31 = arith.constant 0 : index
    %54 = vector.load %arg5[%c7, %c0_30, %c0_31] : memref<8x2x1xi32, #tpu.memory_space<vmem>>, vector<1x2x1xi32>
    %55 = vector.shape_cast %54 : vector<1x2x1xi32> to vector<2x1xi32>
    %56 = vector.shape_cast %53 : vector<2x1xi32> to vector<1x2x1xi32>
    tpu.vector_store %arg5[%c7, %c0_30, %c0_31], %56 {strides = array<i32>} : memref<8x2x1xi32, #tpu.memory_space<vmem>>, vector<1x2x1xi32>,
    %c0_i32_32 = arith.constant 0 : i32
    %c7_i32_33 = arith.constant 7 : i32
    %57 = arith.addi %c0_i32_32, %c7_i32_33 : i32
    %c1_i32_34 = arith.constant 1 : i32
    %58 = scf.for %arg7 = %c0_i32_32 to %57 step %c1_i32_34 iter_args(%arg8 = %53) -> (vector<2x1xi32>)  : i32 {
      %c6_i32 = arith.constant 6 : i32
      %59 = arith.subi %c6_i32, %arg7 : i32
      %60 = vector.broadcast %arg8 : vector<2x1xi32> to vector<2x128xi32>
      %61 = arith.cmpi eq, %1, %60 : vector<2x128xi32>
      %c1_i32_36 = arith.constant 1 : i32
      %62 = arith.addi %59, %c1_i32_36 : i32
      %63 = arith.index_cast %62 : i32 to index
      %c0_37 = arith.constant 0 : index
      %c0_38 = arith.constant 0 : index
      %64 = vector.load %arg6[%63, %c0_37, %c0_38] : memref<8x2x128xi32, #tpu.memory_space<vmem>>, vector<1x2x128xi32>
      %65 = vector.shape_cast %64 : vector<1x2x128xi32> to vector<2x128xi32>
      %c0_i32_39 = arith.constant 0 : i32
      %66 = vector.broadcast %c0_i32_39 : i32 to vector<2x128xi32>
      %67 = arith.select %61, %65, %66 : vector<2x128xi1>, vector<2x128xi32>
      %cst_40 = arith.constant dense<0> : vector<2xi32>
      %68 = vector.multi_reduction <add>, %67, %cst_40 [1] : vector<2x128xi32> to vector<2xi32>
      %69 = vector.shape_cast %68 : vector<2xi32> to vector<2x1xi32>
      %70 = arith.index_cast %59 : i32 to index
      %c0_41 = arith.constant 0 : index
      %c0_42 = arith.constant 0 : index
      %71 = vector.load %arg5[%70, %c0_41, %c0_42] : memref<8x2x1xi32, #tpu.memory_space<vmem>>, vector<1x2x1xi32>
      %72 = vector.shape_cast %71 : vector<1x2x1xi32> to vector<2x1xi32>
      %73 = vector.shape_cast %69 : vector<2x1xi32> to vector<1x2x1xi32>
      tpu.vector_store %arg5[%70, %c0_41, %c0_42], %73 {strides = array<i32>} : memref<8x2x1xi32, #tpu.memory_space<vmem>>, vector<1x2x1xi32>,
      scf.yield %69 : vector<2x1xi32>
    }
    %c7_i32_35 = arith.constant 7 : i32
    return
  }
}

</mosaic_0001>

<bundles_post_ra>
// kernel: model_forward.13
= control target key start
LH: loop header
LB: loop body
LE: loop exit
PB: predicated region body
PF: predicated region fallthrough
CT: control target
= control target key end

     0   :  { %s301_s12 = smov 0   ;;  %s327_s0 = inlined_call_operand.vmem [shape: f32[16,32], index: 0, kind: input, shape index: {}]   ;;  %s328_s1 = inlined_call_operand.vmem [shape: f32[1,32], index: 1, kind: input, shape index: {}]   ;;  %s329_s2 = inlined_call_operand.vmem [shape: f32[1,32], index: 2, kind: input, shape index: {}]   ;;  %s330_s3 = inlined_call_operand.vmem [shape: f32[16,32], index: 3, kind: output, shape index: {}]  }
   0x1 LB: > { %s252_s13 = sadd.s32 4294967295, %s279_s12   ;;  %p256_p0 = scmp.ge.s32.totalorder %s279_s12, 1  ;;  %s279_s12 = sphi %s301_s12, %s13_s12  }
   0x2   : > { %p136_p1 = scmp.lt.s32.totalorder %s279_s12, 3 }
   0x4   : > { %p137_p2 = pnand %p256_p0, %p136_p1 }
   0x5   : > { %p158_p3 = scmp.lt.s32.totalorder (!%p137_p2), %s252_s13, 1 }
   0x6   : > { %140 = sbr.rel (%p137_p2) target bundleno = 324 (0x144), region = 32 }
   0xb   : > { %s332_s13 = smov (!%p158_p3, %s252_s13), 1  ;;  %vm167_vm0 = vcmask 261120   ;;  %v259_v11 = vld [vmem:[%s328_s1] ss:$0 sm:$0xff] }
   0xc   : > { %s257_s14 = sshll.u32 %s332_s13, 3  ;;  %v260_v13 = vld [vmem:[%s329_s2] ss:$0 sm:$0xff] }
   0xd   : > { %s161_s17 = scalar_lea.vmem %s327_s0, %s257_s14  ;;  %s165_s24 = scalar_lea.vmem %s330_s3, %s257_s14 }
   0xe   : > { %v166_v0 = vld [vmem:[%s161_s17] sm:$0xff] }
   0xf   : > { %v168_v1 = vsel %vm167_vm0, %v166_v0, 0.0 }
  0x10   : > { %169 = vadd.xlane.f32.xlu0 %v168_v1 }
  0x99   : > { %v170_v2 = vpop.xlane.xlu0 %169 }
  0x9a   : > { %v172_v3 = vmul.f32 0.03125, %v170_v2 }
  0x9c   : > { %v173_v4 = vsub.f32 %v166_v0, %v172_v3 }
  0x9e   : > { %v174_v5 = vmul.f32 %v173_v4, %v173_v4 }
  0xa0   : > { %v175_v6 = vsel %vm167_vm0, %v174_v5, 0.0 }
  0xa1   : > { %176 = vadd.xlane.f32.xlu0 %v175_v6 }
 0x12a   : > { %v177_v7 = vpop.xlane.xlu0 %176 }
 0x12b   : > { %v178_v8 = vmul.f32 0.03125, %v177_v7 }
 0x12d   : > { %v179_v9 = vadd.f32 1e-05, %v178_v8 }
 0x12f   : > { %271 = vrsqrt.f32 %v179_v9 }
 0x13c   : > { %v272_v10 = vpop.eup %271 }
 0x13d   : > { %v181_v12 = vmul.f32 %v272_v10, %v173_v4 }
 0x13f   : > { %v189_v14 = vmul.f32 %v259_v11, %v181_v12 }
 0x141   : > { %v197_v15 = vadd.f32 %v260_v13, %v189_v14 }
 0x143   : > { %198 = vst.msk [vmem:[%s165_s24] sm:$0xff] %vm167_vm0, %v197_v15 }
 0x144 PF: > { %s13_s12 = sadd.s32 1, %s279_s12  }
 0x145   : > { %p10_p4 = scmp.ge.s32.totalorder %s13_s12, 4  }
 0x147   :  { %12 = sbr.rel (!%p10_p4) target bundleno = 1 (0x1), region = 62 }

// kernel: model_forward.14
= control target key start
LH: loop header
LB: loop body
LE: loop exit
PB: predicated region body
PF: predicated region fallthrough
CT: control target
= control target key end

     0   :  { %s493_s12 = smov 0   ;;  %s495_s13 = smov 0   ;;  %s544_s0 = inlined_call_operand.vmem [shape: f32[16,32], index: 0, kind: input, shape index: {}]   ;;  %s545_s1 = inlined_call_operand.vmem [shape: f32[32,96], index: 1, kind: input, shape index: {}]   ;;  %s546_s2 = inlined_call_operand.vmem [shape: f32[1,96], index: 2, kind: input, shape index: {}]   ;;  %s547_s3 = inlined_call_operand.vmem [shape: f32[16,96], index: 3, kind: output, shape index: {}]  }
   0x1   :  { %s497_s14 = smov 0  }
   0x2 LB: > { %s25_s15 = sadd.s32 1, %s465_s13  ;;  %p398_p0 = scmp.ge.s32.totalorder %s469_s14, 1  ;;  %s469_s14 = sphi %s497_s14, %s13_s14   ;;  %s465_s13 = sphi %s495_s13, %s549_s13   ;;  %s461_s12 = sphi %s493_s12, %s548_s12  }
   0x3   : > { %p27_p1 = scmp.ge.s32.totalorder %s25_s15, 2  ;;  %p164_p2 = scmp.lt.s32.totalorder %s469_s14, 3 }
   0x5   : > { %s551_s15 = smov (%p27_p1, %s25_s15), 0  ;;  %p165_p3 = pnand %p398_p0, %p164_p2 }
   0x6   : > { %p194_p4 = scmp.lt.s32.totalorder (!%p165_p3), %s461_s12, 1 }
   0x7   : > { %168 = sbr.rel (%p165_p3) target bundleno = 227 (0xe3), region = 32 }
   0xc   : > { %v222_v0 = vld [vmem:[%s545_s1 + $0x18] sm:$0xff]  ;;  %v471_v1 = vmov 0.0   ;;  %v221_v2 = vld [vmem:[%s545_s1 + $0x10] sm:$0xff]  ;;  %vm472_vm0 = vmmov 0   ;;  %vm215_vm1 = vcmask 785408   ;;  %s553_s12 = smov (!%p194_p4, %s461_s12), 1 }
   0xd   : > { %410 = vmatprep.subr.mxu0 %v471_v1  ;;  %418 = vmatprep.mubr.msk.f32.mxu0 %vm472_vm0, %v471_v1  ;;  %216 = vst.msk [vmem:[#allocation2] sm:$0xff] %vm215_vm1, %v471_v1  ;;  %v220_v3 = vld [vmem:[%s545_s1 + $0x8] sm:$0xff]  ;;  %s399_s22 = sshll.u32 %s553_s12, 3  ;;  %v219_v4 = vld [vmem:[%s545_s1] sm:$0xff]  ;;  %vm223_vm2 = vcmask 261120  }
   0xe   : > { %411 = vmatpush3.msra.mxu0 %v222_v0  ;;  %s200_s27 = scalar_lea.vmem %s544_s0, %s399_s22  ;;  %v402_v10 = vld [vmem:[%s546_s2] ss:$0 sm:$0xff]  ;;  %s210_s5 = scalar_lea.vmem %s547_s3, %s399_s22 }
   0xf   : > { %412 = vmatprep.subr.mxu0 %v471_v1  ;;  %v218_v5 = vld [vmem:[%s200_s27] sm:$0xff] }
  0x10   : > { %413 = vmatpush3.msra.mxu0 %v221_v2 }
  0x11   : > { %414 = vmatprep.subr.mxu0 %v471_v1 }
  0x12   : > { %415 = vmatpush3.msra.mxu0 %v220_v3 }
  0x13   : > { %416 = vmatprep.subr.mxu0 %v471_v1 }
  0x14   : > { %417 = vmatpush3.msra.mxu0 %v219_v4  ;;  %v217_v6 = vld [vmem:[#allocation2] sm:$0xff] }
  0x15   : > { %419 = vmatmul.mubr.msk.f32.vlgmr.msra.gmra.mxu0 %vm223_vm2, %v218_v5 }
  0xd5   : > { %v293_v7 = vpop.f32.mrf.mxu0 }
  0xd6   : > { %v297_v8 = vadd.f32 %v293_v7, %v217_v6 }
  0xd7   : > { %v420_v9 = vpop.f32.mrf.mxu0 }
  0xd8   : > { %299 = vst.msk [vmem:[#allocation2] sm:$0xff] %vm215_vm1, %v297_v8 }
  0xdf   : > { %v303_v11 = vld [vmem:[#allocation2] sm:$0xff] }
  0xe0   : > { %v311_v12 = vadd.f32 %v402_v10, %v303_v11 }
  0xe2   : > { %312 = vst.msk [vmem:[%s210_s5] sm:$0xff] %vm215_vm1, %v311_v12 }
  0xe3 PF: > { %s13_s14 = sadd.s32 1, %s469_s14   ;;  %s548_s12 = smov %s465_s13 }
  0xe4   : > { %p10_p5 = scmp.ge.s32.totalorder %s13_s14, 4   ;;  %s549_s13 = smov %s551_s15 }
  0xe6   :  { %12 = sbr.rel (!%p10_p5) target bundleno = 2 (0x2), region = 73 }

// kernel: model_forward.16
= control target key start
LH: loop header
LB: loop body
LE: loop exit
PB: predicated region body
PF: predicated region fallthrough
CT: control target
= control target key end

     0   :  { %s654_s21 = smov 0   ;;  %s656_s22 = smov 0   ;;  %s722_s0 = inlined_call_operand.vmem [shape: f32[16,32], index: 0, kind: input, shape index: {}]   ;;  %s723_s1 = inlined_call_operand.vmem [shape: f32[32,32], index: 1, kind: input, shape index: {}]   ;;  %s724_s2 = inlined_call_operand.vmem [shape: f32[1,32], index: 2, kind: input, shape index: {}]   ;;  %s725_s3 = inlined_call_operand.vmem [shape: f32[16,32], index: 3, kind: input, shape index: {}]   ;;  %s726_s4 = inlined_call_operand.vmem [shape: f32[1,32], index: 4, kind: input, shape index: {}]   ;;  %s727_s5 = inlined_call_operand.vmem [shape: f32[1,32], index: 5, kind: input, shape index: {}]   ;;  %s728_s6 = inlined_call_operand.vmem [shape: f32[16,32], index: 6, kind: output, shape index: {}]  }
   0x1   :  { %s658_s23 = smov 0  }
   0x2 LB: > { %s28_s24 = sadd.s32 1, %s611_s22  ;;  %p539_p0 = scmp.ge.s32.totalorder %s615_s23, 1  ;;  %s615_s23 = sphi %s658_s23, %s16_s23   ;;  %s611_s22 = sphi %s656_s22, %s730_s22   ;;  %s607_s21 = sphi %s654_s21, %s729_s21  }
   0x3   : > { %p30_p1 = scmp.ge.s32.totalorder %s28_s24, 2  ;;  %p248_p2 = scmp.lt.s32.totalorder %s615_s23, 3 }
   0x5   : > { %s732_s24 = smov (%p30_p1, %s28_s24), 0  ;;  %p249_p3 = pnand %p539_p0, %p248_p2 }
   0x6   : > { %p288_p4 = scmp.lt.s32.totalorder (!%p249_p3), %s607_s21, 1 }
   0x7   : > { %252 = sbr.rel (%p249_p3) target bundleno = 537 (0x219), region = 44 }
   0xc   : > { %v320_v0 = vld [vmem:[%s723_s1 + $0x18] sm:$0xff]  ;;  %v617_v1 = vmov 0.0   ;;  %v319_v2 = vld [vmem:[%s723_s1 + $0x10] sm:$0xff]  ;;  %vm618_vm0 = vmmov 0   ;;  %vm313_vm1 = vcmask 261120   ;;  %s734_s21 = smov (!%p288_p4, %s607_s21), 1 }
   0xd   : > { %554 = vmatprep.subr.mxu0 %v617_v1  ;;  %562 = vmatprep.mubr.msk.f32.mxu0 %vm618_vm0, %v617_v1  ;;  %314 = vst.msk [vmem:[#allocation2] sm:$0xff] %vm313_vm1, %v617_v1  ;;  %v318_v3 = vld [vmem:[%s723_s1 + $0x8] sm:$0xff]  ;;  %s682_s7 = sshll.u32 %s734_s21, 3  ;;  %v317_v4 = vld [vmem:[%s723_s1] sm:$0xff] }
   0xe   : > { %555 = vmatpush3.msra.mxu0 %v320_v0  ;;  %s294_s12 = scalar_lea.vmem %s722_s0, %s682_s7  ;;  %s304_s15 = scalar_lea.vmem %s725_s3, %s682_s7  ;;  %v544_v10 = vld [vmem:[%s724_s2] ss:$0 sm:$0xff] }
   0xf   : > { %556 = vmatprep.subr.mxu0 %v617_v1  ;;  %v316_v5 = vld [vmem:[%s294_s12] sm:$0xff]  ;;  %s308_s27 = scalar_lea.vmem %s728_s6, %s682_s7 }
  0x10   : > { %557 = vmatpush3.msra.mxu0 %v319_v2  ;;  %v409_v12 = vld [vmem:[%s304_s15] sm:$0xff] }
  0x11   : > { %558 = vmatprep.subr.mxu0 %v617_v1  ;;  %v545_v25 = vld [vmem:[%s726_s4] ss:$0 sm:$0xff] }
  0x12   : > { %559 = vmatpush3.msra.mxu0 %v318_v3  ;;  %v546_v27 = vld [vmem:[%s727_s5] ss:$0 sm:$0xff] }
  0x13   : > { %560 = vmatprep.subr.mxu0 %v617_v1 }
  0x14   : > { %561 = vmatpush3.msra.mxu0 %v317_v4  ;;  %v315_v6 = vld [vmem:[#allocation2] sm:$0xff] }
  0x15   : > { %563 = vmatmul.mubr.msk.f32.vlgmr.msra.gmra.mxu0 %vm313_vm1, %v316_v5 }
  0xd5   : > { %v391_v7 = vpop.f32.mrf.mxu0 }
  0xd6   : > { %v395_v8 = vadd.f32 %v391_v7, %v315_v6 }
  0xd7   : > { %v564_v9 = vpop.f32.mrf.mxu0 }
  0xd8   : > { %396 = vst.msk [vmem:[#allocation2] sm:$0xff] %vm313_vm1, %v395_v8 }
  0xdf   : > { %v400_v11 = vld [vmem:[#allocation2] sm:$0xff] }
  0xe0   : > { %v408_v13 = vadd.f32 %v544_v10, %v400_v11 }
  0xe2   : > { %v410_v14 = vadd.f32 %v409_v12, %v408_v13 }
  0xe4   : > { %v411_v15 = vsel %vm313_vm1, %v410_v14, 0.0 }
  0xe5   : > { %412 = vadd.xlane.f32.xlu0 %v411_v15 }
 0x16e   : > { %v413_v16 = vpop.xlane.xlu0 %412 }
 0x16f   : > { %v415_v17 = vmul.f32 0.03125, %v413_v16 }
 0x171   : > { %v416_v18 = vsub.f32 %v410_v14, %v415_v17 }
 0x173   : > { %v417_v19 = vmul.f32 %v416_v18, %v416_v18 }
 0x175   : > { %v418_v20 = vsel %vm313_vm1, %v417_v19, 0.0 }
 0x176   : > { %419 = vadd.xlane.f32.xlu0 %v418_v20 }
 0x1ff   : > { %v420_v21 = vpop.xlane.xlu0 %419 }
 0x200   : > { %v421_v22 = vmul.f32 0.03125, %v420_v21 }
 0x202   : > { %v422_v23 = vadd.f32 1e-05, %v421_v22 }
 0x204   : > { %591 = vrsqrt.f32 %v422_v23 }
 0x211   : > { %v592_v24 = vpop.eup %591 }
 0x212   : > { %v424_v26 = vmul.f32 %v592_v24, %v416_v18 }
 0x214   : > { %v432_v28 = vmul.f32 %v545_v25, %v424_v26 }
 0x216   : > { %v440_v29 = vadd.f32 %v546_v27, %v432_v28 }
 0x218   : > { %441 = vst.msk [vmem:[%s308_s27] sm:$0xff] %vm313_vm1, %v440_v29 }
 0x219 PF: > { %s16_s23 = sadd.s32 1, %s615_s23   ;;  %s729_s21 = smov %s611_s22 }
 0x21a   : > { %p13_p5 = scmp.ge.s32.totalorder %s16_s23, 4   ;;  %s730_s22 = smov %s732_s24 }
 0x21c   :  { %15 = sbr.rel (!%p13_p5) target bundleno = 2 (0x2), region = 88 }

// kernel: model_forward.17
= control target key start
LH: loop header
LB: loop body
LE: loop exit
PB: predicated region body
PF: predicated region fallthrough
CT: control target
= control target key end

     0   :  { %s504_s12 = smov 0   ;;  %s506_s13 = smov 0   ;;  %s558_s0 = inlined_call_operand.vmem [shape: f32[16,32], index: 0, kind: input, shape index: {}]   ;;  %s559_s1 = inlined_call_operand.vmem [shape: f32[32,64], index: 1, kind: input, shape index: {}]   ;;  %s560_s2 = inlined_call_operand.vmem [shape: f32[1,64], index: 2, kind: input, shape index: {}]   ;;  %s561_s3 = inlined_call_operand.vmem [shape: f32[16,64], index: 3, kind: output, shape index: {}]  }
   0x1   :  { %s508_s14 = smov 0  }
   0x2 LB: > { %s25_s15 = sadd.s32 1, %s476_s13  ;;  %p407_p0 = scmp.ge.s32.totalorder %s480_s14, 1  ;;  %s480_s14 = sphi %s508_s14, %s13_s14   ;;  %s476_s13 = sphi %s506_s13, %s563_s13   ;;  %s472_s12 = sphi %s504_s12, %s562_s12  }
   0x3   : > { %p27_p1 = scmp.ge.s32.totalorder %s25_s15, 2  ;;  %p164_p2 = scmp.lt.s32.totalorder %s480_s14, 3 }
   0x5   : > { %s565_s15 = smov (%p27_p1, %s25_s15), 0  ;;  %p165_p3 = pnand %p407_p0, %p164_p2 }
   0x6   : > { %p194_p4 = scmp.lt.s32.totalorder (!%p165_p3), %s472_s12, 1 }
   0x7   : > { %168 = sbr.rel (%p165_p3) target bundleno = 257 (0x101), region = 32 }
   0xc   : > { %v222_v0 = vld [vmem:[%s559_s1 + $0x18] sm:$0xff]  ;;  %v482_v1 = vmov 0.0   ;;  %v221_v2 = vld [vmem:[%s559_s1 + $0x10] sm:$0xff]  ;;  %vm483_vm0 = vmmov 0   ;;  %vm215_vm1 = vcmask 523264   ;;  %s567_s12 = smov (!%p194_p4, %s472_s12), 1 }
   0xd   : > { %419 = vmatprep.subr.mxu0 %v482_v1  ;;  %427 = vmatprep.mubr.msk.f32.mxu0 %vm483_vm0, %v482_v1  ;;  %216 = vst.msk [vmem:[#allocation2] sm:$0xff] %vm215_vm1, %v482_v1  ;;  %v220_v3 = vld [vmem:[%s559_s1 + $0x8] sm:$0xff]  ;;  %s408_s22 = sshll.u32 %s567_s12, 3  ;;  %v219_v4 = vld [vmem:[%s559_s1] sm:$0xff]  ;;  %vm223_vm2 = vcmask 261120  }
   0xe   : > { %420 = vmatpush3.msra.mxu0 %v222_v0  ;;  %s200_s27 = scalar_lea.vmem %s558_s0, %s408_s22  ;;  %v411_v10 = vld [vmem:[%s560_s2] ss:$0 sm:$0xff]  ;;  %s210_s5 = scalar_lea.vmem %s561_s3, %s408_s22 }
   0xf   : > { %421 = vmatprep.subr.mxu0 %v482_v1  ;;  %v218_v5 = vld [vmem:[%s200_s27] sm:$0xff] }
  0x10   : > { %422 = vmatpush3.msra.mxu0 %v221_v2 }
  0x11   : > { %423 = vmatprep.subr.mxu0 %v482_v1 }
  0x12   : > { %424 = vmatpush3.msra.mxu0 %v220_v3 }
  0x13   : > { %425 = vmatprep.subr.mxu0 %v482_v1 }
  0x14   : > { %426 = vmatpush3.msra.mxu0 %v219_v4  ;;  %v217_v6 = vld [vmem:[#allocation2] sm:$0xff] }
  0x15   : > { %428 = vmatmul.mubr.msk.f32.vlgmr.msra.gmra.mxu0 %vm223_vm2, %v218_v5 }
  0xd5   : > { %v293_v7 = vpop.f32.mrf.mxu0 }
  0xd6   : > { %v297_v8 = vadd.f32 %v293_v7, %v217_v6 }
  0xd7   : > { %v429_v9 = vpop.f32.mrf.mxu0 }
  0xd8   : > { %299 = vst.msk [vmem:[#allocation2] sm:$0xff] %vm215_vm1, %v297_v8 }
  0xdf   : > { %v303_v11 = vld [vmem:[#allocation2] sm:$0xff] }
  0xe0   : > { %v311_v12 = vadd.f32 %v411_v10, %v303_v11 }
  0xe2   : > { %v312_v13 = vmul.f32 %v311_v12, %v311_v12 }
  0xe4   : > { %v313_v14 = vmul.f32 %v312_v13, %v311_v12 }
  0xe6   : > { %v314_v15 = vmul.f32 0.044715, %v313_v14 }
  0xe8   : > { %v315_v16 = vadd.f32 %v314_v15, %v311_v12 }
  0xea   : > { %v316_v17 = vmul.f32 0.7978846, %v315_v16 }
  0xec   : > { %456 = vtanh.f32 %v316_v17 }
  0xf9   : > { %v457_v18 = vpop.eup %456 }
  0xfa   : > { %v318_v19 = vadd.f32 1.0, %v457_v18 }
  0xfc   : > { %v319_v20 = vmul.f32 0.5, %v318_v19 }
  0xfe   : > { %v320_v21 = vmul.f32 %v319_v20, %v311_v12 }
 0x100   : > { %321 = vst.msk [vmem:[%s210_s5] sm:$0xff] %vm215_vm1, %v320_v21 }
 0x101 PF: > { %s13_s14 = sadd.s32 1, %s480_s14   ;;  %s562_s12 = smov %s476_s13 }
 0x102   : > { %p10_p5 = scmp.ge.s32.totalorder %s13_s14, 4   ;;  %s563_s13 = smov %s565_s15 }
 0x104   :  { %12 = sbr.rel (!%p10_p5) target bundleno = 2 (0x2), region = 73 }

// kernel: model_forward.15
= control target key start
LH: loop header
LB: loop body
LE: loop exit
PB: predicated region body
PF: predicated region fallthrough
CT: control target
= control target key end

     0   :  { %s1067_s9 = smov 0   ;;  %s1157_s0 = inlined_call_operand.vmem [shape: f32[2,8,96], index: 0, kind: input, shape index: {}]   ;;  %s1158_s1 = inlined_call_operand.vmem [shape: f32[2,1,8], index: 1, kind: input, shape index: {}]   ;;  %s1159_s2 = inlined_call_operand.vmem [shape: f32[2,8,32], index: 2, kind: output, shape index: {}]  }
   0x1 LB: > { %s910_s10 = sadd.s32 4294967295, %s1034_s9   ;;  %p914_p0 = scmp.ge.s32.totalorder %s1034_s9, 1  ;;  %s1034_s9 = sphi %s1067_s9, %s12_s9  }
   0x2   : > { %p119_p1 = scmp.lt.s32.totalorder %s1034_s9, 3 }
   0x4   : > { %p120_p2 = pnand %p914_p0, %p119_p1 }
   0x5   : > { %p142_p3 = scmp.lt.s32.totalorder (!%p120_p2), %s910_s10, 1  ;;  %s1038_s15 = smov (!%p120_p2), 96  }
   0x6   : > { %123 = sbr.rel (%p120_p2) target bundleno = 1473 (0x5c1), region = 28  ;;  %s1039_s16 = smov (!%p120_p2), 64  }
   0x7   : > { %s1040_s17 = smov (!%p120_p2), 88   ;;  %s1041_s18 = smov (!%p120_p2), 120  }
   0x8   : > { %s1042_s19 = smov (!%p120_p2), 80   ;;  %s1043_s23 = smov (!%p120_p2), 72  }
   0x9   : > { %s1044_s24 = smov (!%p120_p2), 112   ;;  %s1045_s25 = smov (!%p120_p2), 104  }
   0xa   : > { %s1046_s26 = smov (!%p120_p2), 56   ;;  %s1047_s27 = smov (!%p120_p2), 40  }
   0xb   : > { %v1036_v0 = vmov 0.0   ;;  %vm1037_vm0 = vmmov 0   ;;  %s1161_s10 = smov (!%p142_p3, %s910_s10), 1  ;;  %vm158_vm1 = vcmask 64512   ;;  %s1048_s28 = smov 48   ;;  %vm842_vm2 = vcmask 130048  }
   0xc   : > { %948 = vmatprep.subr.mxu0 %v1036_v0  ;;  %950 = vmatprep.mubr.msk.f32.mxu0 %vm1037_vm0, %v1036_v0  ;;  %s915_s11 = sshll.u32 %s1161_s10, 3  ;;  %s148_s22 = scalar_lea.vmem %s1158_s1, %s1161_s10  ;;  %vm844_vm3 = vcmask 195584   ;;  %vm846_vm4 = vcmask 261120  }
   0xd   : > { %953 = vmatprep.subr.mxu1 %v1036_v0  ;;  %955 = vmatprep.mubr.msk.f32.mxu1 %vm1037_vm0, %v1036_v0  ;;  %s145_s14 = scalar_lea.vmem %s1157_s0, %s915_s11  ;;  %v919_v4 = vld [vmem:[%s148_s22] ss:$0 sm:$0xff]  ;;  %s1049_s29 = smov 8  }
   0xe   : > { %v1089_v1 = vld [vmem:[%s145_s14] sm:$0xff]  ;;  %s1050_s30 = smov 16   ;;  %s1051_s3 = smov 24  }
   0xf   : > { %156 = vrot.lane.b32.xlu0 %v1089_v1, %s1038_s15  ;;  %252 = vrot.lane.b32.xlu1 %v1089_v1, %s1039_s16  ;;  %s152_s6 = scalar_lea.vmem %s1159_s2, %s915_s11 }
  0x13   : > { %330 = vrot.lane.b32.xlu1 %v1089_v1, %s1040_s17 }
  0x17   : > { %328 = vrot.lane.b32.xlu1 %v1089_v1, %s1041_s18 }
  0x1b   : > { %497 = vrot.lane.b32.xlu1 %v1089_v1, %s1042_s19 }
  0x81   : > { %v157_v2 = vpop.permute.xlu0 %156  ;;  %v253_v9 = vpop.permute.xlu1 %252 }
  0x82   : > { %949 = vmatpush3.xpose.msk.msra.mxu0 %vm158_vm1, %v157_v2  ;;  %954 = vmatpush3.msra.mxu1 %v253_v9 }
  0x83   : > { %963 = vmatprep.subr.mxu0 %v1036_v0  ;;  %958 = vmatprep.subr.mxu1 %v1036_v0 }
  0x85   : > { %951 = vmatmul.mubr.msk.f32.vlgmr.msra.gmra.mxu0 %vm158_vm1, %v1089_v1  ;;  %v331_v15 = vpop.permute.xlu1 %330 }
  0x86   : > { %965 = vmatprep.mubr.msk.f32.mxu0 %vm1037_vm0, %v1036_v0 }
  0x89   : > { %v329_v16 = vpop.permute.xlu1 %328 }
  0x8d   : > { %v498_v17 = vpop.permute.xlu1 %497 }
 0x145   : > { %v229_v3 = vpop.f32.mrf.mxu0 }
 0x146   : > { %v233_v5 = vmul.f32 0.35355338, %v229_v3 }
 0x147   : > { %v952_v6 = vpop.f32.mrf.mxu0 }
 0x148   : > { %v240_v7 = vadd.f32 %v919_v4, %v233_v5 }
 0x14a   : > { %v241_v8 = vsel %vm158_vm1, %v240_v7, -inf }
 0x14b   : > { %242 = vmax.xlane.f32.xlu0 %v241_v8 }
 0x161   : > { %664 = vrot.lane.b32.xlu0 %v1089_v1, %s1043_s23 }
 0x1d4   : > { %v243_v10 = vpop.xlane.xlu0 %242 }
 0x1d5   : > { %v244_v11 = vsub.f32 %v240_v7, %v243_v10 }
 0x1d7   : > { %v245_v12 = vmul.f32 1.442695, %v244_v11 }
 0x1d8   : > { %v665_v22 = vpop.permute.xlu0 %664 }
 0x1d9   : > { %1012 = vpow2.f32 %v245_v12 }
 0x1e6   : > { %v1013_v13 = vpop.eup %1012 }
 0x1e7   : > { %v247_v14 = vsel %vm158_vm1, %v1013_v13, 0.0 }
 0x1e8   : > { %248 = vadd.xlane.f32.xlu1 %v247_v14 }
 0x1f9   : > { %495 = vrot.lane.b32.xlu1 %v1089_v1, %s1044_s24 }
 0x1fd   : > { %662 = vrot.lane.b32.xlu1 %v1089_v1, %s1045_s25 }
 0x271   : > { %v249_v18 = vpop.xlane.xlu1 %248 }
 0x272   : > { %1014 = vrcp.f32 %v249_v18 }
 0x275   : > { %v496_v21 = vpop.permute.xlu1 %495 }
 0x279   : > { %v663_v23 = vpop.permute.xlu1 %662 }
 0x27f   : > { %v1015_v19 = vpop.eup %1014 }
 0x280   : > { %v251_v20 = vmul.f32 %v1015_v19, %v1013_v13 }
 0x282   : > { %956 = vmatmul.mubr.msk.f32.vlgmr.msra.gmra.mxu1 %vm158_vm1, %v251_v20 }
 0x283   : > { %959 = vmatpush3.xpose.msk.msra.mxu1 %vm158_vm1, %v331_v15  ;;  %960 = vmatprep.mubr.msk.f32.mxu1 %vm1037_vm0, %v1036_v0 }
 0x284   : > { %968 = vmatprep.subr.mxu1 %v1036_v0 }
 0x286   : > { %961 = vmatmul.mubr.msk.f32.vlgmr.msra.gmra.mxu1 %vm158_vm1, %v329_v16 }
 0x287   : > { %969 = vmatpush3.xpose.msk.msra.mxu1 %vm158_vm1, %v498_v17  ;;  %970 = vmatprep.mubr.msk.f32.mxu1 %vm1037_vm0, %v1036_v0 }
 0x288   : > { %978 = vmatprep.subr.mxu1 %v1036_v0 }
 0x28a   : > { %971 = vmatmul.mubr.msk.f32.vlgmr.msra.gmra.mxu1 %vm158_vm1, %v496_v21 }
 0x28b   : > { %979 = vmatpush3.xpose.msk.msra.mxu1 %vm158_vm1, %v665_v22  ;;  %980 = vmatprep.mubr.msk.f32.mxu1 %vm1037_vm0, %v1036_v0 }
 0x28e   : > { %981 = vmatmul.mubr.msk.f32.vlgmr.msra.gmra.mxu1 %vm158_vm1, %v663_v23 }
 0x342   : > { %v1127_v24 = vpop.f32.mrf.mxu1 }
 0x344   : > { %v957_v25 = vpop.f32.mrf.mxu1 }
 0x346   : > { %v402_v26 = vpop.f32.mrf.mxu1 }
 0x347   : > { %v406_v27 = vmul.f32 0.35355338, %v402_v26 }
 0x348   : > { %v962_v28 = vpop.f32.mrf.mxu1 }
 0x349   : > { %v407_v29 = vadd.f32 %v919_v4, %v406_v27 }
 0x34a   : > { %v569_v30 = vpop.f32.mrf.mxu1 }
 0x34b   : > { %v573_v31 = vmul.f32 0.35355338, %v569_v30  ;;  %v408_v32 = vsel %vm158_vm1, %v407_v29, -inf }
 0x34c   : > { %409 = vmax.xlane.f32.xlu1 %v408_v32  ;;  %v972_v33 = vpop.f32.mrf.mxu1 }
 0x34d   : > { %v574_v34 = vadd.f32 %v919_v4, %v573_v31 }
 0x34e   : > { %v736_v35 = vpop.f32.mrf.mxu1 }
 0x34f   : > { %v740_v36 = vmul.f32 0.35355338, %v736_v35  ;;  %v575_v37 = vsel %vm158_vm1, %v574_v34, -inf }
 0x350   : > { %576 = vmax.xlane.f32.xlu0 %v575_v37  ;;  %v982_v38 = vpop.f32.mrf.mxu1 }
 0x351   : > { %v741_v39 = vadd.f32 %v919_v4, %v740_v36 }
 0x353   : > { %v742_v40 = vsel %vm158_vm1, %v741_v39, -inf }
 0x354   : > { %743 = vmax.xlane.f32.xlu1 %v742_v40 }
 0x365   : > { %419 = vrot.lane.b32.xlu1 %v1089_v1, %s1046_s26 }
 0x3d5   : > { %v410_v41 = vpop.xlane.xlu1 %409 }
 0x3d6   : > { %v411_v42 = vsub.f32 %v407_v29, %v410_v41 }
 0x3d8   : > { %v412_v43 = vmul.f32 1.442695, %v411_v42 }
 0x3d9   : > { %v577_v44 = vpop.xlane.xlu0 %576 }
 0x3da   : > { %1016 = vpow2.f32 %v412_v43  ;;  %v578_v45 = vsub.f32 %v574_v34, %v577_v44 }
 0x3dc   : > { %v579_v46 = vmul.f32 1.442695, %v578_v45 }
 0x3dd   : > { %v744_v47 = vpop.xlane.xlu1 %743 }
 0x3de   : > { %1018 = vpow2.f32 %v579_v46  ;;  %v745_v48 = vsub.f32 %v741_v39, %v744_v47 }
 0x3e0   : > { %v746_v49 = vmul.f32 1.442695, %v745_v48 }
 0x3e1   : > { %v420_v50 = vpop.permute.xlu1 %419 }
 0x3e2   : > { %1020 = vpow2.f32 %v746_v49  ;;  %964 = vmatpush3.msra.mxu0 %v420_v50 }
 0x3e3   : > { %973 = vmatprep.subr.mxu0 %v1036_v0 }
 0x3e7   : > { %v1017_v51 = vpop.eup %1016 }
 0x3e8   : > { %v414_v52 = vsel %vm158_vm1, %v1017_v51, 0.0 }
 0x3e9   : > { %415 = vadd.xlane.f32.xlu1 %v414_v52 }
 0x3eb   : > { %v1019_v53 = vpop.eup %1018 }
 0x3ec   : > { %v581_v54 = vsel %vm158_vm1, %v1019_v53, 0.0 }
 0x3ed   : > { %582 = vadd.xlane.f32.xlu1 %v581_v54 }
 0x3ef   : > { %v1021_v55 = vpop.eup %1020 }
 0x3f0   : > { %v748_v56 = vsel %vm158_vm1, %v1021_v55, 0.0 }
 0x3f1   : > { %749 = vadd.xlane.f32.xlu0 %v748_v56 }
 0x3fe   : > { %753 = vrot.lane.b32.xlu1 %v1089_v1, %s1047_s27 }
 0x407   : > { %586 = vrot.lane.b32.xlu0 %v1089_v1, %s1048_s28 }
 0x472   : > { %v416_v57 = vpop.xlane.xlu1 %415 }
 0x473   : > { %1022 = vrcp.f32 %v416_v57 }
 0x476   : > { %v583_v58 = vpop.xlane.xlu1 %582 }
 0x477   : > { %1024 = vrcp.f32 %v583_v58 }
 0x47a   : > { %v750_v59 = vpop.xlane.xlu0 %749  ;;  %v754_v2 = vpop.permute.xlu1 %753 }
 0x47b   : > { %1026 = vrcp.f32 %v750_v59 }
 0x47e   : > { %v587_v61 = vpop.permute.xlu0 %586 }
 0x480   : > { %v1023_v60 = vpop.eup %1022 }
 0x481   : > { %v418_v62 = vmul.f32 %v1023_v60, %v1017_v51 }
 0x483   : > { %966 = vmatmul.mubr.msk.f32.vlgmr.msra.gmra.mxu0 %vm158_vm1, %v418_v62 }
 0x484   : > { %v1025_v63 = vpop.eup %1024  ;;  %974 = vmatpush3.msra.mxu0 %v587_v61  ;;  %975 = vmatprep.mubr.msk.f32.mxu0 %vm1037_vm0, %v1036_v0 }
 0x485   : > { %983 = vmatprep.subr.mxu0 %v1036_v0  ;;  %v585_v1 = vmul.f32 %v1025_v63, %v1019_v53 }
 0x487   : > { %976 = vmatmul.mubr.msk.f32.vlgmr.msra.gmra.mxu0 %vm158_vm1, %v585_v1 }
 0x488   : > { %v1027_v3 = vpop.eup %1026  ;;  %984 = vmatpush3.msra.mxu0 %v754_v2  ;;  %985 = vmatprep.mubr.msk.f32.mxu0 %vm1037_vm0, %v1036_v0 }
 0x489   : > { %v752_v4 = vmul.f32 %v1027_v3, %v1021_v55 }
 0x48b   : > { %986 = vmatmul.mubr.msk.f32.vlgmr.msra.gmra.mxu0 %vm158_vm1, %v752_v4 }
 0x543   : > { %v491_v5 = vpop.f32.mrf.mxu0 }
 0x544   : > { %830 = vrot.lane.b32.xlu1 %v491_v5, %s1049_s29 }
 0x545   : > { %v967_v6 = vpop.f32.mrf.mxu0 }
 0x547   : > { %v658_v7 = vpop.f32.mrf.mxu0 }
 0x548   : > { %834 = vrot.lane.b32.xlu0 %v658_v7, %s1050_s30 }
 0x549   : > { %v977_v8 = vpop.f32.mrf.mxu0 }
 0x54b   : > { %v825_v9 = vpop.f32.mrf.mxu0 }
 0x54c   : > { %838 = vrot.lane.b32.xlu1 %v825_v9, %s1051_s3 }
 0x54d   : > { %v987_v10 = vpop.f32.mrf.mxu0 }
 0x5b6   : > { %v831_v11 = vpop.permute.xlu1 %830 }
 0x5b7   : > { %v841_v0 = vsel %vm158_vm1, %v1127_v24, %v831_v11 }
 0x5ba   : > { %v835_v12 = vpop.permute.xlu0 %834 }
 0x5bb   : > { %v843_v13 = vsel %vm842_vm2, %v841_v0, %v835_v12 }
 0x5be   : > { %v839_v14 = vpop.permute.xlu1 %838 }
 0x5bf   : > { %v845_v15 = vsel %vm844_vm3, %v843_v13, %v839_v14 }
 0x5c0   : > { %847 = vst.msk [vmem:[%s152_s6] sm:$0xff] %vm846_vm4, %v845_v15 }
 0x5c1 PF: > { %s12_s9 = sadd.s32 1, %s1034_s9  }
 0x5c2   : > { %p9_p4 = scmp.ge.s32.totalorder %s12_s9, 4  }
 0x5c4   :  { %11 = sbr.rel (!%p9_p4) target bundleno = 1 (0x1), region = 61 }

// kernel: model_forward.18
= control target key start
LH: loop header
LB: loop body
LE: loop exit
PB: predicated region body
PF: predicated region fallthrough
CT: control target
= control target key end

     0   :  { %s671_s21 = smov 0   ;;  %s673_s22 = smov 0   ;;  %s750_s0 = inlined_call_operand.vmem [shape: f32[16,64], index: 0, kind: input, shape index: {}]   ;;  %s751_s1 = inlined_call_operand.vmem [shape: f32[64,32], index: 1, kind: input, shape index: {}]   ;;  %s752_s2 = inlined_call_operand.vmem [shape: f32[1,32], index: 2, kind: input, shape index: {}]   ;;  %s753_s3 = inlined_call_operand.vmem [shape: f32[16,32], index: 3, kind: input, shape index: {}]   ;;  %s754_s4 = inlined_call_operand.vmem [shape: f32[1,32], index: 4, kind: input, shape index: {}]   ;;  %s755_s5 = inlined_call_operand.vmem [shape: f32[1,32], index: 5, kind: input, shape index: {}]   ;;  %s756_s6 = inlined_call_operand.vmem [shape: f32[16,32], index: 6, kind: output, shape index: {}]  }
   0x1   :  { %s675_s23 = smov 0  }
   0x2 LB: > { %s28_s24 = sadd.s32 1, %s628_s22  ;;  %p544_p0 = scmp.ge.s32.totalorder %s632_s23, 1  ;;  %s632_s23 = sphi %s675_s23, %s16_s23   ;;  %s628_s22 = sphi %s673_s22, %s758_s22   ;;  %s624_s21 = sphi %s671_s21, %s757_s21  }
   0x3   : > { %p30_p1 = scmp.ge.s32.totalorder %s28_s24, 2  ;;  %p248_p2 = scmp.lt.s32.totalorder %s632_s23, 3 }
   0x5   : > { %s760_s24 = smov (%p30_p1, %s28_s24), 0  ;;  %p249_p3 = pnand %p544_p0, %p248_p2 }
   0x6   : > { %p288_p4 = scmp.lt.s32.totalorder (!%p249_p3), %s624_s21, 1 }
   0x7   : > { %252 = sbr.rel (%p249_p3) target bundleno = 545 (0x221), region = 44 }
   0xc   : > { %v324_v0 = vld [vmem:[%s751_s1 + $0x38] sm:$0xff]  ;;  %v634_v1 = vmov 0.0   ;;  %v323_v2 = vld [vmem:[%s751_s1 + $0x30] sm:$0xff]  ;;  %vm635_vm0 = vmmov 0   ;;  %vm313_vm1 = vcmask 261120   ;;  %v322_v3 = vld [vmem:[%s751_s1 + $0x28] sm:$0xff] }
   0xd   : > { %563 = vmatprep.subr.mxu0 %v634_v1  ;;  %579 = vmatprep.mubr.msk.f32.mxu0 %vm635_vm0, %v634_v1  ;;  %314 = vst.msk [vmem:[#allocation2] sm:$0xff] %vm313_vm1, %v634_v1  ;;  %s762_s21 = smov (!%p288_p4, %s624_s21), 1  ;;  %v321_v4 = vld [vmem:[%s751_s1 + $0x20] sm:$0xff]  ;;  %v320_v5 = vld [vmem:[%s751_s1 + $0x18] sm:$0xff]  ;;  %v319_v6 = vld [vmem:[%s751_s1 + $0x10] sm:$0xff]  ;;  %vm325_vm2 = vcmask 523264  }
   0xe   : > { %564 = vmatpush3.msra.mxu0 %v324_v0  ;;  %s705_s11 = sshll.u32 %s762_s21, 3  ;;  %v318_v7 = vld [vmem:[%s751_s1 + $0x8] sm:$0xff]  ;;  %v317_v8 = vld [vmem:[%s751_s1] sm:$0xff] }
   0xf   : > { %565 = vmatprep.subr.mxu0 %v634_v1  ;;  %s294_s18 = scalar_lea.vmem %s750_s0, %s705_s11  ;;  %s304_s26 = scalar_lea.vmem %s753_s3, %s705_s11  ;;  %v549_v14 = vld [vmem:[%s752_s2] ss:$0 sm:$0xff] }
  0x10   : > { %566 = vmatpush3.msra.mxu0 %v323_v2  ;;  %v316_v9 = vld [vmem:[%s294_s18] sm:$0xff]  ;;  %s308_s12 = scalar_lea.vmem %s756_s6, %s705_s11 }
  0x11   : > { %567 = vmatprep.subr.mxu0 %v634_v1  ;;  %v414_v16 = vld [vmem:[%s304_s26] sm:$0xff] }
  0x12   : > { %568 = vmatpush3.msra.mxu0 %v322_v3  ;;  %v550_v29 = vld [vmem:[%s754_s4] ss:$0 sm:$0xff] }
  0x13   : > { %569 = vmatprep.subr.mxu0 %v634_v1  ;;  %v551_v31 = vld [vmem:[%s755_s5] ss:$0 sm:$0xff] }
  0x14   : > { %570 = vmatpush3.msra.mxu0 %v321_v4  ;;  %v315_v10 = vld [vmem:[#allocation2] sm:$0xff] }
  0x15   : > { %571 = vmatprep.subr.mxu0 %v634_v1 }
  0x16   : > { %572 = vmatpush3.msra.mxu0 %v320_v5 }
  0x17   : > { %573 = vmatprep.subr.mxu0 %v634_v1 }
  0x18   : > { %574 = vmatpush3.msra.mxu0 %v319_v6 }
  0x19   : > { %575 = vmatprep.subr.mxu0 %v634_v1 }
  0x1a   : > { %576 = vmatpush3.msra.mxu0 %v318_v7 }
  0x1b   : > { %577 = vmatprep.subr.mxu0 %v634_v1 }
  0x1c   : > { %578 = vmatpush3.msra.mxu0 %v317_v8 }
  0x1d   : > { %580 = vmatmul.mubr.msk.f32.vlgmr.msra.gmra.mxu0 %vm325_vm2, %v316_v9 }
  0xdd   : > { %v395_v11 = vpop.f32.mrf.mxu0 }
  0xde   : > { %v399_v12 = vadd.f32 %v395_v11, %v315_v10 }
  0xdf   : > { %v581_v13 = vpop.f32.mrf.mxu0 }
  0xe0   : > { %401 = vst.msk [vmem:[#allocation2] sm:$0xff] %vm313_vm1, %v399_v12 }
  0xe7   : > { %v405_v15 = vld [vmem:[#allocation2] sm:$0xff] }
  0xe8   : > { %v413_v17 = vadd.f32 %v549_v14, %v405_v15 }
  0xea   : > { %v415_v18 = vadd.f32 %v414_v16, %v413_v17 }
  0xec   : > { %v416_v19 = vsel %vm313_vm1, %v415_v18, 0.0 }
  0xed   : > { %417 = vadd.xlane.f32.xlu0 %v416_v19 }
 0x176   : > { %v418_v20 = vpop.xlane.xlu0 %417 }
 0x177   : > { %v420_v21 = vmul.f32 0.03125, %v418_v20 }
 0x179   : > { %v421_v22 = vsub.f32 %v415_v18, %v420_v21 }
 0x17b   : > { %v422_v23 = vmul.f32 %v421_v22, %v421_v22 }
 0x17d   : > { %v423_v24 = vsel %vm313_vm1, %v422_v23, 0.0 }
 0x17e   : > { %424 = vadd.xlane.f32.xlu0 %v423_v24 }
 0x207   : > { %v425_v25 = vpop.xlane.xlu0 %424 }
 0x208   : > { %v426_v26 = vmul.f32 0.03125, %v425_v25 }
 0x20a   : > { %v427_v27 = vadd.f32 1e-05, %v426_v26 }
 0x20c   : > { %608 = vrsqrt.f32 %v427_v27 }
 0x219   : > { %v609_v28 = vpop.eup %608 }
 0x21a   : > { %v429_v30 = vmul.f32 %v609_v28, %v421_v22 }
 0x21c   : > { %v437_v32 = vmul.f32 %v550_v29, %v429_v30 }
 0x21e   : > { %v445_v33 = vadd.f32 %v551_v31, %v437_v32 }
 0x220   : > { %446 = vst.msk [vmem:[%s308_s12] sm:$0xff] %vm313_vm1, %v445_v33 }
 0x221 PF: > { %s16_s23 = sadd.s32 1, %s632_s23   ;;  %s757_s21 = smov %s628_s22 }
 0x222   : > { %p13_p5 = scmp.ge.s32.totalorder %s16_s23, 4   ;;  %s758_s22 = smov %s760_s24 }
 0x224   :  { %15 = sbr.rel (!%p13_p5) target bundleno = 2 (0x2), region = 88 }

// kernel: model_forward.24
= control target key start
LH: loop header
LB: loop body
LE: loop exit
PB: predicated region body
PF: predicated region fallthrough
CT: control target
= control target key end

     0   :  { %s491_s12 = smov 0   ;;  %s493_s13 = smov 0   ;;  %s539_s0 = inlined_call_operand.vmem [shape: f32[16,32], index: 0, kind: input, shape index: {}]   ;;  %s540_s1 = inlined_call_operand.vmem [shape: f32[32,128], index: 1, kind: input, shape index: {}]   ;;  %s541_s2 = inlined_call_operand.vmem [shape: f32[1,128], index: 2, kind: input, shape index: {}]   ;;  %s542_s3 = inlined_call_operand.vmem [shape: f32[16,128], index: 3, kind: output, shape index: {}]  }
   0x1   :  { %s495_s14 = smov 0  }
   0x2 LB: > { %s25_s15 = sadd.s32 1, %s463_s13  ;;  %p396_p0 = scmp.ge.s32.totalorder %s467_s14, 1  ;;  %s467_s14 = sphi %s495_s14, %s13_s14   ;;  %s463_s13 = sphi %s493_s13, %s544_s13   ;;  %s459_s12 = sphi %s491_s12, %s543_s12  }
   0x3   : > { %p27_p1 = scmp.ge.s32.totalorder %s25_s15, 2  ;;  %p164_p2 = scmp.lt.s32.totalorder %s467_s14, 3 }
   0x5   : > { %s546_s15 = smov (%p27_p1, %s25_s15), 0  ;;  %p165_p3 = pnand %p396_p0, %p164_p2 }
   0x6   : > { %p194_p4 = scmp.lt.s32.totalorder (!%p165_p3), %s459_s12, 1 }
   0x7   : > { %168 = sbr.rel (%p165_p3) target bundleno = 217 (0xd9), region = 32 }
   0xc   : > { %v221_v0 = vld [vmem:[%s540_s1 + $0x18] sm:$0xff]  ;;  %v469_v1 = vmov 0.0   ;;  %v220_v2 = vld [vmem:[%s540_s1 + $0x10] sm:$0xff]  ;;  %vm470_vm0 = vmmov 0   ;;  %s548_s12 = smov (!%p194_p4, %s459_s12), 1  ;;  %v219_v3 = vld [vmem:[%s540_s1 + $0x8] sm:$0xff] }
   0xd   : > { %408 = vmatprep.subr.mxu0 %v469_v1  ;;  %416 = vmatprep.mubr.msk.f32.mxu0 %vm470_vm0, %v469_v1  ;;  %s397_s22 = sshll.u32 %s548_s12, 3  ;;  %v218_v4 = vld [vmem:[%s540_s1] sm:$0xff]  ;;  %vm222_vm1 = vcmask 261120  }
   0xe   : > { %409 = vmatpush3.msra.mxu0 %v221_v0  ;;  %s200_s27 = scalar_lea.vmem %s539_s0, %s397_s22  ;;  %v400_v6 = vld [vmem:[%s541_s2] ss:$0 sm:$0xff]  ;;  %s210_s5 = scalar_lea.vmem %s542_s3, %s397_s22 }
   0xf   : > { %410 = vmatprep.subr.mxu0 %v469_v1  ;;  %v217_v5 = vld [vmem:[%s200_s27] sm:$0xff] }
  0x10   : > { %411 = vmatpush3.msra.mxu0 %v220_v2 }
  0x11   : > { %412 = vmatprep.subr.mxu0 %v469_v1 }
  0x12   : > { %413 = vmatpush3.msra.mxu0 %v219_v3 }
  0x13   : > { %414 = vmatprep.subr.mxu0 %v469_v1 }
  0x14   : > { %415 = vmatpush3.msra.mxu0 %v218_v4 }
  0x15   : > { %417 = vmatmul.mubr.msk.f32.vlgmr.msra.gmra.mxu0 %vm222_vm1, %v217_v5 }
  0xd5   : > { %v292_v7 = vpop.f32.mrf.mxu0 }
  0xd6   : > { %v309_v8 = vadd.f32 %v400_v6, %v292_v7 }
  0xd7   : > { %v418_v9 = vpop.f32.mrf.mxu0 }
  0xd8   : > { %310 = vst [vmem:[%s210_s5] sm:$0xff] %v309_v8 }
  0xd9 PF: > { %s13_s14 = sadd.s32 1, %s467_s14   ;;  %s543_s12 = smov %s463_s13 }
  0xda   : > { %p10_p5 = scmp.ge.s32.totalorder %s13_s14, 4   ;;  %s544_s13 = smov %s546_s15 }
  0xdc   :  { %12 = sbr.rel (!%p10_p5) target bundleno = 2 (0x2), region = 73 }

// kernel: model_forward.25
= control target key start
LH: loop header
LB: loop body
LE: loop exit
PB: predicated region body
PF: predicated region fallthrough
CT: control target
= control target key end

     0   :  { %v2242_v1 = vlaneseq  ;;  %v1411_v2 = vmov 0   ;;  %s2236_s0 = inlined_call_operand.vmem [shape: f32[8,2,128], index: 0, kind: input, shape index: {}]   ;;  %s2237_s1 = inlined_call_operand.vmem [shape: s32[8,2,1], index: 1, kind: input, shape index: {}]   ;;  %s2238_s2 = inlined_call_operand.vmem [shape: f32[8,2,1], index: 2, kind: input, shape index: {}]   ;;  %s2239_s3 = inlined_call_operand.vmem [shape: f32[128,128], index: 3, kind: input, shape index: {}]   ;;  %s2240_s4 = inlined_call_operand.hbm [shape: f32[1,1], index: 4, kind: output, shape index: {0}]   ;;  %s2241_s5 = inlined_call_operand.vmem [shape: s32[8,2,1], index: 5, kind: output, shape index: {1}]  }
   0x1   :  { %v39_v0 = vld [vmem:[%s2237_s1] sm:$0x3]  ;;  %1240 = vset.pattern.permute.xlu0 %v1411_v2 }
   0x2   :  { %11 = vsyncpa [#allocation4], 0  ;;  %41 = vperm.xlu0 %1240, %v39_v0   ;;  %v1454_v3 = vand.u32 127, %v2242_v1  ;;  %v46_v5 = vld [vmem:[%s2236_s0] sm:$0x3]  ;;  %v1412_v6 = vmov 0.0  }
   0x3   :  { %vm2289_vm2 = vcmask 1041408   ;;  %v1465_v10 = vld [vmem:[%s2239_s3] sm:$0xff]  ;;  %v1470_v11 = vld [vmem:[%s2239_s3 + $0x8] sm:$0xff]  ;;  %v1475_v12 = vld [vmem:[%s2239_s3 + $0x10] sm:$0xff]  ;;  %s1546_s29 = smov 1  }
   0x4   :  { %2290 = vst [vmem:[#allocation6_spill] sm:$0xff] %v1454_v3  ;;  %vm38_vm0 = vcmp.lt.s32.totalorder %v1454_v3, 5  ;;  %2291 = vst [vmem:[#allocation7_spill] sm:$0xff] %v1465_v10  ;;  %v1480_v13 = vld [vmem:[%s2239_s3 + $0x18] sm:$0xff]  ;;  %v1485_v14 = vld [vmem:[%s2239_s3 + $0x20] sm:$0xff] }
   0x5   :  { %2292 = vst [vmem:[#allocation8_spill] sm:$0xff] %v1470_v11  ;;  %2293 = vst [vmem:[#allocation9_spill] sm:$0xff] %v1475_v12  ;;  %v1490_v15 = vld [vmem:[%s2239_s3 + $0x28] sm:$0xff]  ;;  %v1495_v16 = vld [vmem:[%s2239_s3 + $0x30] sm:$0xff] }
   0x6   :  { %2294 = vst [vmem:[#allocation10_spill] sm:$0xff] %v1480_v13  ;;  %2295 = vst [vmem:[#allocation11_spill] sm:$0xff] %v1485_v14  ;;  %v1500_v17 = vld [vmem:[%s2239_s3 + $0x38] sm:$0xff]  ;;  %v1505_v18 = vld [vmem:[%s2239_s3 + $0x40] sm:$0xff] }
   0x7   :  { %2296 = vst [vmem:[#allocation12_spill] sm:$0xff] %v1490_v15  ;;  %2297 = vst [vmem:[#allocation13_spill] sm:$0xff] %v1495_v16  ;;  %v1510_v19 = vld [vmem:[%s2239_s3 + $0x48] sm:$0xff]  ;;  %v1515_v20 = vld [vmem:[%s2239_s3 + $0x50] sm:$0xff] }
   0x8   :  { %2298 = vst [vmem:[#allocation14_spill] sm:$0xff] %v1500_v17  ;;  %2299 = vst [vmem:[#allocation15_spill] sm:$0xff] %v1505_v18  ;;  %v1520_v21 = vld [vmem:[%s2239_s3 + $0x58] sm:$0xff]  ;;  %v1525_v22 = vld [vmem:[%s2239_s3 + $0x60] sm:$0xff] }
   0x9   :  { %2300 = vst [vmem:[#allocation16_spill] sm:$0xff] %v1510_v19  ;;  %2301 = vst [vmem:[#allocation17_spill] sm:$0xff] %v1515_v20  ;;  %v1530_v23 = vld [vmem:[%s2239_s3 + $0x68] sm:$0xff]  ;;  %v1535_v24 = vld [vmem:[%s2239_s3 + $0x70] sm:$0xff] }
   0xa   :  { %2302 = vst [vmem:[#allocation18_spill] sm:$0xff] %v1520_v21  ;;  %2303 = vst [vmem:[#allocation19_spill] sm:$0xff] %v1525_v22  ;;  %v1540_v25 = vld [vmem:[%s2239_s3 + $0x78] sm:$0xff] }
   0xb   :  { %2304 = vst [vmem:[#allocation20_spill] sm:$0xff] %v1530_v23 }
  0x7d   :  { %v42_v4 = vpop.permute.xlu0 %41 }
  0x7e   :  { %vm43_vm1 = vcmp.eq.s32.totalorder %v1454_v3, %v42_v4 }
  0x7f   :  { %v1099_v7 = vsel %vm43_vm1, 1.0, %v1412_v6  }
  0x80   :  { %v47_v8 = vmul.f32 %v1099_v7, %v46_v5 }
  0x82   :  { %v49_v9 = vsel %vm2289_vm2, %v47_v8, 0.0 }
  0x83   :  { %50 = vadd.xlane.f32.xlu0 %v49_v9 }
 0x10c   :  { %v51_v26 = vpop.xlane.xlu0 %50  }
 0x10d LB: > { %v1413_v27 = vmov 0.0   ;;  %vm1414_vm3 = vmmov 0   ;;  %v1415_v28 = vmov 0   ;;  %s1557_s3 = sshll.u32 %s1385_s29, 1  ;;  %s57_s29 = sadd.s32 1, %s1385_s29   ;;  %s1385_s29 = sphi %s1546_s29, %s57_s29   ;;  %v1381_v26 = vphi %v51_v26, %v2306_v26   ;;  %v1377_v7 = vphi %v1099_v7, %v1101_v7  }
 0x10e   : > { %1124 = vmatprep.subr.mxu0 %v1413_v27  ;;  %1156 = vmatprep.mubr.msk.f32.mxu0 %vm1414_vm3, %v1413_v27  ;;  %s61_s7 = scalar_lea.vmem %s2237_s1, %s1557_s3  ;;  %s71_s10 = scalar_lea.vmem %s2236_s0, %s1557_s3 }
 0x10f   : > { %1125 = vmatpush3.msra.mxu0 %v1540_v25  ;;  %1241 = vset.pattern.permute.xlu0 %v1415_v28  ;;  %v62_v29 = vld [vmem:[%s61_s7] sm:$0x3]  ;;  %s69_s13 = scalar_lea.vmem %s2238_s2, %s1557_s3  ;;  %p54_p0 = scmp.ge.s32.totalorder %s57_s29, 8  }
 0x110   : > { %1126 = vmatprep.subr.mxu0 %v1413_v27  ;;  %64 = vperm.xlu0 %1241, %v62_v29   ;;  %v72_v31 = vld [vmem:[%s71_s10] sm:$0x3]  ;;  %vm154_vm5 = vcmp.eq.s32.totalorder (%p54_p0), %v1454_v3, 0  ;;  %v1416_v44 = vmov (%p54_p0), -10000.0   ;;  %s1603_s14 = smov (%p54_p0), 0  }
 0x111   : > { %1127 = vmatpush3.msra.mxu0 %v1535_v24  ;;  %v70_v39 = vld [vmem:[%s69_s13] sm:$0x3]  ;;  %v155_v45 = vsel (%p54_p0), %vm154_vm5, 0.0, %v1416_v44  }
 0x112   : > { %1128 = vmatprep.subr.mxu0 %v1413_v27 }
 0x113   : > { %1129 = vmatpush3.msra.mxu0 %v1530_v23 }
 0x114   : > { %1130 = vmatprep.subr.mxu0 %v1413_v27 }
 0x115   : > { %1131 = vmatpush3.msra.mxu0 %v1525_v22 }
 0x116   : > { %1132 = vmatprep.subr.mxu0 %v1413_v27 }
 0x117   : > { %1133 = vmatpush3.msra.mxu0 %v1520_v21 }
 0x118   : > { %1134 = vmatprep.subr.mxu0 %v1413_v27 }
 0x119   : > { %1135 = vmatpush3.msra.mxu0 %v1515_v20 }
 0x11a   : > { %1136 = vmatprep.subr.mxu0 %v1413_v27 }
 0x11b   : > { %1137 = vmatpush3.msra.mxu0 %v1510_v19 }
 0x11c   : > { %1138 = vmatprep.subr.mxu0 %v1413_v27 }
 0x11d   : > { %1139 = vmatpush3.msra.mxu0 %v1505_v18 }
 0x11e   : > { %1140 = vmatprep.subr.mxu0 %v1413_v27 }
 0x11f   : > { %1141 = vmatpush3.msra.mxu0 %v1500_v17 }
 0x120   : > { %1142 = vmatprep.subr.mxu0 %v1413_v27 }
 0x121   : > { %1143 = vmatpush3.msra.mxu0 %v1495_v16 }
 0x122   : > { %1144 = vmatprep.subr.mxu0 %v1413_v27 }
 0x123   : > { %1145 = vmatpush3.msra.mxu0 %v1490_v15 }
 0x124   : > { %1146 = vmatprep.subr.mxu0 %v1413_v27 }
 0x125   : > { %1147 = vmatpush3.msra.mxu0 %v1485_v14 }
 0x126   : > { %1148 = vmatprep.subr.mxu0 %v1413_v27 }
 0x127   : > { %1149 = vmatpush3.msra.mxu0 %v1480_v13 }
 0x128   : > { %1150 = vmatprep.subr.mxu0 %v1413_v27 }
 0x129   : > { %1151 = vmatpush3.msra.mxu0 %v1475_v12 }
 0x12a   : > { %1152 = vmatprep.subr.mxu0 %v1413_v27 }
 0x12b   : > { %1153 = vmatpush3.msra.mxu0 %v1470_v11 }
 0x12c   : > { %1154 = vmatprep.subr.mxu0 %v1413_v27 }
 0x12d   : > { %1155 = vmatpush3.msra.mxu0 %v1465_v10 }
 0x12e   : > { %1157 = vmatmul.mubr.f32.vlgmr.msra.gmra.mxu0 %v1377_v7 }
 0x18b   : > { %v65_v30 = vpop.permute.xlu0 %64 }
 0x18c   : > { %vm66_vm4 = vcmp.eq.s32.totalorder %v1454_v3, %v65_v30 }
 0x18d   : > { %v1101_v7 = vsel %vm66_vm4, 1.0, %v1413_v27  }
 0x18e   : > { %v73_v32 = vmul.f32 %v1101_v7, %v72_v31 }
 0x190   : > { %v74_v33 = vsel %vm2289_vm2, %v73_v32, 0.0 }
 0x191   : > { %75 = vadd.xlane.f32.xlu0 %v74_v33 }
 0x1ee   : > { %v143_v34 = vpop.f32.mrf.mxu0 }
 0x1ef   : > { %v147_v35 = vmul.f32 %v1101_v7, %v143_v34 }
 0x1f0   : > { %v1158_v36 = vpop.f32.mrf.mxu0 }
 0x1f1   : > { %v148_v37 = vsel %vm2289_vm2, %v147_v35, 0.0 }
 0x1f2   : > { %149 = vadd.xlane.f32.xlu1 %v148_v37 }
 0x21a   : > { %v76_v38 = vpop.xlane.xlu0 %75 }
 0x27b   : > { %v150_v40 = vpop.xlane.xlu1 %149 }
 0x27c   : > { %v151_v41 = vadd.f32 %v150_v40, %v76_v38 }
 0x27e   : > { %v152_v42 = vmul.f32 %v151_v41, %v70_v39 }
 0x27f   :  { %56 = sbr.rel (!%p54_p0) target bundleno = 269 (0x10d), region = 83 }
 0x280   : > { %v1590_v26 = vadd.f32 %v1381_v26, %v152_v42  }
 0x282   : > { %v2305_v43 = vmov %v1590_v26 }
 0x283   : > { %v2306_v26 = vmov %v2305_v43 }
 0x284 LB: > { %v2307_v19 = vld [vmem:[#allocation16_spill] sm:$0xff]  ;;  %v2308_v18 = vld [vmem:[#allocation15_spill] sm:$0xff]  ;;  %v2309_v21 = vld [vmem:[#allocation18_spill] sm:$0xff]  ;;  %v2313_v1 = vlaneseq  ;;  %v1417_v51 = vmov 0   ;;  %s1102_s1 = sshll.u32 %s1393_s14, 1  ;;  %vm534_vm6 = vcmask 1041409   ;;  %s1393_s14 = sphi %s1603_s14, %s161_s14   ;;  %v1389_v45 = vphi %v155_v45, %v2314_v45  }
 0x285   : > { %v2310_v20 = vld [vmem:[#allocation17_spill] sm:$0xff]  ;;  %v2311_v23 = vld [vmem:[#allocation20_spill] sm:$0xff]  ;;  %v2312_v22 = vld [vmem:[#allocation19_spill] sm:$0xff]  ;;  %1243 = vset.pattern.permute.xlu1 %v1417_v51  ;;  %1242 = vset.pattern.permute.xlu0 %v1417_v51  ;;  %s166_s17 = scalar_lea.vmem %s2238_s2, %s1102_s1  ;;  %s164_s20 = scalar_lea.vmem %s2236_s0, %s1102_s1 }
 0x286   : > { %v1612_v46 = vshrl.u32 %v2313_v1, 7  ;;  %v167_v52 = vld [vmem:[%s166_s17] sm:$0x3]  ;;  %s161_s14 = sadd.s32 1, %s1393_s14  }
 0x287   : > { %v538_v53 = vsub.f32 1.0, %v167_v52  ;;  %p158_p1 = scmp.ge.s32.totalorder %s161_s14, 8  }
 0x288   : > { %v2243_v47 = vsub.s32 1, %v1612_v46  ;;  %v2244_v49 = vsub.s32 0, %v1612_v46  ;;  %vm2288_vm7 = vcmask (%p158_p1), 1024   ;;  %vm569_vm8 = vcmask (%p158_p1), 0   ;;  %s1896_s23 = smov (%p158_p1), 1  }
 0x28a   : > { %v238_v48 = vrot.slane %v1389_v45, %v2243_v47  ;;  %v171_v50 = vrot.slane %v1389_v45, %v2244_v49 }
 0x28c   : > { %248 = vbcast.lane.b32.xlu1 %v238_v48, 272  ;;  %240 = vbcast.lane.b32.xlu0 %v238_v48, 256 }
 0x290   : > { %252 = vbcast.lane.b32.xlu1 %v238_v48, 280  ;;  %244 = vbcast.lane.b32.xlu0 %v238_v48, 264 }
 0x294   : > { %177 = vbcast.lane.b32.xlu1 %v171_v50, 264  ;;  %173 = vbcast.lane.b32.xlu0 %v171_v50, 256 }
 0x298   : > { %185 = vbcast.lane.b32.xlu1 %v171_v50, 280  ;;  %181 = vbcast.lane.b32.xlu0 %v171_v50, 272 }
 0x29c   : > { %260 = vbcast.lane.b32.xlu1 %v238_v48, 296  ;;  %256 = vbcast.lane.b32.xlu0 %v238_v48, 288 }
 0x2a0   : > { %193 = vbcast.lane.b32.xlu1 %v171_v50, 296  ;;  %189 = vbcast.lane.b32.xlu0 %v171_v50, 288 }
 0x2a4   : > { %268 = vbcast.lane.b32.xlu1 %v238_v48, 312  ;;  %264 = vbcast.lane.b32.xlu0 %v238_v48, 304 }
 0x2a8   : > { %201 = vbcast.lane.b32.xlu1 %v171_v50, 312  ;;  %197 = vbcast.lane.b32.xlu0 %v171_v50, 304 }
 0x2ac   : > { %276 = vbcast.lane.b32.xlu1 %v238_v48, 328  ;;  %272 = vbcast.lane.b32.xlu0 %v238_v48, 320 }
 0x2b0   : > { %209 = vbcast.lane.b32.xlu1 %v171_v50, 328  ;;  %205 = vbcast.lane.b32.xlu0 %v171_v50, 320 }
 0x2b4   : > { %284 = vbcast.lane.b32.xlu1 %v238_v48, 344  ;;  %280 = vbcast.lane.b32.xlu0 %v238_v48, 336 }
 0x2b8   : > { %217 = vbcast.lane.b32.xlu1 %v171_v50, 344  ;;  %213 = vbcast.lane.b32.xlu0 %v171_v50, 336 }
 0x2bc   : > { %292 = vbcast.lane.b32.xlu1 %v238_v48, 360  ;;  %288 = vbcast.lane.b32.xlu0 %v238_v48, 352 }
 0x2c0   : > { %225 = vbcast.lane.b32.xlu1 %v171_v50, 360  ;;  %221 = vbcast.lane.b32.xlu0 %v171_v50, 352 }
 0x2c4   : > { %300 = vbcast.lane.b32.xlu1 %v238_v48, 376  ;;  %296 = vbcast.lane.b32.xlu0 %v238_v48, 368 }
 0x2c8   : > { %233 = vbcast.lane.b32.xlu1 %v171_v50, 376  ;;  %229 = vbcast.lane.b32.xlu0 %v171_v50, 368 }
 0x2cc   : > { %541 = vperm.xlu1 %1243, %v538_v53   ;;  %528 = vperm.xlu0 %1242, %v167_v52  }
 0x2fe   : > { %v249_v54 = vpop.permute.xlu1 %248  ;;  %v241_v55 = vpop.permute.xlu0 %240 }
 0x2ff   : > { %v1629_v30 = vadd.f32 %v249_v54, %v1475_v12  ;;  %v1632_v31 = vadd.f32 %v241_v55, %v1465_v10 }
 0x301   : > { %v355_v40 = vmax.f32 %v1632_v31, %v1629_v30 }
 0x302   : > { %v253_v56 = vpop.permute.xlu1 %252  ;;  %v245_v57 = vpop.permute.xlu0 %244 }
 0x303   : > { %v1635_v32 = vadd.f32 %v253_v56, %v1480_v13  ;;  %v1638_v33 = vadd.f32 %v245_v57, %v1470_v11 }
 0x305   : > { %v356_v41 = vmax.f32 %v1638_v33, %v1635_v32 }
 0x306   : > { %v178_v58 = vpop.permute.xlu1 %177  ;;  %v174_v59 = vpop.permute.xlu0 %173 }
 0x307   : > { %v1657_v42 = vadd.f32 %v178_v58, %v1470_v11  ;;  %v1663_v48 = vadd.f32 %v174_v59, %v1465_v10 }
 0x30a   : > { %v186_v60 = vpop.permute.xlu1 %185  ;;  %v182_v61 = vpop.permute.xlu0 %181 }
 0x30b   : > { %v1644_v37 = vadd.f32 %v186_v60, %v1480_v13  ;;  %v1647_v38 = vadd.f32 %v182_v61, %v1475_v12 }
 0x30d   : > { %v335_v57 = vmax.f32 %v1657_v42, %v1644_v37  ;;  %v334_v58 = vmax.f32 %v1663_v48, %v1647_v38 }
 0x30e   : > { %v261_v62 = vpop.permute.xlu1 %260  ;;  %v257_v63 = vpop.permute.xlu0 %256 }
 0x30f   : > { %v1641_v34 = vadd.f32 %v261_v62, %v1490_v15  ;;  %v1650_v39 = vadd.f32 %v257_v63, %v1485_v14 }
 0x311   : > { %v358_v53 = vmax.f32 %v356_v41, %v1641_v34  ;;  %v357_v59 = vmax.f32 %v355_v40, %v1650_v39 }
 0x312   : > { %v194_v0 = vpop.permute.xlu1 %193  ;;  %v190_v2 = vpop.permute.xlu0 %189 }
 0x313   : > { %v1666_v50 = vadd.f32 %v194_v0, %v1490_v15  ;;  %v1669_v51 = vadd.f32 %v190_v2, %v1485_v14 }
 0x315   : > { %v337_v2 = vmax.f32 %v335_v57, %v1666_v50 }
 0x316   : > { %v269_v4 = vpop.permute.xlu1 %268  ;;  %v265_v5 = vpop.permute.xlu0 %264 }
 0x317   : > { %v1660_v44 = vadd.f32 %v269_v4, %v1500_v17  ;;  %v1672_v52 = vadd.f32 %v265_v5, %v1495_v16  ;;  %v336_v4 = vmax.f32 %v334_v58, %v1669_v51 }
 0x319   : > { %v360_v61 = vmax.f32 %v358_v53, %v1660_v44  ;;  %v359_v5 = vmax.f32 %v357_v59, %v1672_v52 }
 0x31a   : > { %v202_v6 = vpop.permute.xlu1 %201  ;;  %v198_v7 = vpop.permute.xlu0 %197 }
 0x31b   : > { %v1688_v62 = vadd.f32 %v202_v6, %v1500_v17  ;;  %v1691_v63 = vadd.f32 %v198_v7, %v1495_v16 }
 0x31d   : > { %v338_v58 = vmax.f32 %v336_v4, %v1691_v63 }
 0x31e   : > { %v277_v8 = vpop.permute.xlu1 %276  ;;  %v273_v9 = vpop.permute.xlu0 %272 }
 0x31f   : > { %v1676_v54 = vadd.f32 %v277_v8, %v2307_v19  ;;  %v1684_v60 = vadd.f32 %v273_v9, %v2308_v18 }
 0x321   : > { %v362_v9 = vmax.f32 %v360_v61, %v1676_v54  ;;  %v361_v53 = vmax.f32 %v359_v5, %v1684_v60 }
 0x322   : > { %v210_v26 = vpop.permute.xlu1 %209  ;;  %v206_v27 = vpop.permute.xlu0 %205 }
 0x323   : > { %v1704_v6 = vadd.f32 %v210_v26, %v2307_v19  ;;  %v1707_v7 = vadd.f32 %v206_v27, %v2308_v18 }
 0x325   : > { %v340_v5 = vmax.f32 %v338_v58, %v1707_v7 }
 0x326   : > { %v285_v28 = vpop.permute.xlu1 %284  ;;  %v281_v29 = vpop.permute.xlu0 %280 }
 0x327   : > { %v1694_v0 = vadd.f32 %v285_v28, %v2309_v21  ;;  %v1700_v8 = vadd.f32 %v281_v29, %v2310_v20  ;;  %v339_v29 = vmax.f32 %v337_v2, %v1688_v62 }
 0x329   : > { %v364_v26 = vmax.f32 %v362_v9, %v1694_v0  ;;  %v363_v27 = vmax.f32 %v361_v53, %v1700_v8  ;;  %v341_v61 = vmax.f32 %v339_v29, %v1704_v6 }
 0x32a   : > { %v218_v35 = vpop.permute.xlu1 %217  ;;  %v214_v36 = vpop.permute.xlu0 %213 }
 0x32b   : > { %v1720_v59 = vadd.f32 %v218_v35, %v2309_v21 }
 0x32d   : > { %v343_v29 = vmax.f32 %v341_v61, %v1720_v59 }
 0x32e   : > { %v293_v55 = vpop.permute.xlu1 %292  ;;  %v289_v56 = vpop.permute.xlu0 %288 }
 0x32f   : > { %v1710_v28 = vadd.f32 %v293_v55, %v2311_v23  ;;  %v1714_v57 = vadd.f32 %v289_v56, %v2312_v22  ;;  %v1724_v55 = vadd.f32 %v214_v36, %v2310_v20 }
 0x331   : > { %v366_v56 = vmax.f32 %v364_v26, %v1710_v28  ;;  %v365_v9 = vmax.f32 %v363_v27, %v1714_v57  ;;  %v342_v58 = vmax.f32 %v340_v5, %v1724_v55 }
 0x332   : > { %v226_v40 = vpop.permute.xlu1 %225  ;;  %v222_v41 = vpop.permute.xlu0 %221 }
 0x333   : > { %v1730_v2 = vadd.f32 %v226_v40, %v2311_v23  ;;  %v1734_v35 = vadd.f32 %v222_v41, %v2312_v22 }
 0x335   : > { %v345_v47 = vmax.f32 %v343_v29, %v1730_v2  ;;  %v344_v41 = vmax.f32 %v342_v58, %v1734_v35 }
 0x336   : > { %v301_v4 = vpop.permute.xlu1 %300  ;;  %v297_v1 = vpop.permute.xlu0 %296 }
 0x337   : > { %v1737_v53 = vadd.f32 %v301_v4, %v1540_v25  ;;  %v1740_v36 = vadd.f32 %v297_v1, %v1535_v24 }
 0x339   : > { %v368_v40 = vmax.f32 %v366_v56, %v1737_v53  ;;  %v367_v26 = vmax.f32 %v365_v9, %v1740_v36 }
 0x33a   : > { %v234_v27 = vpop.permute.xlu1 %233  ;;  %v230_v49 = vpop.permute.xlu0 %229 }
 0x33b   : > { %v369_v22 = vmax.f32 %v367_v26, %v368_v40  ;;  %v1749_v4 = vadd.f32 %v234_v27, %v1540_v25  ;;  %v1752_v1 = vadd.f32 %v230_v49, %v1535_v24 }
 0x33d   : > { %v370_v61 = vrot.slane %v369_v22, 4  ;;  %v347_v5 = vmax.f32 %v345_v47, %v1749_v4  ;;  %v346_v56 = vmax.f32 %v344_v41, %v1752_v1 }
 0x33f   : > { %v371_v23 = vmax.f32 %v369_v22, %v370_v61  ;;  %v348_v9 = vmax.f32 %v346_v56, %v347_v5 }
 0x341   : > { %v372_v20 = vrot.slane %v371_v23, 2  ;;  %v349_v29 = vrot.slane %v348_v9, 4 }
 0x343   : > { %v373_v21 = vmax.f32 %v371_v23, %v372_v20  ;;  %v350_v19 = vmax.f32 %v348_v9, %v349_v29 }
 0x345   : > { %v374_v18 = vrot.slane %v373_v21, 1  ;;  %v351_v26 = vrot.slane %v350_v19, 2 }
 0x347   : > { %v1756_v58 = vmax.f32 %v373_v21, %v374_v18  ;;  %v352_v21 = vmax.f32 %v350_v19, %v351_v26 }
 0x349   : > { %v392_v40 = vsub.f32 %v1632_v31, %v1756_v58  ;;  %v393_v49 = vsub.f32 %v1638_v33, %v1756_v58  ;;  %v394_v47 = vsub.f32 %v1629_v30, %v1756_v58  ;;  %v395_v22 = vsub.f32 %v1635_v32, %v1756_v58 }
 0x34a   : > { %v396_v20 = vsub.f32 %v1650_v39, %v1756_v58  ;;  %v397_v23 = vsub.f32 %v1641_v34, %v1756_v58  ;;  %v398_v30 = vsub.f32 %v1672_v52, %v1756_v58  ;;  %v353_v61 = vrot.slane %v352_v21, 1 }
 0x34b   : > { %v440_v27 = vmul.f32 1.442695, %v392_v40  ;;  %v442_v41 = vmul.f32 1.442695, %v393_v49  ;;  %v444_v18 = vmul.f32 1.442695, %v394_v47  ;;  %v399_v32 = vsub.f32 %v1660_v44, %v1756_v58 }
 0x34c   : > { %v446_v31 = vmul.f32 1.442695, %v395_v22  ;;  %v448_v33 = vmul.f32 1.442695, %v396_v20  ;;  %v450_v5 = vmul.f32 1.442695, %v397_v23  ;;  %v1774_v39 = vmax.f32 %v352_v21, %v353_v61 }
 0x34d   : > { %1244 = vpow2.f32 %v440_v27  ;;  %v400_v19 = vsub.f32 %v1684_v60, %v1756_v58  ;;  %v401_v34 = vsub.f32 %v1676_v54, %v1756_v58  ;;  %v452_v56 = vmul.f32 1.442695, %v398_v30 }
 0x34e   : > { %1246 = vpow2.f32 %v442_v41  ;;  %v376_v52 = vsub.f32 %v1663_v48, %v1774_v39  ;;  %v454_v9 = vmul.f32 1.442695, %v399_v32  ;;  %v377_v44 = vsub.f32 %v1657_v42, %v1774_v39 }
 0x34f   : > { %1248 = vpow2.f32 %v444_v18  ;;  %v402_v29 = vsub.f32 %v1700_v8, %v1756_v58  ;;  %v456_v40 = vmul.f32 1.442695, %v400_v19  ;;  %v458_v49 = vmul.f32 1.442695, %v401_v34 }
 0x350   : > { %1250 = vpow2.f32 %v446_v31  ;;  %v378_v60 = vsub.f32 %v1647_v38, %v1774_v39  ;;  %v403_v54 = vsub.f32 %v1694_v0, %v1756_v58  ;;  %v408_v47 = vmul.f32 1.442695, %v376_v52 }
 0x351   : > { %1252 = vpow2.f32 %v448_v33  ;;  %v379_v48 = vsub.f32 %v1644_v37, %v1774_v39  ;;  %v410_v22 = vmul.f32 1.442695, %v377_v44  ;;  %v404_v8 = vsub.f32 %v1714_v57, %v1756_v58 }
 0x352   : > { %1254 = vpow2.f32 %v450_v5  ;;  %v460_v27 = vmul.f32 1.442695, %v402_v29  ;;  %v380_v38 = vsub.f32 %v1669_v51, %v1774_v39  ;;  %v412_v20 = vmul.f32 1.442695, %v378_v60 }
 0x353   : > { %1256 = vpow2.f32 %v452_v56  ;;  %v405_v18 = vsub.f32 %v1710_v28, %v1756_v58  ;;  %v462_v21 = vmul.f32 1.442695, %v403_v54  ;;  %v381_v23 = vsub.f32 %v1666_v50, %v1774_v39 }
 0x354   : > { %1258 = vpow2.f32 %v454_v9  ;;  %v414_v57 = vmul.f32 1.442695, %v379_v48  ;;  %v406_v30 = vsub.f32 %v1740_v36, %v1756_v58  ;;  %v464_v33 = vmul.f32 1.442695, %v404_v8 }
 0x355   : > { %1260 = vpow2.f32 %v456_v40  ;;  %v382_v61 = vsub.f32 %v1691_v63, %v1774_v39  ;;  %v416_v28 = vmul.f32 1.442695, %v380_v38  ;;  %v407_v5 = vsub.f32 %v1737_v53, %v1756_v58 }
 0x356   : > { %1262 = vpow2.f32 %v458_v49  ;;  %v466_v50 = vmul.f32 1.442695, %v405_v18  ;;  %v383_v34 = vsub.f32 %v1688_v62, %v1774_v39  ;;  %v418_v36 = vmul.f32 1.442695, %v381_v23 }
 0x357   : > { %1264 = vpow2.f32 %v408_v47  ;;  %v468_v52 = vmul.f32 1.442695, %v406_v30  ;;  %v384_v63 = vsub.f32 %v1707_v7, %v1774_v39  ;;  %v420_v44 = vmul.f32 1.442695, %v382_v61 }
 0x358   : > { %1266 = vpow2.f32 %v410_v22  ;;  %v470_v53 = vmul.f32 1.442695, %v407_v5  ;;  %v385_v49 = vsub.f32 %v1704_v6, %v1774_v39  ;;  %v422_v62 = vmul.f32 1.442695, %v383_v34 }
 0x359   : > { %1268 = vpow2.f32 %v460_v27  ;;  %v424_v7 = vmul.f32 1.442695, %v384_v63  ;;  %v387_v8 = vsub.f32 %v1720_v59, %v1774_v39  ;;  %v390_v30 = vsub.f32 %v1752_v1, %v1774_v39 }
 0x35a   : > { %v1245_v26 = vpop.eup %1244  ;;  %1270 = vpow2.f32 %v412_v20  ;;  %v426_v6 = vmul.f32 1.442695, %v385_v49 }
 0x35b   : > { %v1247_v42 = vpop.eup %1246  ;;  %1272 = vpow2.f32 %v462_v21  ;;  %v389_v21 = vsub.f32 %v1730_v2, %v1774_v39 }
 0x35c   : > { %v493_v41 = vadd.f32 %v1247_v42, %v1245_v26  ;;  %v1249_v0 = vpop.eup %1248  ;;  %1274 = vpow2.f32 %v414_v57  ;;  %v386_v26 = vsub.f32 %v1724_v55, %v1774_v39  ;;  %v430_v57 = vmul.f32 1.442695, %v387_v8 }
 0x35d   : > { %v1251_v31 = vpop.eup %1250  ;;  %1276 = vpow2.f32 %v464_v33 }
 0x35e   : > { %v494_v37 = vadd.f32 %v1249_v0, %v493_v41  ;;  %v1253_v32 = vpop.eup %1252  ;;  %1278 = vpow2.f32 %v416_v28  ;;  %v388_v41 = vsub.f32 %v1734_v35, %v1774_v39  ;;  %v428_v0 = vmul.f32 1.442695, %v386_v26 }
 0x35f   : > { %v1255_v56 = vpop.eup %1254  ;;  %1280 = vpow2.f32 %v466_v50  ;;  %v434_v50 = vmul.f32 1.442695, %v389_v21 }
 0x360   : > { %v495_v51 = vadd.f32 %v1251_v31, %v494_v37  ;;  %v1257_v29 = vpop.eup %1256  ;;  %1282 = vpow2.f32 %v418_v36 }
 0x361   : > { %v1259_v60 = vpop.eup %1258  ;;  %1284 = vpow2.f32 %v468_v52  ;;  %v436_v52 = vmul.f32 1.442695, %v390_v30 }
 0x362   : > { %v496_v19 = vadd.f32 %v1253_v32, %v495_v51  ;;  %v1261_v54 = vpop.eup %1260  ;;  %1286 = vpow2.f32 %v420_v44  ;;  %v432_v51 = vmul.f32 1.442695, %v388_v41  ;;  %v391_v32 = vsub.f32 %v1749_v4, %v1774_v39 }
 0x363   : > { %v1263_v48 = vpop.eup %1262  ;;  %1288 = vpow2.f32 %v470_v53 }
 0x364   : > { %v497_v9 = vadd.f32 %v1255_v56, %v496_v19  ;;  %v1265_v22 = vpop.eup %1264  ;;  %1290 = vpow2.f32 %v422_v62 }
 0x365   : > { %v1267_v27 = vpop.eup %1266  ;;  %1292 = vpow2.f32 %v424_v7 }
 0x366   : > { %v498_v40 = vadd.f32 %v1257_v29, %v497_v9  ;;  %v1269_v38 = vpop.eup %1268  ;;  %v472_v55 = vadd.f32 %v1267_v27, %v1265_v22  ;;  %1294 = vpow2.f32 %v426_v6  ;;  %v438_v29 = vmul.f32 1.442695, %v391_v32  ;;  %v165_v32 = vld [vmem:[%s164_s20] sm:$0x3] }
 0x367   : > { %v1271_v18 = vpop.eup %1270  ;;  %1296 = vpow2.f32 %v428_v0 }
 0x368   : > { %v499_v47 = vadd.f32 %v1259_v60, %v498_v40  ;;  %v1273_v37 = vpop.eup %1272  ;;  %v473_v59 = vadd.f32 %v1271_v18, %v472_v55  ;;  %1298 = vpow2.f32 %v430_v57 }
 0x369   : > { %v1275_v31 = vpop.eup %1274  ;;  %1300 = vpow2.f32 %v432_v51 }
 0x36a   : > { %v500_v42 = vadd.f32 %v1261_v54, %v499_v47  ;;  %v1277_v33 = vpop.eup %1276  ;;  %v474_v61 = vadd.f32 %v1275_v31, %v473_v59  ;;  %1302 = vpow2.f32 %v434_v50 }
 0x36b   : > { %v1279_v28 = vpop.eup %1278  ;;  %1304 = vpow2.f32 %v436_v52 }
 0x36c   : > { %v501_v20 = vadd.f32 %v1263_v48, %v500_v42  ;;  %v1281_v5 = vpop.eup %1280  ;;  %v475_v19 = vadd.f32 %v1279_v28, %v474_v61  ;;  %1306 = vpow2.f32 %v438_v29 }
 0x36d   : > { %v1283_v34 = vpop.eup %1282 }
 0x36e   : > { %v502_v23 = vadd.f32 %v1269_v38, %v501_v20  ;;  %v1285_v36 = vpop.eup %1284  ;;  %v476_v1 = vadd.f32 %v1283_v34, %v475_v19 }
 0x36f   : > { %v1287_v9 = vpop.eup %1286 }
 0x370   : > { %v503_v35 = vadd.f32 %v1273_v37, %v502_v23  ;;  %v1289_v63 = vpop.eup %1288  ;;  %v477_v53 = vadd.f32 %v1287_v9, %v476_v1  ;;  %v529_v9 = vpop.permute.xlu0 %528 }
 0x371   : > { %v1291_v40 = vpop.eup %1290 }
 0x372   : > { %v504_v2 = vadd.f32 %v1277_v33, %v503_v35  ;;  %v478_v4 = vadd.f32 %v1291_v40, %v477_v53  ;;  %v1293_v62 = vpop.eup %1292 }
 0x373   : > { %v1295_v47 = vpop.eup %1294 }
 0x374   : > { %v505_v56 = vadd.f32 %v1281_v5, %v504_v2  ;;  %v479_v60 = vadd.f32 %v1293_v62, %v478_v4  ;;  %v1297_v48 = vpop.eup %1296  ;;  %v521_v2 = vrot.slane %v165_v32, 1 }
 0x375   : > { %v1299_v8 = vpop.eup %1298 }
 0x376   : > { %v506_v44 = vadd.f32 %v1285_v36, %v505_v56  ;;  %v480_v26 = vadd.f32 %v1295_v47, %v479_v60  ;;  %v1301_v41 = vpop.eup %1300  ;;  %v542_v36 = vpop.permute.xlu1 %541  ;;  %v1843_v60 = vadd.s32 (%p158_p1), 8, %v1612_v46  ;;  %v1849_v47 = vadd.s32 (%p158_p1), 24, %v1612_v46 }
 0x377   : > { %v1303_v20 = vpop.eup %1302 }
 0x378   : > { %v507_v49 = vadd.f32 %v1289_v63, %v506_v44  ;;  %v481_v22 = vadd.f32 %v1297_v48, %v480_v26  ;;  %v1305_v18 = vpop.eup %1304  ;;  %v544_v63 = vmul.f32 %v1389_v45, %v542_v36  ;;  %v1852_v26 = vadd.s32 (%p158_p1), 32, %v1612_v46 }
 0x379   : > { %v1307_v37 = vpop.eup %1306  ;;  %v1858_v48 = vadd.s32 (%p158_p1), 40, %v1612_v46 }
 0x37a   : > { %v508_v54 = vrot.slane %v507_v49, 4  ;;  %v482_v6 = vadd.f32 %v1299_v8, %v481_v22  ;;  %v1861_v22 = vadd.s32 (%p158_p1), 48, %v1612_v46  ;;  %v1867_v8 = vadd.s32 (%p158_p1), 64, %v1612_v46 }
 0x37c   : > { %v509_v7 = vadd.f32 %v508_v54, %v507_v49  ;;  %v483_v38 = vadd.f32 %v1301_v41, %v482_v6  ;;  %v1846_v54 = vadd.s32 (%p158_p1), 16, %v1612_v46  ;;  %v1870_v6 = vadd.s32 (%p158_p1), 72, %v1612_v46 }
 0x37d   :  { %v1876_v41 = vadd.s32 (%p158_p1), 88, %v1612_v46 }
 0x37e   : > { %v510_v42 = vrot.slane %v509_v7, 2  ;;  %v484_v0 = vadd.f32 %v1303_v20, %v483_v38  ;;  %v1879_v38 = vadd.s32 (%p158_p1), 96, %v1612_v46  ;;  %v1882_v20 = vadd.s32 (%p158_p1), 104, %v1612_v46 }
 0x380   : > { %v511_v27 = vadd.f32 %v510_v42, %v509_v7  ;;  %v485_v21 = vadd.f32 %v1305_v18, %v484_v0  ;;  %v588_v7 = vld [vmem:[%s2236_s0] sm:$0x3] (%p158_p1)  ;;  %v1864_v42 = vadd.s32 (%p158_p1), 56, %v1612_v46  ;;  %v1885_v0 = vadd.s32 (%p158_p1), 112, %v1612_v46 }
 0x381   :  { %v589_v18 = vsel (%p158_p1), %vm38_vm0, %v588_v7, -1e+09  }
 0x382   : > { %v512_v55 = vrot.slane %v511_v27, 1  ;;  %v486_v23 = vadd.f32 %v1307_v37, %v485_v21 }
 0x384   : > { %v513_v57 = vadd.f32 %v512_v55, %v511_v27  ;;  %v487_v59 = vrot.slane %v486_v23, 4  ;;  %v1873_v27 = vadd.s32 (%p158_p1), 80, %v1612_v46  ;;  %v1888_v55 = vadd.s32 (%p158_p1), 120, %v1612_v46 }
 0x386   : > { %v488_v31 = vadd.f32 %v487_v59, %v486_v23  ;;  %1308 = vlog2.f32 %v513_v57 }
 0x388   : > { %v489_v30 = vrot.slane %v488_v31, 2 }
 0x38a   : > { %v490_v33 = vadd.f32 %v489_v30, %v488_v31 }
 0x38c   : > { %v491_v35 = vrot.slane %v490_v33, 1 }
 0x38e   : > { %v492_v51 = vadd.f32 %v491_v35, %v490_v33 }
 0x390   : > { %1310 = vlog2.f32 %v492_v51 }
 0x393   : > { %v1309_v61 = vpop.eup %1308 }
 0x394   : > { %v517_v28 = vmul.f32 0.6931472, %v1309_v61 }
 0x396   : > { %v519_v5 = vadd.f32 %v517_v28, %v1756_v58 }
 0x398   : > { %v525_v34 = vadd.f32 %v521_v2, %v519_v5 }
 0x39a   : > { %v533_v1 = vrot.slane %v525_v34, 7 }
 0x39d   : > { %v1311_v50 = vpop.eup %1310 }
 0x39e   : > { %v515_v19 = vmul.f32 0.6931472, %v1311_v50 }
 0x3a0   : > { %v518_v56 = vadd.f32 %v515_v19, %v1774_v39 }
 0x3a2   : > { %v524_v52 = vadd.f32 %v518_v56, %v165_v32 }
 0x3a4   : > { %v535_v44 = vsel %vm534_vm6, %v533_v1, %v524_v52 }
 0x3a5   : > { %v537_v29 = vmul.f32 %v535_v44, %v529_v9 }
 0x3a6   :  { %160 = sbr.rel (!%p158_p1) target bundleno = 644 (0x284), region = 94 }
 0x3a7   : > { %v545_v53 = vadd.f32 %v544_v63, %v537_v29 }
 0x3a9   : > { %v546_v58 = vsel %vm38_vm0, %v545_v53, -10000.0  }
 0x3aa   : > { %v2314_v45 = vmov %v546_v58  ;;  %v547_v39 = vsel (%p158_p1), %vm2289_vm2, %v546_v58, -inf }
 0x3ab   :  { %548 = vmax.xlane.f32.xlu0 %v547_v39 }
 0x434   :  { %v549_v40 = vpop.xlane.xlu0 %548 }
 0x435   :  { %v550_v45 = vsub.f32 %v546_v58, %v549_v40 }
 0x437   :  { %v551_v49 = vmul.f32 1.442695, %v550_v45 }
 0x439   :  { %1312 = vpow2.f32 %v551_v49 }
 0x446   :  { %v1313_v4 = vpop.eup %1312 }
 0x447   :  { %v553_v62 = vsel %vm2289_vm2, %v1313_v4, 0.0 }
 0x448   :  { %554 = vadd.xlane.f32.xlu0 %v553_v62 }
 0x4d1   :  { %v555_v21 = vpop.xlane.xlu0 %554 }
 0x4d2   :  { %1314 = vlog2.f32 %v555_v21 }
 0x4df   :  { %v1315_v37 = vpop.eup %1314 }
 0x4e0   :  { %v557_v23 = vmul.f32 0.6931472, %v1315_v37 }
 0x4e2   :  { %v558_v57 = vadd.f32 %v557_v23, %v549_v40 }
 0x4e4   :  { %v559_v59 = vsub.f32 %v558_v57, %v2305_v43 }
 0x4e6   :  { %v561_v31 = vsel %vm2288_vm7, %v559_v59, 0.0 }
 0x4e7   :  { %v562_v30 = vrot.slane %v561_v31, 4 }
 0x4e9   :  { %v563_v33 = vadd.f32 %v562_v30, %v561_v31 }
 0x4eb   :  { %v564_v35 = vrot.slane %v563_v33, 2 }
 0x4ed   :  { %v565_v51 = vadd.f32 %v564_v35, %v563_v33 }
 0x4ef   :  { %v566_v61 = vrot.slane %v565_v51, 1 }
 0x4f1   :  { %v567_v28 = vadd.f32 %v566_v61, %v565_v51 }
 0x4f3   :  { %v568_v32 = vmul.f32 0.5, %v567_v28 }
 0x4f5   :  { %570 = vst.msk [vmem:[#allocation3] sm:$0x1] %vm569_vm8, %v568_v32 }
 0x4f6 LB: > { %v2315_v17 = vld [vmem:[#allocation14_spill] sm:$0xff]  ;;  %v2316_v16 = vld [vmem:[#allocation13_spill] sm:$0xff]  ;;  %v2317_v15 = vld [vmem:[#allocation12_spill] sm:$0xff]  ;;  %v1418_v43 = vmov 0   ;;  %v2323_v5 = vsub.s32 0, %v1612_v46  ;;  %v2324_v50 = vsub.s32 1, %v1612_v46  ;;  %s1401_s23 = sphi %s1896_s23, %s595_s23   ;;  %v1397_v18 = vphi %v589_v18, %v2340_v18  }
 0x4f7   : > { %v2318_v14 = vld [vmem:[#allocation11_spill] sm:$0xff]  ;;  %v2319_v13 = vld [vmem:[#allocation10_spill] sm:$0xff]  ;;  %v2320_v12 = vld [vmem:[#allocation9_spill] sm:$0xff]  ;;  %1316 = vset.pattern.permute.xlu0 %v1418_v43  ;;  %s1907_s24 = sshll.u32 %s1401_s23, 1  ;;  %s595_s23 = sadd.s32 1, %s1401_s23  }
 0x4f8   : > { %v2321_v11 = vld [vmem:[#allocation8_spill] sm:$0xff]  ;;  %v2322_v10 = vld [vmem:[#allocation7_spill] sm:$0xff]  ;;  %v600_v2 = vrot.slane %v1397_v18, %v2323_v5  ;;  %v667_v19 = vrot.slane %v1397_v18, %v2324_v50  ;;  %s954_s27 = scalar_lea.vmem %s2238_s2, %s1907_s24  ;;  %s952_s3 = scalar_lea.vmem %s2236_s0, %s1907_s24 }
 0x4f9   : > { %v955_v34 = vld [vmem:[%s954_s27] sm:$0x3]  ;;  %s950_s30 = scalar_lea.vmem [#allocation2], %s1907_s24  ;;  %p592_p2 = scmp.ge.s32.totalorder %s595_s23, 8  }
 0x4fa   : > { %610 = vbcast.lane.b32.xlu1 %v600_v2, 272  ;;  %602 = vbcast.lane.b32.xlu0 %v600_v2, 256  ;;  %s2222_s6 = smov (%p592_p2), 0  }
 0x4fe   : > { %614 = vbcast.lane.b32.xlu1 %v600_v2, 280  ;;  %606 = vbcast.lane.b32.xlu0 %v600_v2, 264 }
 0x502   : > { %673 = vbcast.lane.b32.xlu1 %v667_v19, 264  ;;  %669 = vbcast.lane.b32.xlu0 %v667_v19, 256 }
 0x506   : > { %681 = vbcast.lane.b32.xlu1 %v667_v19, 280  ;;  %677 = vbcast.lane.b32.xlu0 %v667_v19, 272 }
 0x50a   : > { %622 = vbcast.lane.b32.xlu1 %v600_v2, 296  ;;  %618 = vbcast.lane.b32.xlu0 %v600_v2, 288 }
 0x50e   : > { %689 = vbcast.lane.b32.xlu1 %v667_v19, 296  ;;  %685 = vbcast.lane.b32.xlu0 %v667_v19, 288 }
 0x512   : > { %630 = vbcast.lane.b32.xlu1 %v600_v2, 312  ;;  %626 = vbcast.lane.b32.xlu0 %v600_v2, 304 }
 0x516   : > { %697 = vbcast.lane.b32.xlu1 %v667_v19, 312  ;;  %693 = vbcast.lane.b32.xlu0 %v667_v19, 304 }
 0x51a   : > { %638 = vbcast.lane.b32.xlu1 %v600_v2, 328  ;;  %634 = vbcast.lane.b32.xlu0 %v600_v2, 320 }
 0x51e   : > { %705 = vbcast.lane.b32.xlu1 %v667_v19, 328  ;;  %701 = vbcast.lane.b32.xlu0 %v667_v19, 320 }
 0x522   : > { %646 = vbcast.lane.b32.xlu1 %v600_v2, 344  ;;  %642 = vbcast.lane.b32.xlu0 %v600_v2, 336 }
 0x526   : > { %713 = vbcast.lane.b32.xlu1 %v667_v19, 344  ;;  %709 = vbcast.lane.b32.xlu0 %v667_v19, 336 }
 0x52a   : > { %654 = vbcast.lane.b32.xlu1 %v600_v2, 360  ;;  %650 = vbcast.lane.b32.xlu0 %v600_v2, 352 }
 0x52e   : > { %721 = vbcast.lane.b32.xlu1 %v667_v19, 360  ;;  %717 = vbcast.lane.b32.xlu0 %v667_v19, 352 }
 0x532   : > { %662 = vbcast.lane.b32.xlu1 %v600_v2, 376  ;;  %658 = vbcast.lane.b32.xlu0 %v600_v2, 368 }
 0x536   : > { %729 = vbcast.lane.b32.xlu1 %v667_v19, 376  ;;  %725 = vbcast.lane.b32.xlu0 %v667_v19, 368 }
 0x53a   : > { %958 = vperm.xlu0 %1316, %v955_v34  }
 0x56c   : > { %v611_v36 = vpop.permute.xlu1 %610  ;;  %v603_v56 = vpop.permute.xlu0 %602 }
 0x56d   : > { %v1914_v59 = vadd.f32 %v611_v36, %v2320_v12  ;;  %v1917_v31 = vadd.f32 %v603_v56, %v2322_v10 }
 0x56f   : > { %v763_v5 = vmax.f32 %v1917_v31, %v1914_v59 }
 0x570   : > { %v615_v52 = vpop.permute.xlu1 %614  ;;  %v607_v1 = vpop.permute.xlu0 %606 }
 0x571   : > { %v1920_v30 = vadd.f32 %v615_v52, %v2319_v13  ;;  %v1923_v33 = vadd.f32 %v607_v1, %v2321_v11 }
 0x573   : > { %v764_v2 = vmax.f32 %v1923_v33, %v1920_v30 }
 0x574   : > { %v674_v9 = vpop.permute.xlu1 %673  ;;  %v670_v63 = vpop.permute.xlu0 %669 }
 0x575   : > { %v1942_v50 = vadd.f32 %v674_v9, %v2321_v11  ;;  %v1948_v34 = vadd.f32 %v670_v63, %v2322_v10  ;;  %v2327_v10 = vld [vmem:[#allocation18_spill] sm:$0xff] }
 0x578   : > { %v682_v44 = vpop.permute.xlu1 %681  ;;  %v678_v29 = vpop.permute.xlu0 %677 }
 0x579   : > { %v1929_v28 = vadd.f32 %v682_v44, %v2319_v13  ;;  %v1932_v32 = vadd.f32 %v678_v29, %v2320_v12  ;;  %v2325_v44 = vld [vmem:[#allocation16_spill] sm:$0xff] }
 0x57b   : > { %v785_v63 = vmax.f32 %v1942_v50, %v1929_v28 }
 0x57c   : > { %v623_v53 = vpop.permute.xlu1 %622  ;;  %v619_v58 = vpop.permute.xlu0 %618 }
 0x57d   : > { %v1926_v35 = vadd.f32 %v623_v53, %v2317_v15  ;;  %v1935_v43 = vadd.f32 %v619_v58, %v2318_v14  ;;  %v784_v58 = vmax.f32 %v1948_v34, %v1932_v32 }
 0x57f   : > { %v766_v1 = vmax.f32 %v764_v2, %v1926_v35 }
 0x580   : > { %v690_v39 = vpop.permute.xlu1 %689  ;;  %v686_v40 = vpop.permute.xlu0 %685 }
 0x581   : > { %v1951_v36 = vadd.f32 %v690_v39, %v2317_v15  ;;  %v1954_v56 = vadd.f32 %v686_v40, %v2318_v14  ;;  %v765_v39 = vmax.f32 %v763_v5, %v1935_v43  ;;  %v2326_v40 = vld [vmem:[#allocation15_spill] sm:$0xff]  ;;  %v2328_v14 = vld [vmem:[#allocation17_spill] sm:$0xff]  ;;  %v2330_v15 = vld [vmem:[#allocation20_spill] sm:$0xff] }
 0x583   : > { %v787_v12 = vmax.f32 %v785_v63, %v1951_v36  ;;  %v786_v13 = vmax.f32 %v784_v58, %v1954_v56 }
 0x584   : > { %v631_v45 = vpop.permute.xlu1 %630  ;;  %v627_v49 = vpop.permute.xlu0 %626 }
 0x585   : > { %v1945_v19 = vadd.f32 %v631_v45, %v2315_v17  ;;  %v1957_v52 = vadd.f32 %v627_v49, %v2316_v16 }
 0x587   : > { %v768_v49 = vmax.f32 %v766_v1, %v1945_v19  ;;  %v767_v5 = vmax.f32 %v765_v39, %v1957_v52 }
 0x588   : > { %v698_v4 = vpop.permute.xlu1 %697  ;;  %v694_v62 = vpop.permute.xlu0 %693 }
 0x589   : > { %v1973_v2 = vadd.f32 %v698_v4, %v2315_v17  ;;  %v2331_v17 = vld [vmem:[#allocation19_spill] sm:$0xff] }
 0x58c   : > { %v639_v7 = vpop.permute.xlu1 %638  ;;  %v635_v18 = vpop.permute.xlu0 %634 }
 0x58d   : > { %v1961_v9 = vadd.f32 %v639_v7, %v2325_v44  ;;  %v1969_v45 = vadd.f32 %v635_v18, %v2326_v40  ;;  %v1976_v7 = vadd.f32 %v694_v62, %v2316_v16 }
 0x58f   : > { %v770_v1 = vmax.f32 %v768_v49, %v1961_v9  ;;  %v769_v58 = vmax.f32 %v767_v5, %v1969_v45  ;;  %v788_v49 = vmax.f32 %v786_v13, %v1976_v7 }
 0x590   : > { %v706_v21 = vpop.permute.xlu1 %705  ;;  %v702_v37 = vpop.permute.xlu0 %701 }
 0x591   : > { %v1989_v4 = vadd.f32 %v706_v21, %v2325_v44  ;;  %v1992_v62 = vadd.f32 %v702_v37, %v2326_v40 }
 0x593   : > { %2329 = vst [vmem:[#allocation21_spill] sm:$0xff] %v1989_v4  ;;  %v790_v5 = vmax.f32 %v788_v49, %v1992_v62 }
 0x594   : > { %v647_v23 = vpop.permute.xlu1 %646  ;;  %v643_v57 = vpop.permute.xlu0 %642 }
 0x595   : > { %v1979_v11 = vadd.f32 %v647_v23, %v2327_v10  ;;  %v1985_v18 = vadd.f32 %v643_v57, %v2328_v14  ;;  %v789_v57 = vmax.f32 %v787_v12, %v1973_v2 }
 0x597   : > { %v772_v21 = vmax.f32 %v770_v1, %v1979_v11  ;;  %v771_v37 = vmax.f32 %v769_v58, %v1985_v18  ;;  %v791_v40 = vmax.f32 %v789_v57, %v1989_v4 }
 0x598   : > { %v714_v51 = vpop.permute.xlu1 %713  ;;  %v710_v61 = vpop.permute.xlu0 %709 }
 0x599   : > { %v2005_v44 = vadd.f32 %v714_v51, %v2327_v10 }
 0x59b   : > { %2332 = vst [vmem:[#allocation22_spill] sm:$0xff] %v2005_v44 }
 0x59c   : > { %v655_v29 = vpop.permute.xlu1 %654  ;;  %v651_v53 = vpop.permute.xlu0 %650 }
 0x59d   : > { %v1995_v23 = vadd.f32 %v655_v29, %v2330_v15  ;;  %v1999_v39 = vadd.f32 %v651_v53, %v2331_v17  ;;  %v2009_v29 = vadd.f32 %v710_v61, %v2328_v14  ;;  %v793_v61 = vmax.f32 %v791_v40, %v2005_v44 }
 0x59f   : > { %2333 = vst [vmem:[#allocation23_spill] sm:$0xff] %v2009_v29  ;;  %v774_v53 = vmax.f32 %v772_v21, %v1995_v23  ;;  %v773_v1 = vmax.f32 %v771_v37, %v1999_v39  ;;  %v792_v58 = vmax.f32 %v790_v5, %v2009_v29 }
 0x5a0   : > { %v722_v16 = vpop.permute.xlu1 %721  ;;  %v718_v63 = vpop.permute.xlu0 %717 }
 0x5a1   : > { %v2015_v12 = vadd.f32 %v722_v16, %v2330_v15  ;;  %v2019_v10 = vadd.f32 %v718_v63, %v2331_v17 }
 0x5a3   : > { %2334 = vst [vmem:[#allocation24_spill] sm:$0xff] %v2015_v12  ;;  %v795_v57 = vmax.f32 %v793_v61, %v2015_v12  ;;  %v794_v17 = vmax.f32 %v792_v58, %v2019_v10 }
 0x5a4   : > { %v663_v13 = vpop.permute.xlu1 %662  ;;  %v659_v3 = vpop.permute.xlu0 %658 }
 0x5a5   : > { %v2022_v51 = vadd.f32 %v663_v13, %v1540_v25  ;;  %v2025_v14 = vadd.f32 %v659_v3, %v1535_v24 }
 0x5a7   : > { %v776_v15 = vmax.f32 %v774_v53, %v2022_v51  ;;  %v775_v16 = vmax.f32 %v773_v1, %v2025_v14 }
 0x5a8   : > { %v730_v49 = vpop.permute.xlu1 %729  ;;  %v726_v21 = vpop.permute.xlu0 %725 }
 0x5a9   : > { %v777_v63 = vmax.f32 %v775_v16, %v776_v15  ;;  %v2034_v37 = vadd.f32 %v730_v49, %v1540_v25  ;;  %v2037_v3 = vadd.f32 %v726_v21, %v1535_v24 }
 0x5ab   : > { %v778_v40 = vrot.slane %v777_v63, 4  ;;  %v797_v5 = vmax.f32 %v795_v57, %v2034_v37  ;;  %v796_v53 = vmax.f32 %v794_v17, %v2037_v3 }
 0x5ad   : > { %v779_v13 = vmax.f32 %v777_v63, %v778_v40  ;;  %v798_v1 = vmax.f32 %v796_v53, %v797_v5 }
 0x5af   : > { %v780_v61 = vrot.slane %v779_v13, 2  ;;  %v799_v12 = vrot.slane %v798_v1, 4 }
 0x5b1   : > { %v781_v44 = vmax.f32 %v779_v13, %v780_v61  ;;  %v800_v4 = vmax.f32 %v798_v1, %v799_v12  ;;  %v953_v12 = vld [vmem:[%s952_s3] sm:$0x3] }
 0x5b3   : > { %v782_v29 = vrot.slane %v781_v44, 1  ;;  %v801_v15 = vrot.slane %v800_v4, 2 }
 0x5b5   : > { %v2041_v58 = vmax.f32 %v781_v44, %v782_v29  ;;  %v959_v44 = vpop.permute.xlu0 %958 }
 0x5b7   : > { %vm805_vm9 = vcmp.ge.f32.partialorder %v1917_v31, %v2041_v58  ;;  %vm806_vm10 = vcmp.ge.f32.partialorder %v1923_v33, %v2041_v58  ;;  %vm807_vm11 = vcmp.ge.f32.partialorder %v1914_v59, %v2041_v58  ;;  %vm808_vm12 = vcmp.ge.f32.partialorder %v1920_v30, %v2041_v58 }
 0x5b8   : > { %v837_v29 = vsel %vm805_vm9, %v1612_v46, 128  ;;  %v838_v16 = vsel %vm806_vm10, %v1843_v60, 128  ;;  %v839_v57 = vsel %vm807_vm11, %v1846_v54, 128  ;;  %v840_v49 = vsel %vm808_vm12, %v1849_v47, 128 }
 0x5b9   : > { %vm809_vm13 = vcmp.ge.f32.partialorder %v1935_v43, %v2041_v58  ;;  %vm810_vm14 = vcmp.ge.f32.partialorder %v1926_v35, %v2041_v58  ;;  %v802_v59 = vmax.f32 %v800_v4, %v801_v15  ;;  %v2063_v31 = vmul.f32 %v959_v44, %v953_v12 }
 0x5ba   : > { %vm811_vm15 = vcmp.ge.f32.partialorder %v1957_v52, %v2041_v58  ;;  %vm812_vm1 = vcmp.ge.f32.partialorder %v1945_v19, %v2041_v58  ;;  %vm813_vm3 = vcmp.ge.f32.partialorder %v1969_v45, %v2041_v58  ;;  %vm814_vm4 = vcmp.ge.f32.partialorder %v1961_v9, %v2041_v58 }
 0x5bb   : > { %vm815_vm5 = vcmp.ge.f32.partialorder %v1985_v18, %v2041_v58  ;;  %vm816_vm8 = vcmp.ge.f32.partialorder %v1979_v11, %v2041_v58  ;;  %vm869_vm9 = vcmp.lt.s32.totalorder %v837_v29, %v839_v57  ;;  %vm871_vm10 = vcmp.lt.s32.totalorder %v838_v16, %v840_v49 }
 0x5bc   : > { %v841_v30 = vsel %vm809_vm13, %v1852_v26, 128  ;;  %v842_v33 = vsel %vm810_vm14, %v1858_v48, 128  ;;  %v870_v35 = vsel %vm869_vm9, %v837_v29, %v839_v57  ;;  %v872_v43 = vsel %vm871_vm10, %v838_v16, %v840_v49 }
 0x5bd   : > { %vm817_vm11 = vcmp.ge.f32.partialorder %v1999_v39, %v2041_v58  ;;  %v843_v19 = vsel %vm811_vm15, %v1861_v22, 128  ;;  %vm873_vm12 = vcmp.lt.s32.totalorder %v870_v35, %v841_v30  ;;  %vm875_vm7 = vcmp.lt.s32.totalorder %v872_v43, %v842_v33 }
 0x5be   : > { %v844_v52 = vsel %vm812_vm1, %v1864_v42, 128  ;;  %v874_v4 = vsel %vm873_vm12, %v870_v35, %v841_v30  ;;  %v876_v21 = vsel %vm875_vm7, %v872_v43, %v842_v33  ;;  %v803_v17 = vrot.slane %v802_v59, 1 }
 0x5bf   : > { %vm818_vm2 = vcmp.ge.f32.partialorder %v1995_v23, %v2041_v58  ;;  %vm819_vm13 = vcmp.ge.f32.partialorder %v2025_v14, %v2041_v58  ;;  %vm877_vm14 = vcmp.lt.s32.totalorder %v874_v4, %v843_v19  ;;  %vm879_vm9 = vcmp.lt.s32.totalorder %v876_v21, %v844_v52 }
 0x5c0   : > { %v845_v63 = vsel %vm813_vm3, %v1867_v8, 128  ;;  %v846_v40 = vsel %vm814_vm4, %v1870_v6, 128  ;;  %v878_v5 = vsel %vm877_vm14, %v874_v4, %v843_v19  ;;  %v880_v53 = vsel %vm879_vm9, %v876_v21, %v844_v52  ;;  %v2338_v19 = vld [vmem:[#allocation24_spill] sm:$0xff] }
 0x5c1   : > { %vm820_vm7 = vcmp.ge.f32.partialorder %v2022_v51, %v2041_v58  ;;  %v847_v13 = vsel %vm815_vm5, %v1873_v27, 128  ;;  %vm881_vm15 = vcmp.lt.s32.totalorder %v878_v5, %v845_v63  ;;  %vm883_vm1 = vcmp.lt.s32.totalorder %v880_v53, %v846_v40 }
 0x5c2   : > { %v848_v45 = vsel %vm816_vm8, %v1876_v41, 128  ;;  %v882_v1 = vsel %vm881_vm15, %v878_v5, %v845_v63  ;;  %v884_v9 = vsel %vm883_vm1, %v880_v53, %v846_v40  ;;  %v2105_v61 = vmax.f32 %v802_v59, %v803_v17  ;;  %v2336_v59 = vld [vmem:[#allocation23_spill] sm:$0xff] }
 0x5c3   : > { %v849_v51 = vsel %vm817_vm11, %v1879_v38, 128  ;;  %vm885_vm3 = vcmp.lt.s32.totalorder %v882_v1, %v847_v13  ;;  %vm887_vm4 = vcmp.lt.s32.totalorder %v884_v9, %v848_v45  ;;  %v850_v18 = vsel %vm818_vm2, %v1882_v20, 128 }
 0x5c4   : > { %v851_v11 = vsel %vm819_vm13, %v1885_v0, 128  ;;  %v886_v15 = vsel %vm885_vm3, %v882_v1, %v847_v13  ;;  %v888_v12 = vsel %vm887_vm4, %v884_v9, %v848_v45  ;;  %v852_v44 = vsel %vm820_vm7, %v1888_v55, 128 }
 0x5c5   : > { %vm889_vm5 = vcmp.lt.s32.totalorder %v886_v15, %v849_v51  ;;  %vm891_vm8 = vcmp.lt.s32.totalorder %v888_v12, %v850_v18  ;;  %v963_v39 = vrot.slane %v2063_v31, 1  ;;  %vm821_vm10 = vcmp.ge.f32.partialorder %v1948_v34, %v2105_v61 }
 0x5c6   : > { %v890_v29 = vsel %vm889_vm5, %v886_v15, %v849_v51  ;;  %v892_v16 = vsel %vm891_vm8, %v888_v12, %v850_v18  ;;  %vm823_vm2 = vcmp.ge.f32.partialorder %v1932_v32, %v2105_v61  ;;  %vm822_vm13 = vcmp.ge.f32.partialorder %v1942_v50, %v2105_v61 }
 0x5c7   : > { %vm893_vm11 = vcmp.lt.s32.totalorder %v890_v29, %v851_v11  ;;  %vm895_vm12 = vcmp.lt.s32.totalorder %v892_v16, %v852_v44  ;;  %vm824_vm14 = vcmp.ge.f32.partialorder %v1929_v28, %v2105_v61  ;;  %vm825_vm9 = vcmp.ge.f32.partialorder %v1954_v56, %v2105_v61 }
 0x5c8   : > { %v894_v23 = vsel %vm893_vm11, %v890_v29, %v851_v11  ;;  %v896_v14 = vsel %vm895_vm12, %v892_v16, %v852_v44  ;;  %v966_v57 = vadd.f32 %v2063_v31, %v2041_v58  ;;  %vm826_vm15 = vcmp.ge.f32.partialorder %v1951_v36, %v2105_v61  ;;  %v2335_v58 = vld [vmem:[#allocation21_spill] sm:$0xff]  ;;  %v2337_v31 = vld [vmem:[#allocation22_spill] sm:$0xff] }
 0x5c9   : > { %vm897_vm7 = vcmp.lt.s32.totalorder %v894_v23, %v896_v14  ;;  %v853_v32 = vsel %vm821_vm10, %v1612_v46, 128  ;;  %v855_v34 = vsel %vm823_vm2, %v1846_v54, 128  ;;  %vm827_vm1 = vcmp.ge.f32.partialorder %v1976_v7, %v2105_v61 }
 0x5ca   : > { %v898_v50 = vsel %vm897_vm7, %v894_v23, %v896_v14  ;;  %v854_v28 = vsel %vm822_vm13, %v1843_v60, 128  ;;  %v856_v49 = vsel %vm824_vm14, %v1849_v47, 128  ;;  %vm828_vm3 = vcmp.ge.f32.partialorder %v1973_v2, %v2105_v61 }
 0x5cb   : > { %vm829_vm4 = vcmp.ge.f32.partialorder %v1992_v62, %v2105_v61  ;;  %vm830_vm5 = vcmp.ge.f32.partialorder %v2335_v58, %v2105_v61  ;;  %vm831_vm8 = vcmp.ge.f32.partialorder %v2336_v59, %v2105_v61  ;;  %vm832_vm10 = vcmp.ge.f32.partialorder %v2337_v31, %v2105_v61 }
 0x5cc   : > { %vm833_vm2 = vcmp.ge.f32.partialorder %v2019_v10, %v2105_v61  ;;  %v857_v30 = vsel %vm825_vm9, %v1852_v26, 128  ;;  %vm908_vm11 = vcmp.lt.s32.totalorder %v853_v32, %v855_v34  ;;  %v899_v33 = vrot.slane %v898_v50, 4 }
 0x5cd   : > { %v909_v35 = vsel %vm908_vm11, %v853_v32, %v855_v34  ;;  %vm910_vm12 = vcmp.lt.s32.totalorder %v854_v28, %v856_v49  ;;  %v967_v43 = vadd.f32 %v963_v39, %v2105_v61  ;;  %vm834_vm13 = vcmp.ge.f32.partialorder %v2338_v19, %v2105_v61 }
 0x5ce   : > { %v858_v52 = vsel %vm826_vm15, %v1858_v48, 128  ;;  %v911_v4 = vsel %vm910_vm12, %v854_v28, %v856_v49  ;;  %vm912_vm14 = vcmp.lt.s32.totalorder %v909_v35, %v857_v30  ;;  %v859_v56 = vsel %vm827_vm1, %v1861_v22, 128 }
 0x5cf   : > { %v913_v21 = vsel %vm912_vm14, %v909_v35, %v857_v30  ;;  %vm914_vm9 = vcmp.lt.s32.totalorder %v911_v4, %v858_v52  ;;  %v970_v17 = vrot.slane %v967_v43, 7  ;;  %v860_v63 = vsel %vm828_vm3, %v1864_v42, 128  ;;  %v2342_v35 = vld [vmem:[#allocation6_spill] sm:$0xff] (%p592_p2) }
 0x5d0   : > { %v861_v36 = vsel %vm829_vm4, %v1867_v8, 128  ;;  %v915_v40 = vsel %vm914_vm9, %v911_v4, %v858_v52  ;;  %vm916_vm7 = vcmp.lt.s32.totalorder %v913_v21, %v859_v56  ;;  %vm900_vm15 = vcmp.lt.s32.totalorder %v898_v50, %v899_v33 }
 0x5d1   : > { %v917_v5 = vsel %vm916_vm7, %v913_v21, %v859_v56  ;;  %vm918_vm11 = vcmp.lt.s32.totalorder %v915_v40, %v860_v63  ;;  %v971_v7 = vsel %vm534_vm6, %v970_v17, %v966_v57  ;;  %v862_v53 = vsel %vm830_vm5, %v1870_v6, 128 }
 0x5d2   : > { %v919_v13 = vsel %vm918_vm11, %v915_v40, %v860_v63  ;;  %vm920_vm1 = vcmp.lt.s32.totalorder %v917_v5, %v861_v36  ;;  %v973_v45 = vsel %vm38_vm0, %v971_v7, -1e+09   ;;  %vm835_vm3 = vcmp.ge.f32.partialorder %v2037_v3, %v2105_v61 }
 0x5d3   : > { %v863_v62 = vsel %vm831_vm8, %v1873_v27, 128  ;;  %v921_v1 = vsel %vm920_vm1, %v917_v5, %v861_v36  ;;  %vm922_vm4 = vcmp.lt.s32.totalorder %v919_v13, %v862_v53  ;;  %v901_v9 = vsel %vm900_vm15, %v898_v50, %v899_v33 }
 0x5d4   : > { %v864_v51 = vsel %vm832_vm10, %v1876_v41, 128  ;;  %v923_v18 = vsel %vm922_vm4, %v919_v13, %v862_v53  ;;  %vm924_vm5 = vcmp.lt.s32.totalorder %v921_v1, %v863_v62  ;;  %vm836_vm12 = vcmp.ge.f32.partialorder %v2034_v37, %v2105_v61 }
 0x5d5   : > { %v865_v11 = vsel %vm833_vm2, %v1879_v38, 128  ;;  %v925_v15 = vsel %vm924_vm5, %v921_v1, %v863_v62  ;;  %vm926_vm8 = vcmp.lt.s32.totalorder %v923_v18, %v864_v51  ;;  %v866_v12 = vsel %vm834_vm13, %v1882_v20, 128 }
 0x5d6   : > { %v927_v44 = vsel %vm926_vm8, %v923_v18, %v864_v51  ;;  %vm928_vm14 = vcmp.lt.s32.totalorder %v925_v15, %v865_v11  ;;  %v902_v39 = vrot.slane %v901_v9, 2  ;;  %v867_v37 = vsel %vm835_vm3, %v1885_v0, 128 }
 0x5d7   : > { %v929_v29 = vsel %vm928_vm14, %v925_v15, %v865_v11  ;;  %vm930_vm10 = vcmp.lt.s32.totalorder %v927_v44, %v866_v12  ;;  %v868_v10 = vsel %vm836_vm12, %v1888_v55, 128  ;;  %v2340_v18 = vmov %v973_v45 }
 0x5d8   : > { %v931_v16 = vsel %vm930_vm10, %v927_v44, %v866_v12  ;;  %vm932_vm2 = vcmp.lt.s32.totalorder %v929_v29, %v867_v37  ;;  %vm903_vm7 = vcmp.lt.s32.totalorder %v901_v9, %v902_v39  ;;  %vm2341_vm4 = vcmask (%p592_p2), 1041408  }
 0x5d9   : > { %v933_v23 = vsel %vm932_vm2, %v929_v29, %v867_v37  ;;  %vm934_vm9 = vcmp.lt.s32.totalorder %v931_v16, %v868_v10  ;;  %v904_v34 = vsel %vm903_vm7, %v901_v9, %v902_v39  ;;  %v974_v30 = vsel (%p592_p2), %vm2341_vm4, %v973_v45, -inf  ;;  %vm2343_vm12 = vmmov (%p592_p2), %vm2341_vm4 }
 0x5da   : > { %v935_v14 = vsel %vm934_vm9, %v931_v16, %v868_v10  ;;  %v905_v28 = vrot.slane %v904_v34, 1  ;;  %975 = vmax.xlane.f32.xlu0 (%p592_p2), %v974_v30  ;;  %vm2344_vm0 = vcmask (%p592_p2), 1024  }
 0x5db   : > { %vm936_vm15 = vcmp.lt.s32.totalorder %v933_v23, %v935_v14 }
 0x5dc   : > { %v937_v57 = vsel %vm936_vm15, %v933_v23, %v935_v14  ;;  %vm906_vm1 = vcmp.lt.s32.totalorder %v904_v34, %v905_v28 }
 0x5dd   : > { %v938_v32 = vrot.slane %v937_v57, 4  ;;  %v907_v58 = vsel %vm906_vm1, %v904_v34, %v905_v28 }
 0x5df   : > { %vm939_vm13 = vcmp.lt.s32.totalorder %v937_v57, %v938_v32 }
 0x5e0   : > { %v940_v50 = vsel %vm939_vm13, %v937_v57, %v938_v32 }
 0x5e1   : > { %v941_v3 = vrot.slane %v940_v50, 2 }
 0x5e3   : > { %vm942_vm11 = vcmp.lt.s32.totalorder %v940_v50, %v941_v3 }
 0x5e4   : > { %v943_v61 = vsel %vm942_vm11, %v940_v50, %v941_v3 }
 0x5e5   : > { %v944_v49 = vrot.slane %v943_v61, 1 }
 0x5e6   :  { %594 = sbr.rel (!%p592_p2) target bundleno = 1270 (0x4f6), region = 105 }
 0x5e7   : > { %vm945_vm3 = vcmp.lt.s32.totalorder %v943_v61, %v944_v49 }
 0x5e8   : > { %v946_v59 = vsel %vm945_vm3, %v943_v61, %v944_v49 }
 0x5e9   : > { %v948_v31 = vsel %vm534_vm6, %v946_v59, %v907_v58 }
 0x5ea   : > { %951 = vst [vmem:[%s950_s30] sm:$0x3] %v948_v31 }
 0x663   :  { %v976_v33 = vpop.xlane.xlu0 %975 }
 0x664   :  { %vm977_vm5 = vcmp.ge.f32.partialorder %v973_v45, %v976_v33 }
 0x665   :  { %v978_v43 = vsel %vm977_vm5, %v2342_v35, 128 }
 0x666   :  { %v979_v19 = vsel %vm2343_vm12, %v978_v43, 2147483647 }
 0x667   :  { %v981_v52 = vshra.s32 %v979_v19, 16  ;;  %v980_v56 = vand.u32 65535, %v979_v19 }
 0x669   :  { %v983_v4 = vcvt.s32.f32 %v981_v52  ;;  %v982_v17 = vcvt.s32.f32 %v980_v56 }
 0x66b   :  { %984 = vmin.xlane.f32.xlu0 %v983_v4 }
 0x6f4   :  { %v985_v21 = vpop.xlane.xlu0 %984 }
 0x6f5   :  { %vm986_vm8 = vcmp.eq.f32.partialorder %v983_v4, %v985_v21  ;;  %v991_v36 = vcvt.f32.s32 %v985_v21 }
 0x6f6   :  { %v987_v63 = vsel %vm986_vm8, %v982_v17, inf }
 0x6f7   :  { %988 = vmin.xlane.f32.xlu1 %v987_v63  ;;  %v992_v24 = vshll.u32 %v991_v36, 16 }
 0x780   :  { %v989_v40 = vpop.xlane.xlu1 %988 }
 0x781   :  { %v990_v25 = vcvt.f32.s32 %v989_v40 }
 0x783   :  { %v993_v46 = vadd.s32 %v992_v24, %v990_v25  }
 0x785   :  { %1104 = vst.msk [vmem:[%s2241_s5 + $0xe] sm:$0x3] %vm2344_vm0, %v993_v46  ;;  %v1403_v60 = vmov %v993_v46  }
 0x786 LB: > { %s1005_s7 = ssub.s32 7, %s1409_s6  ;;  %v2345_v54 = vld [vmem:[#allocation6_spill] sm:$0xff]  ;;  %vm2346_vm14 = vcmask 1041408   ;;  %s1003_s10 = ssub.s32 6, %s1409_s6  ;;  %vm2347_vm10 = vcmask 1024   ;;  %s1409_s6 = sphi %s2222_s6, %s1001_s6   ;;  %v1405_v60 = vphi %v1403_v60, %v1022_v60  }
 0x787   : > { %vm1004_vm6 = vcmp.eq.s32.totalorder %v2345_v54, %v1405_v60  ;;  %s1105_s8 = sshll.u32 %s1005_s7, 1  ;;  %s1106_s11 = sshll.u32 %s1003_s10, 1 }
 0x788   : > { %s1007_s9 = scalar_lea.vmem [#allocation2], %s1105_s8  ;;  %s1024_s14 = scalar_lea.vmem %s2241_s5, %s1106_s11 }
 0x789   : > { %v1008_v47 = vld [vmem:[%s1007_s9] sm:$0x3]  ;;  %s1001_s6 = sadd.s32 1, %s1409_s6  }
 0x78a   : > { %v1009_v26 = vsel %vm1004_vm6, %v1008_v47, 0  ;;  %p998_p3 = scmp.ge.s32.totalorder %s1001_s6, 7  }
 0x78b   : > { %v1010_v48 = vsel %vm2346_vm14, %v1009_v26, 0  ;;  %s1419_s1 = smov (%p998_p3), [#allocation3]  }
 0x78c   : > { %v1012_v22 = vshrl.u32 %v1010_v48, 16  ;;  %v1011_v42 = vand.u32 65535, %v1010_v48  ;;  %s1032_s15 = sshll.u32 (%p998_p3), %s1419_s1, 4  ;;  %s1033_s15 = int_to_ptr.vmem [resolvable:$true] %s1032_s15 }
 0x78d   :  { %s1317_s16 = scalar_lea.vmem (%p998_p3), %s1033_s15, 16  ;;  %s1321_s17 = scalar_lea.vmem (%p998_p3), %s1033_s15, 32 }
 0x78e   : > { %v1014_v8 = vcvt.s32.f32 %v1012_v22  ;;  %v1013_v6 = vcvt.s32.f32 %v1011_v42  ;;  %p1318_p4 = scmp.ne.s32.totalorder (%p998_p3), %s1033_s15, %s1317_s16  ;;  %p1322_p5 = scmp.lt.s32.totalorder (%p998_p3), %s1033_s15, %s1033_s15 }
 0x78f   :  { %p1323_p6 = scmp.lt.s32.totalorder (%p998_p3), %s1321_s17, %s1317_s16 }
 0x790   : > { %1017 = vadd.xlane.f32.xlu0 %v1014_v8 }
 0x791   :  { %p1324_p7 = por (%p998_p3), %p1323_p6, %p1322_p5 }
 0x793   :  { %p1325_p8 = pnand (%p998_p3), %p1324_p7, %p1318_p4 }
 0x794   : > { %1015 = vadd.xlane.f32.xlu0 %v1013_v6 }
 0x819   : > { %v1018_v27 = vpop.xlane.xlu0 %1017 }
 0x81a   : > { %v1020_v41 = vcvt.f32.s32 %v1018_v27 }
 0x81c   : > { %v1021_v20 = vshll.u32 %v1020_v41, 16 }
 0x81d   : > { %v1016_v38 = vpop.xlane.xlu0 %1015 }
 0x81e   : > { %v1019_v0 = vcvt.f32.s32 %v1016_v38  ;;  %1000 = sbr.rel (!%p998_p3) target bundleno = 1926 (0x786), region = 116 }
 0x820   : > { %v1022_v60 = vadd.s32 %v1021_v20, %v1019_v0  }
 0x822   : > { %1025 = vst.msk [vmem:[%s1024_s14] sm:$0x3] %vm2347_vm10, %v1022_v60 }
 0x823   :  { %1328 = shalt.err (!%p1325_p8)
}
 0x824   :  { %1035 = dma.vmem_to_hbm [thread:$0]  %s1033_s15, 16, %s2240_s4, [#allocation4]  }
 0x825   :  { %1373 = dma.done.wait [#allocation4], 16  }
 0x826   :  { %1374 = vsyncadd [#allocation4], 4294967280 }
 0x827   :  { %1043 = vsyncpa [#allocation4], 1 }

</bundles_post_ra>
